<compile_context>
chip_gen: v7x
topology: tpu7x:2x2x1
jax: 0.10.0
libtpu: 0.0.40
codegen_flags: <defaults>
</compile_context>

<pallas_src>
import functools

import jax
import jax.numpy as jnp
from jax.experimental import pallas as pl
from jax.experimental.pallas import tpu as pltpu

BN_EPS = 1e-5
_LANE = 128
_SUBLANE = 8
_TILE_BUDGET_BYTES = 16 * 1024 * 1024   # per-step working-set cap (v7x-safe)


def _round_up(x, m):
    return (x + m - 1) // m * m


def _cdiv(a, b):
    return -(-a // b)


def _pick_vmem_limit_bytes():
    # Generation-aware scoped-VMEM limit: half of physical, capped at 64 MiB.
    #   v5e / v6e (128 MiB physical) -> 64 MiB ; v7x (64 MiB physical) -> 32 MiB.
    try:
        cap = pltpu.get_tpu_info().vmem_capacity_bytes
    except Exception:
        cap = 128 * 1024 * 1024
    return max(min(cap // 2, 64 * 1024 * 1024), 16 * 1024 * 1024)


_VMEM_LIMIT_BYTES = _pick_vmem_limit_bytes()


def _compiler_params(semantics):
    return pltpu.CompilerParams(
        dimension_semantics=semantics,
        vmem_limit_bytes=_VMEM_LIMIT_BYTES,
    )


# ---------------------------------------------------------------------------
# Pallas kernels
# ---------------------------------------------------------------------------
def _matmul_lrelu_kernel(p_ref, w_ref, o_ref, *, slope):
    # bf16 x bf16 -> f32 accumulator on the MXU; leaky-relu epilogue; bf16 store.
    acc = jnp.dot(p_ref[...], w_ref[...], preferred_element_type=jnp.float32)
    o_ref[...] = jnp.maximum(acc, slope * acc).astype(o_ref.dtype)


def _matmul_bn_lrelu_kernel(p_ref, w_ref, g_ref, b_ref, o_ref, *, slope, inv_m):
    # Fully fused BN layer (single grid step, all M rows resident in VMEM):
    #   matmul -> per-channel batch mean / E[x^2] -> scale/shift -> lrelu -> bf16.
    # Zero-padded rows / K-columns / channels contribute nothing to the sums;
    # dividing by the real row count m (inv_m) gives the exact batch statistics.
    acc = jnp.dot(p_ref[...], w_ref[...], preferred_element_type=jnp.float32)
    mean = jnp.sum(acc, axis=0, keepdims=True) * inv_m            # (1, cp)
    ex2 = jnp.sum(acc * acc, axis=0, keepdims=True) * inv_m       # (1, cp)
    var = jnp.maximum(ex2 - mean * mean, 0.0)   # clamp f32 cancellation (no NaN)
    scale = g_ref[...] * jax.lax.rsqrt(var + BN_EPS)
    shift = b_ref[...] - mean * scale
    y = acc * scale + shift
    o_ref[...] = jnp.maximum(y, slope * y).astype(o_ref.dtype)


# ---------------------------------------------------------------------------
# JAX glue: im2col + padding + pallas_call dispatch
# ---------------------------------------------------------------------------
def _im2col(x_nhwc, kh, kw, stride, pad):
    n, h, w, c = x_nhwc.shape
    xp = jnp.pad(x_nhwc, ((0, 0), (pad, pad), (pad, pad), (0, 0)))
    ho = (h + 2 * pad - kh) // stride + 1
    wo = (w + 2 * pad - kw) // stride + 1
    cols = []
    for i in range(kh):
        for j in range(kw):
            cols.append(xp[:, i:i + stride * ho:stride, j:j + stride * wo:stride, :])
    patches = jnp.stack(cols, axis=3)                       # (N, Ho, Wo, kh*kw, C)
    return patches.reshape(n * ho * wo, kh * kw * c), ho, wo


def conv_block(x_nhwc, w_oihw, gamma=None, beta=None, *, stride, pad, slope=0.2):
    n, h, w, cin = x_nhwc.shape
    cout, cin_w, kh, kw = w_oihw.shape
    assert cin == cin_w
    use_bn = gamma is not None

    # bf16 im2col (activations already bf16 after layer 1; cast is a no-op then).
    patches, ho, wo = _im2col(x_nhwc.astype(jnp.bfloat16), kh, kw, stride, pad)
    m = n * ho * wo
    k = kh * kw * cin
    kp = _round_up(k, _LANE)
    cp = _round_up(cout, _LANE)
    # TODO(synk): at real DCGAN widths (ndf=64 -> K up to 8192) also tile K with
    # an "arbitrary" grid axis + f32 VMEM accumulator and widen cp tiles to 256.

    if use_bn:
        # Fused kernel needs every M row in one block for the batch statistics.
        # At these sizes the whole layer is a few MiB of VMEM at most.
        nt = 1
        tm = _round_up(max(m, _SUBLANE), _SUBLANE)
    else:
        # No cross-row coupling: split M into >=2 "parallel" tiles so v7x
        # megacore can shard across both TensorCores; grow nt only if a tile
        # would bust the per-step working-set budget.
        nt = 2 if m >= 2 * _SUBLANE else 1
        while True:
            tm = _round_up(_cdiv(m, nt), _SUBLANE)
            need = (2 * tm * kp * 2          # double-buffered bf16 patch tile
                    + 2 * kp * cp * 2        # double-buffered bf16 weights
                    + 2 * tm * cp * 2        # double-buffered bf16 output tile
                    + tm * cp * 4)           # f32 accumulator headroom
            if need <= _TILE_BUDGET_BYTES or tm == _SUBLANE:
                break
            nt += 1
    mp = tm * nt

    patches_p = jnp.pad(patches, ((0, mp - m), (0, kp - k)))
    w_mat = jnp.transpose(w_oihw, (2, 3, 1, 0)).reshape(k, cout).astype(jnp.bfloat16)
    w_p = jnp.pad(w_mat, ((0, kp - k), (0, cp - cout)))

    p_spec = pl.BlockSpec((tm, kp), lambda i: (i, 0))
    w_spec = pl.BlockSpec((kp, cp), lambda i: (0, 0))
    o_spec = pl.BlockSpec((tm, cp), lambda i: (i, 0))

    if not use_bn:
        out = pl.pallas_call(
            functools.partial(_matmul_lrelu_kernel, slope=slope),
            out_shape=jax.ShapeDtypeStruct((mp, cp), jnp.bfloat16),
            grid=(nt,),
            in_specs=[p_spec, w_spec],
            out_specs=o_spec,
            compiler_params=_compiler_params(("parallel",)),
        )(patches_p, w_p)
    else:
        g_p = jnp.pad(gamma.astype(jnp.float32), (0, cp - cout)).reshape(1, cp)
        b_p = jnp.pad(beta.astype(jnp.float32), (0, cp - cout)).reshape(1, cp)
        out = pl.pallas_call(
            functools.partial(_matmul_bn_lrelu_kernel, slope=slope,
                              inv_m=1.0 / float(m)),
            out_shape=jax.ShapeDtypeStruct((mp, cp), jnp.bfloat16),
            grid=(nt,),  # nt == 1: single fused step
            in_specs=[p_spec, w_spec,
                      pl.BlockSpec((1, cp), lambda i: (0, 0)),
                      pl.BlockSpec((1, cp), lambda i: (0, 0))],
            out_specs=o_spec,
            compiler_params=_compiler_params(("arbitrary",)),
        )(patches_p, w_p, g_p, b_p)

    # Padded rows/channels are sliced away here; nothing downstream sees them.
    return out[:m, :cout].reshape(n, ho, wo, cout)


def _small_conv(x_nhwc, w_oihw, *, stride, pad):
    # conv5 / conv6: tiny (Cout = 1, a handful of rows) -> plain XLA matmul.
    n = x_nhwc.shape[0]
    cout, cin, kh, kw = w_oihw.shape
    patches, ho, wo = _im2col(x_nhwc.astype(jnp.float32), kh, kw, stride, pad)
    w_mat = jnp.transpose(w_oihw, (2, 3, 1, 0)).reshape(kh * kw * cin, cout)
    y = patches @ w_mat.astype(jnp.float32)
    return y.reshape(n, ho, wo, cout)


# ---------------------------------------------------------------------------
# Discriminator forward (parameters initialized deterministically in-script).
# ---------------------------------------------------------------------------
def init_params(key, nc, ndf):
    def conv_w(k, cout, cin, kh, kw):
        return 0.02 * jax.random.normal(k, (cout, cin, kh, kw), jnp.float32)

    ks = jax.random.split(key, 6)
    return {
        'w1': conv_w(ks[0], ndf, nc, 4, 4),
        'w2': conv_w(ks[1], ndf * 2, ndf, 4, 4),
        'w3': conv_w(ks[2], ndf * 4, ndf * 2, 4, 4),
        'w4': conv_w(ks[3], ndf * 8, ndf * 4, 4, 4),
        'w5': conv_w(ks[4], 1, ndf * 8, 4, 4),
        'w6': conv_w(ks[5], 1, 1, 2, 2),
        'g2': jnp.ones((ndf * 2,), jnp.float32), 'b2': jnp.zeros((ndf * 2,), jnp.float32),
        'g3': jnp.ones((ndf * 4,), jnp.float32), 'b3': jnp.zeros((ndf * 4,), jnp.float32),
        'g4': jnp.ones((ndf * 8,), jnp.float32), 'b4': jnp.zeros((ndf * 8,), jnp.float32),
    }


def discriminator_forward(x_nchw, p):
    x = jnp.transpose(x_nchw, (0, 2, 3, 1))                                   # NCHW -> NHWC
    x = conv_block(x, p['w1'], stride=2, pad=1, slope=0.2)                    # conv1 + lrelu
    x = conv_block(x, p['w2'], p['g2'], p['b2'], stride=2, pad=1, slope=0.2)  # conv2 + BN + lrelu
    x = conv_block(x, p['w3'], p['g3'], p['b3'], stride=2, pad=1, slope=0.2)  # conv3 + BN + lrelu
    x = conv_block(x, p['w4'], p['g4'], p['b4'], stride=2, pad=1, slope=0.2)  # conv4 + BN + lrelu
    y = _small_conv(x, p['w5'], stride=1, pad=0)
    y = jnp.maximum(y, 0.01 * y)                          # F.leaky_relu default slope
    y = _small_conv(y, p['w6'], stride=1, pad=0)
    y = jax.nn.sigmoid(y)
    # y is (N, 1, 1, 1) NHWC; PyTorch squeeze(1)x3 on (N,1,1,1) NCHW -> (N,)
    return y.reshape(y.shape[0])


if __name__ == "__main__":
    # Small config: nc=3, ndf=4.  Spatial must be 80 so the conv chain
    # (80->40->20->10->5->2->1) matches the module's squeeze-to-(N,) semantics.
    nc, ndf, batch, hw = 3, 4, 2, 80

    key = jax.random.PRNGKey(0)
    k_params, k_x = jax.random.split(key)
    params = init_params(k_params, nc, ndf)
    x = jax.random.normal(k_x, (batch, nc, hw, hw), jnp.float32)

    fwd = jax.jit(discriminator_forward)
    out = jax.block_until_ready(fwd(x, params))
    assert out.shape == (batch,)
    assert bool(jnp.all(jnp.isfinite(out)))
    assert bool(jnp.all((out > 0.0) & (out < 1.0)))   # sigmoid output range
    print("KERNEL_OK")
</pallas_src>

<mosaic_0001>
module attributes {stable_mosaic.version = 11 : i64} {
  func.func @_matmul_lrelu_kernel(%arg0: i32, %arg1: memref<1600x128xbf16, #tpu.memory_space<vmem>>, %arg2: memref<128x128xbf16, #tpu.memory_space<vmem>>, %arg3: memref<1600x128xbf16, #tpu.memory_space<vmem>>) attributes {dimension_semantics = [#tpu.dimension_semantics<parallel>], iteration_bounds = array<i64: 2>, scalar_prefetch = 0 : i64, scratch_operands = 0 : i64, tpu.core_type = #tpu.core_type<tc>, window_params = [{transform_indices = @transform_0, window_bounds = array<i64: 1600, 128>}, {pipeline_mode = #tpu.pipeline_mode<synchronous>, transform_indices = @transform_1, window_bounds = array<i64: 128, 128>}, {transform_indices = @transform_2, window_bounds = array<i64: 1600, 128>}]} {
    %c0 = arith.constant 0 : index
    %c0_0 = arith.constant 0 : index
    %0 = vector.load %arg1[%c0, %c0_0] : memref<1600x128xbf16, #tpu.memory_space<vmem>>, vector<1600x128xbf16>
    %c0_1 = arith.constant 0 : index
    %c0_2 = arith.constant 0 : index
    %1 = vector.load %arg2[%c0_1, %c0_2] : memref<128x128xbf16, #tpu.memory_space<vmem>>, vector<128x128xbf16>
    %cst = arith.constant dense<0.000000e+00> : vector<1600x128xf32>
    %2 = tpu.matmul %0, %1, %cst {dimension_numbers = #tpu.dot_dimension_numbers<[1], [0], [0], [1], [0, 0, 1, 1], [], []>} : vector<1600x128xbf16>, vector<128x128xbf16>, vector<1600x128xf32> -> vector<1600x128xf32>
    %cst_3 = arith.constant 2.000000e-01 : f32
    %3 = vector.broadcast %cst_3 : f32 to vector<1600x128xf32>
    %4 = arith.mulf %3, %2 : vector<1600x128xf32>
    %5 = arith.maximumf %2, %4 : vector<1600x128xf32>
    %6 = arith.truncf %5 : vector<1600x128xf32> to vector<1600x128xbf16>
    %c0_4 = arith.constant 0 : index
    %c0_5 = arith.constant 0 : index
    %7 = vector.load %arg3[%c0_4, %c0_5] : memref<1600x128xbf16, #tpu.memory_space<vmem>>, vector<1600x128xbf16>
    tpu.vector_store %arg3[%c0_4, %c0_5], %6 {strides = array<i32>} : memref<1600x128xbf16, #tpu.memory_space<vmem>>, vector<1600x128xbf16>,
    return
  }
  func.func @transform_0(%arg0: i32) -> (i32, i32) {
    %c0_i32 = arith.constant 0 : i32
    %c0_i32_0 = arith.constant 0 : i32
    return %arg0, %c0_i32 : i32, i32
  }
  func.func @transform_1(%arg0: i32) -> (i32, i32) {
    %c0_i32 = arith.constant 0 : i32
    %c0_i32_0 = arith.constant 0 : i32
    %c0_i32_1 = arith.constant 0 : i32
    return %c0_i32, %c0_i32_0 : i32, i32
  }
  func.func @transform_2(%arg0: i32) -> (i32, i32) {
    %c0_i32 = arith.constant 0 : i32
    %c0_i32_0 = arith.constant 0 : i32
    return %arg0, %c0_i32 : i32, i32
  }
}

module attributes {stable_mosaic.version = 11 : i64} {
  func.func @_matmul_bn_lrelu_kernel(%arg0: i32, %arg1: memref<800x128xbf16, #tpu.memory_space<vmem>>, %arg2: memref<128x128xbf16, #tpu.memory_space<vmem>>, %arg3: memref<1x128xf32, #tpu.memory_space<vmem>>, %arg4: memref<1x128xf32, #tpu.memory_space<vmem>>, %arg5: memref<800x128xbf16, #tpu.memory_space<vmem>>) attributes {dimension_semantics = [#tpu.dimension_semantics<arbitrary>], iteration_bounds = array<i64: 1>, scalar_prefetch = 0 : i64, scratch_operands = 0 : i64, tpu.core_type = #tpu.core_type<tc>, window_params = [{transform_indices = @transform_0, window_bounds = array<i64: 800, 128>}, {pipeline_mode = #tpu.pipeline_mode<synchronous>, transform_indices = @transform_1, window_bounds = array<i64: 128, 128>}, {pipeline_mode = #tpu.pipeline_mode<synchronous>, transform_indices = @transform_2, window_bounds = array<i64: 1, 128>}, {pipeline_mode = #tpu.pipeline_mode<synchronous>, transform_indices = @transform_3, window_bounds = array<i64: 1, 128>}, {transform_indices = @transform_4, window_bounds = array<i64: 800, 128>}]} {
    %c0 = arith.constant 0 : index
    %c0_0 = arith.constant 0 : index
    %0 = vector.load %arg1[%c0, %c0_0] : memref<800x128xbf16, #tpu.memory_space<vmem>>, vector<800x128xbf16>
    %c0_1 = arith.constant 0 : index
    %c0_2 = arith.constant 0 : index
    %1 = vector.load %arg2[%c0_1, %c0_2] : memref<128x128xbf16, #tpu.memory_space<vmem>>, vector<128x128xbf16>
    %cst = arith.constant dense<0.000000e+00> : vector<800x128xf32>
    %2 = tpu.matmul %0, %1, %cst {dimension_numbers = #tpu.dot_dimension_numbers<[1], [0], [0], [1], [0, 0, 1, 1], [], []>} : vector<800x128xbf16>, vector<128x128xbf16>, vector<800x128xf32> -> vector<800x128xf32>
    %cst_3 = arith.constant dense<0.000000e+00> : vector<128xf32>
    %3 = vector.multi_reduction <add>, %2, %cst_3 [0] : vector<800x128xf32> to vector<128xf32>
    %4 = vector.shape_cast %3 : vector<128xf32> to vector<1x128xf32>
    %cst_4 = arith.constant 1.250000e-03 : f32
    %5 = vector.broadcast %cst_4 : f32 to vector<1x128xf32>
    %6 = arith.mulf %4, %5 : vector<1x128xf32>
    %7 = arith.mulf %2, %2 : vector<800x128xf32>
    %cst_5 = arith.constant dense<0.000000e+00> : vector<128xf32>
    %8 = vector.multi_reduction <add>, %7, %cst_5 [0] : vector<800x128xf32> to vector<128xf32>
    %9 = vector.shape_cast %8 : vector<128xf32> to vector<1x128xf32>
    %cst_6 = arith.constant 1.250000e-03 : f32
    %10 = vector.broadcast %cst_6 : f32 to vector<1x128xf32>
    %11 = arith.mulf %9, %10 : vector<1x128xf32>
    %12 = arith.mulf %6, %6 : vector<1x128xf32>
    %13 = arith.subf %11, %12 : vector<1x128xf32>
    %cst_7 = arith.constant 0.000000e+00 : f32
    %14 = vector.broadcast %cst_7 : f32 to vector<1x128xf32>
    %15 = arith.maximumf %13, %14 : vector<1x128xf32>
    %c0_8 = arith.constant 0 : index
    %c0_9 = arith.constant 0 : index
    %16 = vector.load %arg3[%c0_8, %c0_9] : memref<1x128xf32, #tpu.memory_space<vmem>>, vector<1x128xf32>
    %cst_10 = arith.constant 9.99999974E-6 : f32
    %17 = vector.broadcast %cst_10 : f32 to vector<1x128xf32>
    %18 = arith.addf %15, %17 : vector<1x128xf32>
    %19 = math.rsqrt %18 : vector<1x128xf32>
    %20 = arith.mulf %16, %19 : vector<1x128xf32>
    %c0_11 = arith.constant 0 : index
    %c0_12 = arith.constant 0 : index
    %21 = vector.load %arg4[%c0_11, %c0_12] : memref<1x128xf32, #tpu.memory_space<vmem>>, vector<1x128xf32>
    %22 = arith.mulf %6, %20 : vector<1x128xf32>
    %23 = arith.subf %21, %22 : vector<1x128xf32>
    %24 = vector.broadcast %20 : vector<1x128xf32> to vector<800x128xf32>
    %25 = arith.mulf %2, %24 : vector<800x128xf32>
    %26 = vector.broadcast %23 : vector<1x128xf32> to vector<800x128xf32>
    %27 = arith.addf %25, %26 : vector<800x128xf32>
    %cst_13 = arith.constant 2.000000e-01 : f32
    %28 = vector.broadcast %cst_13 : f32 to vector<800x128xf32>
    %29 = arith.mulf %28, %27 : vector<800x128xf32>
    %30 = arith.maximumf %27, %29 : vector<800x128xf32>
    %31 = arith.truncf %30 : vector<800x128xf32> to vector<800x128xbf16>
    %c0_14 = arith.constant 0 : index
    %c0_15 = arith.constant 0 : index
    %32 = vector.load %arg5[%c0_14, %c0_15] : memref<800x128xbf16, #tpu.memory_space<vmem>>, vector<800x128xbf16>
    tpu.vector_store %arg5[%c0_14, %c0_15], %31 {strides = array<i32>} : memref<800x128xbf16, #tpu.memory_space<vmem>>, vector<800x128xbf16>,
    return
  }
  func.func @transform_0(%arg0: i32) -> (i32, i32) {
    %c0_i32 = arith.constant 0 : i32
    %c0_i32_0 = arith.constant 0 : i32
    return %arg0, %c0_i32 : i32, i32
  }
  func.func @transform_1(%arg0: i32) -> (i32, i32) {
    %c0_i32 = arith.constant 0 : i32
    %c0_i32_0 = arith.constant 0 : i32
    %c0_i32_1 = arith.constant 0 : i32
    return %c0_i32, %c0_i32_0 : i32, i32
  }
  func.func @transform_2(%arg0: i32) -> (i32, i32) {
    %c0_i32 = arith.constant 0 : i32
    %c0_i32_0 = arith.constant 0 : i32
    %c0_i32_1 = arith.constant 0 : i32
    return %c0_i32, %c0_i32_0 : i32, i32
  }
  func.func @transform_3(%arg0: i32) -> (i32, i32) {
    %c0_i32 = arith.constant 0 : i32
    %c0_i32_0 = arith.constant 0 : i32
    %c0_i32_1 = arith.constant 0 : i32
    return %c0_i32, %c0_i32_0 : i32, i32
  }
  func.func @transform_4(%arg0: i32) -> (i32, i32) {
    %c0_i32 = arith.constant 0 : i32
    %c0_i32_0 = arith.constant 0 : i32
    return %arg0, %c0_i32 : i32, i32
  }
}

module attributes {stable_mosaic.version = 11 : i64} {
  func.func @_matmul_bn_lrelu_kernel(%arg0: i32, %arg1: memref<200x128xbf16, #tpu.memory_space<vmem>>, %arg2: memref<128x128xbf16, #tpu.memory_space<vmem>>, %arg3: memref<1x128xf32, #tpu.memory_space<vmem>>, %arg4: memref<1x128xf32, #tpu.memory_space<vmem>>, %arg5: memref<200x128xbf16, #tpu.memory_space<vmem>>) attributes {dimension_semantics = [#tpu.dimension_semantics<arbitrary>], iteration_bounds = array<i64: 1>, scalar_prefetch = 0 : i64, scratch_operands = 0 : i64, tpu.core_type = #tpu.core_type<tc>, window_params = [{transform_indices = @transform_0, window_bounds = array<i64: 200, 128>}, {pipeline_mode = #tpu.pipeline_mode<synchronous>, transform_indices = @transform_1, window_bounds = array<i64: 128, 128>}, {pipeline_mode = #tpu.pipeline_mode<synchronous>, transform_indices = @transform_2, window_bounds = array<i64: 1, 128>}, {pipeline_mode = #tpu.pipeline_mode<synchronous>, transform_indices = @transform_3, window_bounds = array<i64: 1, 128>}, {transform_indices = @transform_4, window_bounds = array<i64: 200, 128>}]} {
    %c0 = arith.constant 0 : index
    %c0_0 = arith.constant 0 : index
    %0 = vector.load %arg1[%c0, %c0_0] : memref<200x128xbf16, #tpu.memory_space<vmem>>, vector<200x128xbf16>
    %c0_1 = arith.constant 0 : index
    %c0_2 = arith.constant 0 : index
    %1 = vector.load %arg2[%c0_1, %c0_2] : memref<128x128xbf16, #tpu.memory_space<vmem>>, vector<128x128xbf16>
    %cst = arith.constant dense<0.000000e+00> : vector<200x128xf32>
    %2 = tpu.matmul %0, %1, %cst {dimension_numbers = #tpu.dot_dimension_numbers<[1], [0], [0], [1], [0, 0, 1, 1], [], []>} : vector<200x128xbf16>, vector<128x128xbf16>, vector<200x128xf32> -> vector<200x128xf32>
    %cst_3 = arith.constant dense<0.000000e+00> : vector<128xf32>
    %3 = vector.multi_reduction <add>, %2, %cst_3 [0] : vector<200x128xf32> to vector<128xf32>
    %4 = vector.shape_cast %3 : vector<128xf32> to vector<1x128xf32>
    %cst_4 = arith.constant 5.000000e-03 : f32
    %5 = vector.broadcast %cst_4 : f32 to vector<1x128xf32>
    %6 = arith.mulf %4, %5 : vector<1x128xf32>
    %7 = arith.mulf %2, %2 : vector<200x128xf32>
    %cst_5 = arith.constant dense<0.000000e+00> : vector<128xf32>
    %8 = vector.multi_reduction <add>, %7, %cst_5 [0] : vector<200x128xf32> to vector<128xf32>
    %9 = vector.shape_cast %8 : vector<128xf32> to vector<1x128xf32>
    %cst_6 = arith.constant 5.000000e-03 : f32
    %10 = vector.broadcast %cst_6 : f32 to vector<1x128xf32>
    %11 = arith.mulf %9, %10 : vector<1x128xf32>
    %12 = arith.mulf %6, %6 : vector<1x128xf32>
    %13 = arith.subf %11, %12 : vector<1x128xf32>
    %cst_7 = arith.constant 0.000000e+00 : f32
    %14 = vector.broadcast %cst_7 : f32 to vector<1x128xf32>
    %15 = arith.maximumf %13, %14 : vector<1x128xf32>
    %c0_8 = arith.constant 0 : index
    %c0_9 = arith.constant 0 : index
    %16 = vector.load %arg3[%c0_8, %c0_9] : memref<1x128xf32, #tpu.memory_space<vmem>>, vector<1x128xf32>
    %cst_10 = arith.constant 9.99999974E-6 : f32
    %17 = vector.broadcast %cst_10 : f32 to vector<1x128xf32>
    %18 = arith.addf %15, %17 : vector<1x128xf32>
    %19 = math.rsqrt %18 : vector<1x128xf32>
    %20 = arith.mulf %16, %19 : vector<1x128xf32>
    %c0_11 = arith.constant 0 : index
    %c0_12 = arith.constant 0 : index
    %21 = vector.load %arg4[%c0_11, %c0_12] : memref<1x128xf32, #tpu.memory_space<vmem>>, vector<1x128xf32>
    %22 = arith.mulf %6, %20 : vector<1x128xf32>
    %23 = arith.subf %21, %22 : vector<1x128xf32>
    %24 = vector.broadcast %20 : vector<1x128xf32> to vector<200x128xf32>
    %25 = arith.mulf %2, %24 : vector<200x128xf32>
    %26 = vector.broadcast %23 : vector<1x128xf32> to vector<200x128xf32>
    %27 = arith.addf %25, %26 : vector<200x128xf32>
    %cst_13 = arith.constant 2.000000e-01 : f32
    %28 = vector.broadcast %cst_13 : f32 to vector<200x128xf32>
    %29 = arith.mulf %28, %27 : vector<200x128xf32>
    %30 = arith.maximumf %27, %29 : vector<200x128xf32>
    %31 = arith.truncf %30 : vector<200x128xf32> to vector<200x128xbf16>
    %c0_14 = arith.constant 0 : index
    %c0_15 = arith.constant 0 : index
    %32 = vector.load %arg5[%c0_14, %c0_15] : memref<200x128xbf16, #tpu.memory_space<vmem>>, vector<200x128xbf16>
    tpu.vector_store %arg5[%c0_14, %c0_15], %31 {strides = array<i32>} : memref<200x128xbf16, #tpu.memory_space<vmem>>, vector<200x128xbf16>,
    return
  }
  func.func @transform_0(%arg0: i32) -> (i32, i32) {
    %c0_i32 = arith.constant 0 : i32
    %c0_i32_0 = arith.constant 0 : i32
    return %arg0, %c0_i32 : i32, i32
  }
  func.func @transform_1(%arg0: i32) -> (i32, i32) {
    %c0_i32 = arith.constant 0 : i32
    %c0_i32_0 = arith.constant 0 : i32
    %c0_i32_1 = arith.constant 0 : i32
    return %c0_i32, %c0_i32_0 : i32, i32
  }
  func.func @transform_2(%arg0: i32) -> (i32, i32) {
    %c0_i32 = arith.constant 0 : i32
    %c0_i32_0 = arith.constant 0 : i32
    %c0_i32_1 = arith.constant 0 : i32
    return %c0_i32, %c0_i32_0 : i32, i32
  }
  func.func @transform_3(%arg0: i32) -> (i32, i32) {
    %c0_i32 = arith.constant 0 : i32
    %c0_i32_0 = arith.constant 0 : i32
    %c0_i32_1 = arith.constant 0 : i32
    return %c0_i32, %c0_i32_0 : i32, i32
  }
  func.func @transform_4(%arg0: i32) -> (i32, i32) {
    %c0_i32 = arith.constant 0 : i32
    %c0_i32_0 = arith.constant 0 : i32
    return %arg0, %c0_i32 : i32, i32
  }
}

module attributes {stable_mosaic.version = 11 : i64} {
  func.func @_matmul_bn_lrelu_kernel(%arg0: i32, %arg1: memref<56x256xbf16, #tpu.memory_space<vmem>>, %arg2: memref<256x128xbf16, #tpu.memory_space<vmem>>, %arg3: memref<1x128xf32, #tpu.memory_space<vmem>>, %arg4: memref<1x128xf32, #tpu.memory_space<vmem>>, %arg5: memref<56x128xbf16, #tpu.memory_space<vmem>>) attributes {dimension_semantics = [#tpu.dimension_semantics<arbitrary>], iteration_bounds = array<i64: 1>, scalar_prefetch = 0 : i64, scratch_operands = 0 : i64, tpu.core_type = #tpu.core_type<tc>, window_params = [{transform_indices = @transform_0, window_bounds = array<i64: 56, 256>}, {pipeline_mode = #tpu.pipeline_mode<synchronous>, transform_indices = @transform_1, window_bounds = array<i64: 256, 128>}, {pipeline_mode = #tpu.pipeline_mode<synchronous>, transform_indices = @transform_2, window_bounds = array<i64: 1, 128>}, {pipeline_mode = #tpu.pipeline_mode<synchronous>, transform_indices = @transform_3, window_bounds = array<i64: 1, 128>}, {transform_indices = @transform_4, window_bounds = array<i64: 56, 128>}]} {
    %c0 = arith.constant 0 : index
    %c0_0 = arith.constant 0 : index
    %0 = vector.load %arg1[%c0, %c0_0] : memref<56x256xbf16, #tpu.memory_space<vmem>>, vector<56x256xbf16>
    %c0_1 = arith.constant 0 : index
    %c0_2 = arith.constant 0 : index
    %1 = vector.load %arg2[%c0_1, %c0_2] : memref<256x128xbf16, #tpu.memory_space<vmem>>, vector<256x128xbf16>
    %cst = arith.constant dense<0.000000e+00> : vector<56x128xf32>
    %2 = tpu.matmul %0, %1, %cst {dimension_numbers = #tpu.dot_dimension_numbers<[1], [0], [0], [1], [0, 0, 1, 1], [], []>} : vector<56x256xbf16>, vector<256x128xbf16>, vector<56x128xf32> -> vector<56x128xf32>
    %cst_3 = arith.constant dense<0.000000e+00> : vector<128xf32>
    %3 = vector.multi_reduction <add>, %2, %cst_3 [0] : vector<56x128xf32> to vector<128xf32>
    %4 = vector.shape_cast %3 : vector<128xf32> to vector<1x128xf32>
    %cst_4 = arith.constant 2.000000e-02 : f32
    %5 = vector.broadcast %cst_4 : f32 to vector<1x128xf32>
    %6 = arith.mulf %4, %5 : vector<1x128xf32>
    %7 = arith.mulf %2, %2 : vector<56x128xf32>
    %cst_5 = arith.constant dense<0.000000e+00> : vector<128xf32>
    %8 = vector.multi_reduction <add>, %7, %cst_5 [0] : vector<56x128xf32> to vector<128xf32>
    %9 = vector.shape_cast %8 : vector<128xf32> to vector<1x128xf32>
    %cst_6 = arith.constant 2.000000e-02 : f32
    %10 = vector.broadcast %cst_6 : f32 to vector<1x128xf32>
    %11 = arith.mulf %9, %10 : vector<1x128xf32>
    %12 = arith.mulf %6, %6 : vector<1x128xf32>
    %13 = arith.subf %11, %12 : vector<1x128xf32>
    %cst_7 = arith.constant 0.000000e+00 : f32
    %14 = vector.broadcast %cst_7 : f32 to vector<1x128xf32>
    %15 = arith.maximumf %13, %14 : vector<1x128xf32>
    %c0_8 = arith.constant 0 : index
    %c0_9 = arith.constant 0 : index
    %16 = vector.load %arg3[%c0_8, %c0_9] : memref<1x128xf32, #tpu.memory_space<vmem>>, vector<1x128xf32>
    %cst_10 = arith.constant 9.99999974E-6 : f32
    %17 = vector.broadcast %cst_10 : f32 to vector<1x128xf32>
    %18 = arith.addf %15, %17 : vector<1x128xf32>
    %19 = math.rsqrt %18 : vector<1x128xf32>
    %20 = arith.mulf %16, %19 : vector<1x128xf32>
    %c0_11 = arith.constant 0 : index
    %c0_12 = arith.constant 0 : index
    %21 = vector.load %arg4[%c0_11, %c0_12] : memref<1x128xf32, #tpu.memory_space<vmem>>, vector<1x128xf32>
    %22 = arith.mulf %6, %20 : vector<1x128xf32>
    %23 = arith.subf %21, %22 : vector<1x128xf32>
    %24 = vector.broadcast %20 : vector<1x128xf32> to vector<56x128xf32>
    %25 = arith.mulf %2, %24 : vector<56x128xf32>
    %26 = vector.broadcast %23 : vector<1x128xf32> to vector<56x128xf32>
    %27 = arith.addf %25, %26 : vector<56x128xf32>
    %cst_13 = arith.constant 2.000000e-01 : f32
    %28 = vector.broadcast %cst_13 : f32 to vector<56x128xf32>
    %29 = arith.mulf %28, %27 : vector<56x128xf32>
    %30 = arith.maximumf %27, %29 : vector<56x128xf32>
    %31 = arith.truncf %30 : vector<56x128xf32> to vector<56x128xbf16>
    %c0_14 = arith.constant 0 : index
    %c0_15 = arith.constant 0 : index
    %32 = vector.load %arg5[%c0_14, %c0_15] : memref<56x128xbf16, #tpu.memory_space<vmem>>, vector<56x128xbf16>
    tpu.vector_store %arg5[%c0_14, %c0_15], %31 {strides = array<i32>} : memref<56x128xbf16, #tpu.memory_space<vmem>>, vector<56x128xbf16>,
    return
  }
  func.func @transform_0(%arg0: i32) -> (i32, i32) {
    %c0_i32 = arith.constant 0 : i32
    %c0_i32_0 = arith.constant 0 : i32
    return %arg0, %c0_i32 : i32, i32
  }
  func.func @transform_1(%arg0: i32) -> (i32, i32) {
    %c0_i32 = arith.constant 0 : i32
    %c0_i32_0 = arith.constant 0 : i32
    %c0_i32_1 = arith.constant 0 : i32
    return %c0_i32, %c0_i32_0 : i32, i32
  }
  func.func @transform_2(%arg0: i32) -> (i32, i32) {
    %c0_i32 = arith.constant 0 : i32
    %c0_i32_0 = arith.constant 0 : i32
    %c0_i32_1 = arith.constant 0 : i32
    return %c0_i32, %c0_i32_0 : i32, i32
  }
  func.func @transform_3(%arg0: i32) -> (i32, i32) {
    %c0_i32 = arith.constant 0 : i32
    %c0_i32_0 = arith.constant 0 : i32
    %c0_i32_1 = arith.constant 0 : i32
    return %c0_i32, %c0_i32_0 : i32, i32
  }
  func.func @transform_4(%arg0: i32) -> (i32, i32) {
    %c0_i32 = arith.constant 0 : i32
    %c0_i32_0 = arith.constant 0 : i32
    return %arg0, %c0_i32 : i32, i32
  }
}

</mosaic_0001>

<bundles_post_ra>
// kernel: discriminator_forward.4
= control target key start
LH: loop header
LB: loop body
LE: loop exit
PB: predicated region body
PF: predicated region fallthrough
CT: control target
= control target key end

     0   :  { %7 = vsyncpa [#allocation3], 0  ;;  %s5572_s0 = inlined_call_operand.hbm [shape: bf16[3200,128], index: 0, kind: input, shape index: {}]   ;;  %s5573_s1 = inlined_call_operand.hbm [shape: bf16[128,128], index: 1, kind: input, shape index: {}]   ;;  %s5574_s2 = inlined_call_operand.hbm [shape: bf16[3200,128], index: 2, kind: output, shape index: {}]  }
   0x1   :  { %9 = vsyncpa [#allocation3 + $0x1], 0 }
   0x2   :  { %10 = vsyncpa [#allocation6], 0 }
   0x3   :  { %11 = vsyncpa [#allocation4], 0 }
   0x4   :  { %13 = vsyncpa [#allocation4 + $0x1], 0  ;;  %s5156_s9 = smov 0   ;;  %s5158_s10 = smov 0  }
   0x5   :  { %s5160_s11 = smov 0   ;;  %s5162_s12 = smov 0  }
   0x6 LB: > { %s5177_s13 = sadd.s32 4294967295, %s5132_s12   ;;  %s3374_s14 = sadd.s32 4294967294, %s5132_s12   ;;  %s5132_s12 = sphi %s5162_s12, %s5594_s12   ;;  %s5128_s11 = sphi %s5160_s11, %s5593_s11   ;;  %s5124_s10 = sphi %s5158_s10, %s5592_s10   ;;  %s5120_s9 = sphi %s5156_s9, %s5591_s9  }
   0x7   : > { %p39_p0 = scmp.ne.s32.totalorder %s5124_s10, %s5120_s9  ;;  %p5575_p1 = scmp.eq.s32.totalorder %s5177_s13, 0 }
   0x8   : > { %p90_p3 = scmp.eq.s32.totalorder %s3374_s14, 1  ;;  %p3375_p5 = scmp.ge.s32.totalorder %s5132_s12, 1 }
   0x9   : > { %p5186_p4 = por %p5575_p1, %p39_p0  ;;  %p97_p7 = scmp.lt.s32.totalorder %s5132_s12, 3 }
   0xa   : > { %p5191_p6 = por %p90_p3, %p39_p0  ;;  %s5134_s18 = smov [#allocation5]  }
   0xb   : > { %s5578_s15 = scalar_select %p5186_p4, 1, 0 }
   0xc   : > { %s5579_s16 = scalar_select %p5191_p6, 1, 0 }
   0xd   : > { %p5196_p8 = pnand %p3375_p5, %p97_p7  ;;  %s109_s19 = sshll.u32 %s5134_s18, 4  ;;  %s5200_s19 = int_to_ptr.vmem [resolvable:$true] %s109_s19 }
   0xe   : > { %s5212_s21 = sadd.s32 1, %s5132_s12   ;;  %s26_s22 = sadd.s32 1, %s5128_s11 }
   0xf   : > { %s5580_s17 = scalar_select %p5196_p8, 1, 0 }
  0x10   : > { %p4843_p9 = pneg %p5196_p8  ;;  %s23_s23 = ssub.s32 %s5132_s12, %s5212_s21 }
  0x11   : > { %s5004_s26 = scalar_lea.hbm %s5573_s1, 1024 }
  0x12   : > { %p5207_p11 = pnand %p4843_p9, %p5575_p1  ;;  %p5005_p12 = scmp.ne.s32.totalorder %s5573_s1, %s5004_s26 }
  0x13   : > { %p5011_p5 = scmp.lt.u32.totalorder %s5004_s26, %s5573_s1 }
  0x14   : > { %p5006_p13 = pneg %p5207_p11 }
  0x16   : > { %p5007_p0 = pnand %p5006_p13, %p5005_p12 }
  0x18   : > { %p5008_p3 = pneg %p5007_p0 }
  0x1a   : > { %p5013_p7 = pnand %p5011_p5, %p5008_p3 }
  0x1c   : > { %5016 = shalt.err (!%p5013_p7)
}
  0x1d   : > { %s5017_s3 = scalar_lea.vmem %s5200_s19, 1024  ;;  %p5025_p2 = scmp.lt.s32.totalorder %s5200_s19, %s5200_s19 }
  0x1e   : > { %p5018_p9 = scmp.ne.s32.totalorder %s5200_s19, %s5017_s3  ;;  %p5026_p6 = scmp.lt.s32.totalorder %s5017_s3, %s5017_s3 }
  0x20   : > { %p5020_p10 = pnand %p5018_p9, %p5006_p13  ;;  %p5027_p4 = por %p5026_p6, %p5025_p2 }
  0x22   : > { %p5021_p1 = pneg %p5020_p10 }
  0x24   : > { %p5028_p8 = pnand %p5027_p4, %p5021_p1 }
  0x26   : > { %5031 = shalt.err (!%p5028_p8)
}
  0x27   : > { %s5135_s4 = smov 64   ;;  %s5136_s5 = smov 4  }
  0x28   : > { %4846 = dma.hbm_to_vmem [thread:$0]  (!%p5207_p11), %s5573_s1, 1024, %s5200_s19, [#allocation6], %s5135_s4, %s5135_s4, %s5136_s5  }
  0x29   : > { %p24_p1 = scmp.eq.s32.totalorder %s23_s23, 0  ;;  %p33_p2 = scmp.ne.s32.totalorder %s5128_s11, %s5124_s10 }
  0x2a   : > { %p34_p4 = scmp.eq.s32.totalorder %s5132_s12, 0  ;;  %p4856_p6 = scmp.lt.s32.totalorder %s5132_s12, 2 }
  0x2b   : > { %s5246_s8 = scalar_select %p24_p1, %s5128_s11, %s26_s22  }
  0x2c   : > { %p35_p8 = por %p34_p4, %p33_p2  ;;  %p5582_p10 = scmp.eq.s32.totalorder %s5177_s13, 1 }
  0x2d   : > { %s123_s18 = sand.u32 1, %s5128_s11   ;;  %s3692_s20 = smul.u32 12800, %s5132_s12 }
  0x2e   : > { %p5250_p12 = por %p5582_p10, %p33_p2  ;;  %s4833_s24 = smul.u32 800, %s123_s18 }
  0x2f   : > { %p5256_p13 = pnand %p4856_p6, %p35_p8  ;;  %s5263_s22 = scalar_lea.hbm %s5572_s0, %s3692_s20 }
  0x30   : > { %s127_s26 = scalar_lea.vmem [#allocation2], %s4833_s24  ;;  %s5267_s28 = scalar_lea.sflag [#allocation3], %s123_s18 }
  0x31   : > { %s134_s27 = sshll.u32 %s127_s26, 4  ;;  %s5032_s29 = scalar_lea.hbm %s5263_s22, 12800  ;;  %s5265_s27 = int_to_ptr.vmem [resolvable:$true] %s134_s27 }
  0x32   : > { %p5033_p11 = scmp.ne.s32.totalorder %s5263_s22, %s5032_s29  ;;  %p5034_p0 = pneg %p5256_p13 }
  0x33   : > { %s5037_s6 = scalar_lea.hbm %s5572_s0, 25600  ;;  %p5038_p7 = scmp.lt.u32.totalorder %s5263_s22, %s5572_s0 }
  0x34   : > { %p5035_p3 = pnand %p5034_p0, %p5033_p11  ;;  %p5039_p9 = scmp.lt.u32.totalorder %s5037_s6, %s5032_s29 }
  0x35   : > { %p5041_p2 = scmp.lt.u32.totalorder %s5032_s29, %s5263_s22 }
  0x36   : > { %p5036_p5 = pneg %p5035_p3  ;;  %p5040_p1 = por %p5039_p9, %p5038_p7 }
  0x38   : > { %p5042_p4 = por %p5041_p2, %p5040_p1 }
  0x3a   : > { %p5043_p6 = pnand %p5042_p4, %p5036_p5 }
  0x3c   : > { %5046 = shalt.err (!%p5043_p6)
}
  0x3d   : > { %s5047_s18 = scalar_lea.vmem %s5265_s27, 12800  ;;  %s5137_s24 = smov [#allocation2]  }
  0x3e   : > { %p5048_p8 = scmp.ne.s32.totalorder %s5265_s27, %s5047_s18  ;;  %s5052_s19 = sshll.u32 %s5137_s24, 4  ;;  %s5053_s19 = int_to_ptr.vmem [resolvable:$false] %s5052_s19 }
  0x3f   : > { %s5054_s23 = scalar_lea.vmem %s5053_s19, 25600  ;;  %p5055_p3 = scmp.lt.s32.totalorder %s5265_s27, %s5053_s19 }
  0x40   : > { %p5050_p10 = pnand %p5048_p8, %p5034_p0  ;;  %p5056_p7 = scmp.lt.s32.totalorder %s5054_s23, %s5047_s18 }
  0x42   : > { %p5051_p11 = pneg %p5050_p10  ;;  %p5057_p9 = por %p5056_p7, %p5055_p3 }
  0x44   : > { %p5058_p1 = pnand %p5057_p9, %p5051_p11 }
  0x46   : > { %5061 = shalt.err (!%p5058_p1)
}
  0x47   : > { %4850 = dma.hbm_to_vmem [thread:$0]  (!%p5256_p13), %s5263_s22, 12800, %s5265_s27, %s5267_s28, %s5135_s4, %s5135_s4, %s5136_s5  }
  0x48   : > { %p5585_p0 = scmp.ne.s32.totalorder %s5580_s17, 0 }
  0x49   : > { %s5301_s26 = sand.u32 (!%p5585_p0), 1, %s5124_s10   ;;  %p5586_p5 = scmp.ne.s32.totalorder (!%p5585_p0), %s5578_s15, 0 }
  0x4a   : > { %146 = sbr.rel (%p5585_p0) target bundleno = 547 (0x223), region = 28  ;;  %s149_s30 = scalar_lea.sflag (!%p5585_p0), [#allocation3], %s5301_s26 }
  0x4b   : > { %s4834_s29 = smul.u32 (!%p5585_p0), 800, %s5301_s26 }
  0x4d   : > { %s5307_s25 = scalar_lea.vmem (!%p5585_p0), [#allocation2], %s4834_s29 }
  0x51   : > { %5107 = dma.done.wait (%p5586_p5), %s149_s30, 12800  }
  0x52   : > { %5109 = vsyncadd (%p5586_p5), %s149_s30, 4294954496  ;;  %p5587_p13 = scmp.eq.s32.totalorder %s5177_s13, 0 }
  0x54   : > { %5111 = dma.done.wait (%p5587_p13), [#allocation6], 1024   ;;  %p5588_p2 = pmov %p5587_p13 }
  0x55   : > { %v4896_v0 = vld [vmem:[#allocation5] sm:$0xff]   ;;  %v4897_v1 = vld [vmem:[#allocation5 + $0x8] sm:$0xff]   ;;  %v4898_v2 = vld [vmem:[#allocation5 + $0x10] sm:$0xff]   ;;  %s5419_s15 = scalar_lea.vmem [#allocation7], %s4834_s29  ;;  %s3893_s17 = smul.u32 12800, %s5177_s13 }
  0x56   : > { %5113 = vsyncadd (%p5588_p2), [#allocation6], 4294966272  ;;  %4601 = vmatprep.subr.bf16.mxu0 %v4896_v0  ;;  %4817 = vmatprep.subr.bf16.mxu1 %v4896_v0  ;;  %v4899_v3 = vld [vmem:[#allocation5 + $0x18] sm:$0xff]   ;;  %v4904_v4 = vld [vmem:[%s5307_s25] sm:$0xff]   ;;  %s3291_s13 = sshll.u32 %s5419_s15, 4  ;;  %s3278_s27 = scalar_lea.sflag [#allocation4], %s5301_s26  ;;  %s5524_s13 = int_to_ptr.vmem [resolvable:$true] %s3291_s13 }
  0x57   : > { %4602 = vmatpush3.bf16.msra.mxu0 %v4896_v0  ;;  %4825 = vmatpush3.bf16.msra.mxu1 %v4896_v0  ;;  %v4905_v5 = vld [vmem:[%s5307_s25 + $0x190] sm:$0xff]   ;;  %v4900_v6 = vld [vmem:[#allocation5 + $0x20] sm:$0xff]   ;;  %v4901_v7 = vld [vmem:[#allocation5 + $0x28] sm:$0xff]   ;;  %s5522_s22 = scalar_lea.hbm %s5574_s2, %s3893_s17  ;;  %s5062_s28 = scalar_lea.vmem %s5524_s13, 12800 }
  0x58   : > { %4603 = vmatprep.subr.bf16.mxu0 %v4897_v1  ;;  %4818 = vmatprep.subr.bf16.mxu1 %v4897_v1  ;;  %v4902_v8 = vld [vmem:[#allocation5 + $0x30] sm:$0xff]   ;;  %v4903_v9 = vld [vmem:[#allocation5 + $0x38] sm:$0xff]   ;;  %v4906_v10 = vld [vmem:[%s5307_s25 + $0x8] sm:$0xff]   ;;  %p5063_p4 = scmp.ne.s32.totalorder %s5524_s13, %s5062_s28  ;;  %s5138_s3 = smov [#allocation7]  }
  0x59   : > { %4617 = vmatprep.mubr.bf16.mxu0 %v4904_v4  ;;  %4717 = vmatprep.mubr.bf16.mxu1 %v4905_v5  ;;  %v4907_v11 = vld [vmem:[%s5307_s25 + $0x198] sm:$0xff]   ;;  %v4908_v12 = vld [vmem:[%s5307_s25 + $0x10] sm:$0xff]   ;;  %v4909_v13 = vld [vmem:[%s5307_s25 + $0x1a0] sm:$0xff]   ;;  %s5066_s6 = sshll.u32 %s5138_s3, 4  ;;  %s5067_s6 = int_to_ptr.vmem [resolvable:$false] %s5066_s6 }
  0x5a   : > { %v4910_v14 = vld [vmem:[%s5307_s25 + $0x18] sm:$0xff]   ;;  %v4911_v15 = vld [vmem:[%s5307_s25 + $0x1a8] sm:$0xff]   ;;  %v4912_v16 = vld [vmem:[%s5307_s25 + $0x20] sm:$0xff]   ;;  %p5064_p6 = pnand %p5063_p4, %p5250_p12  ;;  %s5068_s7 = scalar_lea.vmem %s5067_s6, 25600 }
  0x5b   : > { %4604 = vmatpush3.bf16.msra.mxu0 %v4897_v1  ;;  %4826 = vmatpush3.bf16.msra.mxu1 %v4897_v1  ;;  %v4913_v17 = vld [vmem:[%s5307_s25 + $0x1b0] sm:$0xff]   ;;  %v4914_v18 = vld [vmem:[%s5307_s25 + $0x28] sm:$0xff]   ;;  %v4915_v19 = vld [vmem:[%s5307_s25 + $0x1b8] sm:$0xff]   ;;  %p5069_p10 = scmp.lt.s32.totalorder %s5524_s13, %s5067_s6  ;;  %p5070_p11 = scmp.lt.s32.totalorder %s5068_s7, %s5062_s28 }
  0x5c   : > { %4605 = vmatprep.subr.bf16.mxu0 %v4898_v2  ;;  %4819 = vmatprep.subr.bf16.mxu1 %v4898_v2  ;;  %v4916_v20 = vld [vmem:[%s5307_s25 + $0x30] sm:$0xff]   ;;  %v4917_v21 = vld [vmem:[%s5307_s25 + $0x1c0] sm:$0xff]   ;;  %v4918_v22 = vld [vmem:[%s5307_s25 + $0x38] sm:$0xff]   ;;  %p5065_p8 = pneg %p5064_p6 }
  0x5d   : > { %v4919_v23 = vld [vmem:[%s5307_s25 + $0x1c8] sm:$0xff]   ;;  %v4920_v24 = vld [vmem:[%s5307_s25 + $0x40] sm:$0xff]   ;;  %v4921_v25 = vld [vmem:[%s5307_s25 + $0x1d0] sm:$0xff]   ;;  %p5071_p3 = por %p5070_p11, %p5069_p10 }
  0x5e   : > { %v4922_v26 = vld [vmem:[%s5307_s25 + $0x48] sm:$0xff]   ;;  %v4923_v27 = vld [vmem:[%s5307_s25 + $0x1d8] sm:$0xff]   ;;  %v4924_v28 = vld [vmem:[%s5307_s25 + $0x50] sm:$0xff]  }
  0x5f   : > { %4606 = vmatpush3.bf16.msra.mxu0 %v4898_v2  ;;  %4827 = vmatpush3.bf16.msra.mxu1 %v4898_v2  ;;  %v4925_v29 = vld [vmem:[%s5307_s25 + $0x1e0] sm:$0xff]   ;;  %v4926_v30 = vld [vmem:[%s5307_s25 + $0x58] sm:$0xff]   ;;  %v4927_v31 = vld [vmem:[%s5307_s25 + $0x1e8] sm:$0xff]   ;;  %p5072_p7 = pnand %p5071_p3, %p5065_p8 }
  0x60   : > { %4607 = vmatprep.subr.bf16.mxu0 %v4899_v3  ;;  %4820 = vmatprep.subr.bf16.mxu1 %v4899_v3  ;;  %v4928_v32 = vld [vmem:[%s5307_s25 + $0x60] sm:$0xff]   ;;  %v4929_v33 = vld [vmem:[%s5307_s25 + $0x1f0] sm:$0xff]   ;;  %v4930_v34 = vld [vmem:[%s5307_s25 + $0x68] sm:$0xff]  }
  0x61   : > { %v4931_v35 = vld [vmem:[%s5307_s25 + $0x1f8] sm:$0xff]   ;;  %v4932_v36 = vld [vmem:[%s5307_s25 + $0x70] sm:$0xff]   ;;  %v4933_v37 = vld [vmem:[%s5307_s25 + $0x200] sm:$0xff]  }
  0x62   : > { %v4934_v38 = vld [vmem:[%s5307_s25 + $0x78] sm:$0xff]   ;;  %v4935_v39 = vld [vmem:[%s5307_s25 + $0x208] sm:$0xff]   ;;  %v4936_v40 = vld [vmem:[%s5307_s25 + $0x80] sm:$0xff]  }
  0x63   : > { %4608 = vmatpush3.bf16.msra.mxu0 %v4899_v3  ;;  %4828 = vmatpush3.bf16.msra.mxu1 %v4899_v3  ;;  %v4937_v41 = vld [vmem:[%s5307_s25 + $0x210] sm:$0xff]   ;;  %v4938_v42 = vld [vmem:[%s5307_s25 + $0x88] sm:$0xff]   ;;  %v4939_v43 = vld [vmem:[%s5307_s25 + $0x218] sm:$0xff]  }
  0x64   : > { %4609 = vmatprep.subr.bf16.mxu0 %v4900_v6  ;;  %4821 = vmatprep.subr.bf16.mxu1 %v4900_v6  ;;  %v4940_v44 = vld [vmem:[%s5307_s25 + $0x90] sm:$0xff]   ;;  %v4941_v45 = vld [vmem:[%s5307_s25 + $0x220] sm:$0xff]   ;;  %v4942_v46 = vld [vmem:[%s5307_s25 + $0x98] sm:$0xff]  }
  0x65   : > { %v4943_v47 = vld [vmem:[%s5307_s25 + $0x228] sm:$0xff]   ;;  %v4944_v48 = vld [vmem:[%s5307_s25 + $0xa0] sm:$0xff]   ;;  %v4945_v49 = vld [vmem:[%s5307_s25 + $0x230] sm:$0xff]  }
  0x66   : > { %v4946_v50 = vld [vmem:[%s5307_s25 + $0xa8] sm:$0xff]   ;;  %v4947_v51 = vld [vmem:[%s5307_s25 + $0x238] sm:$0xff]   ;;  %v4948_v52 = vld [vmem:[%s5307_s25 + $0xb0] sm:$0xff]  }
  0x67   : > { %4610 = vmatpush3.bf16.msra.mxu0 %v4900_v6  ;;  %4829 = vmatpush3.bf16.msra.mxu1 %v4900_v6  ;;  %v4949_v53 = vld [vmem:[%s5307_s25 + $0x240] sm:$0xff]   ;;  %v4950_v54 = vld [vmem:[%s5307_s25 + $0xb8] sm:$0xff]   ;;  %v4951_v55 = vld [vmem:[%s5307_s25 + $0x248] sm:$0xff]  }
  0x68   : > { %4611 = vmatprep.subr.bf16.mxu0 %v4901_v7  ;;  %4822 = vmatprep.subr.bf16.mxu1 %v4901_v7  ;;  %v4952_v56 = vld [vmem:[%s5307_s25 + $0xc0] sm:$0xff]   ;;  %v4953_v57 = vld [vmem:[%s5307_s25 + $0x250] sm:$0xff]   ;;  %v4954_v58 = vld [vmem:[%s5307_s25 + $0xc8] sm:$0xff]  }
  0x69   : > { %v4955_v59 = vld [vmem:[%s5307_s25 + $0x258] sm:$0xff]   ;;  %v4956_v60 = vld [vmem:[%s5307_s25 + $0xd0] sm:$0xff]   ;;  %v4957_v61 = vld [vmem:[%s5307_s25 + $0x260] sm:$0xff]  }
  0x6a   : > { %v4958_v62 = vld [vmem:[%s5307_s25 + $0xd8] sm:$0xff]   ;;  %v4959_v63 = vld [vmem:[%s5307_s25 + $0x268] sm:$0xff]   ;;  %v4960_v0 = vld [vmem:[%s5307_s25 + $0xe0] sm:$0xff]  }
  0x6b   : > { %4612 = vmatpush3.bf16.msra.mxu0 %v4901_v7  ;;  %4830 = vmatpush3.bf16.msra.mxu1 %v4901_v7  ;;  %v4961_v1 = vld [vmem:[%s5307_s25 + $0x270] sm:$0xff]   ;;  %v4962_v2 = vld [vmem:[%s5307_s25 + $0xe8] sm:$0xff]   ;;  %v4963_v3 = vld [vmem:[%s5307_s25 + $0x278] sm:$0xff]  }
  0x6c   : > { %4613 = vmatprep.subr.bf16.mxu0 %v4902_v8  ;;  %4823 = vmatprep.subr.bf16.mxu1 %v4902_v8  ;;  %v4964_v4 = vld [vmem:[%s5307_s25 + $0xf0] sm:$0xff]   ;;  %v4965_v5 = vld [vmem:[%s5307_s25 + $0x280] sm:$0xff]   ;;  %v4966_v6 = vld [vmem:[%s5307_s25 + $0xf8] sm:$0xff]  }
  0x6d   : > { %v4967_v7 = vld [vmem:[%s5307_s25 + $0x288] sm:$0xff]  }
  0x6f   : > { %4614 = vmatpush3.bf16.msra.mxu0 %v4902_v8  ;;  %4831 = vmatpush3.bf16.msra.mxu1 %v4902_v8  ;;  %v4968_v8 = vld [vmem:[%s5307_s25 + $0x100] sm:$0xff]  }
  0x70   : > { %4615 = vmatprep.subr.bf16.mxu0 %v4903_v9  ;;  %4824 = vmatprep.subr.bf16.mxu1 %v4903_v9 }
  0x73   : > { %4616 = vmatpush3.bf16.msra.mxu0 %v4903_v9  ;;  %4832 = vmatpush3.bf16.msra.mxu1 %v4903_v9  ;;  %v4969_v9 = vld [vmem:[%s5307_s25 + $0x290] sm:$0xff]  }
  0x76   : > { %4618 = vmatmul.mubr.bf16.vlgmr.msra.gmra.mrb[0].mxu0 %v4906_v10  ;;  %4718 = vmatmul.mubr.bf16.vlgmr.msra.gmra.mrb[0].mxu1 %v4907_v11  ;;  %v4970_v10 = vld [vmem:[%s5307_s25 + $0x108] sm:$0xff]   ;;  %v4971_v11 = vld [vmem:[%s5307_s25 + $0x298] sm:$0xff]  }
  0x77   : > { %4621 = vmatprep.mubr.bf16.mxu0 %v4908_v12  ;;  %4721 = vmatprep.mubr.bf16.mxu1 %v4909_v13  ;;  %v4972_v12 = vld [vmem:[%s5307_s25 + $0x110] sm:$0xff]   ;;  %v4973_v13 = vld [vmem:[%s5307_s25 + $0x2a0] sm:$0xff]  }
  0x7e   : > { %4622 = vmatmul.mubr.bf16.gmra.mrb[4].mxu0 %v4910_v14  ;;  %4722 = vmatmul.mubr.bf16.gmra.mrb[4].mxu1 %v4911_v15  ;;  %v4974_v14 = vld [vmem:[%s5307_s25 + $0x118] sm:$0xff]   ;;  %v4975_v15 = vld [vmem:[%s5307_s25 + $0x2a8] sm:$0xff]  }
  0x7f   : > { %4625 = vmatprep.mubr.bf16.mxu0 %v4912_v16  ;;  %4725 = vmatprep.mubr.bf16.mxu1 %v4913_v17  ;;  %v4976_v16 = vld [vmem:[%s5307_s25 + $0x120] sm:$0xff]   ;;  %v4977_v17 = vld [vmem:[%s5307_s25 + $0x2b0] sm:$0xff]  }
  0x86   : > { %4626 = vmatmul.mubr.bf16.gmra.mrb[8].mxu0 %v4914_v18  ;;  %4726 = vmatmul.mubr.bf16.gmra.mrb[8].mxu1 %v4915_v19  ;;  %v4978_v18 = vld [vmem:[%s5307_s25 + $0x128] sm:$0xff]   ;;  %v4979_v19 = vld [vmem:[%s5307_s25 + $0x2b8] sm:$0xff]  }
  0x87   : > { %4629 = vmatprep.mubr.bf16.mxu0 %v4916_v20  ;;  %4729 = vmatprep.mubr.bf16.mxu1 %v4917_v21  ;;  %v4980_v20 = vld [vmem:[%s5307_s25 + $0x130] sm:$0xff]   ;;  %v4981_v21 = vld [vmem:[%s5307_s25 + $0x2c0] sm:$0xff]  }
  0x8e   : > { %4630 = vmatmul.mubr.bf16.gmra.mrb[12].mxu0 %v4918_v22  ;;  %4730 = vmatmul.mubr.bf16.gmra.mrb[12].mxu1 %v4919_v23  ;;  %v4982_v22 = vld [vmem:[%s5307_s25 + $0x138] sm:$0xff]   ;;  %v4983_v23 = vld [vmem:[%s5307_s25 + $0x2c8] sm:$0xff]  }
  0x8f   : > { %4633 = vmatprep.mubr.bf16.mxu0 %v4920_v24  ;;  %4733 = vmatprep.mubr.bf16.mxu1 %v4921_v25  ;;  %v4984_v24 = vld [vmem:[%s5307_s25 + $0x140] sm:$0xff]   ;;  %v4985_v25 = vld [vmem:[%s5307_s25 + $0x2d0] sm:$0xff]  }
  0x96   : > { %4634 = vmatmul.mubr.bf16.gmra.mrb[16].mxu0 %v4922_v26  ;;  %4734 = vmatmul.mubr.bf16.gmra.mrb[16].mxu1 %v4923_v27  ;;  %v4986_v26 = vld [vmem:[%s5307_s25 + $0x148] sm:$0xff]   ;;  %v4987_v27 = vld [vmem:[%s5307_s25 + $0x2d8] sm:$0xff]  }
  0x97   : > { %4637 = vmatprep.mubr.bf16.mxu0 %v4924_v28  ;;  %4737 = vmatprep.mubr.bf16.mxu1 %v4925_v29  ;;  %v4988_v28 = vld [vmem:[%s5307_s25 + $0x150] sm:$0xff]   ;;  %v4989_v29 = vld [vmem:[%s5307_s25 + $0x2e0] sm:$0xff]  }
  0x9e   : > { %4638 = vmatmul.mubr.bf16.gmra.mrb[20].mxu0 %v4926_v30  ;;  %4738 = vmatmul.mubr.bf16.gmra.mrb[20].mxu1 %v4927_v31  ;;  %v4990_v30 = vld [vmem:[%s5307_s25 + $0x158] sm:$0xff]   ;;  %v4991_v31 = vld [vmem:[%s5307_s25 + $0x2e8] sm:$0xff]  }
  0x9f   : > { %4641 = vmatprep.mubr.bf16.mxu0 %v4928_v32  ;;  %4741 = vmatprep.mubr.bf16.mxu1 %v4929_v33  ;;  %v4992_v32 = vld [vmem:[%s5307_s25 + $0x160] sm:$0xff]   ;;  %v4993_v33 = vld [vmem:[%s5307_s25 + $0x2f0] sm:$0xff]  }
  0xa6   : > { %4642 = vmatmul.mubr.bf16.gmra.mrb[24].mxu0 %v4930_v34  ;;  %4742 = vmatmul.mubr.bf16.gmra.mrb[24].mxu1 %v4931_v35  ;;  %v4994_v34 = vld [vmem:[%s5307_s25 + $0x168] sm:$0xff]   ;;  %v4995_v35 = vld [vmem:[%s5307_s25 + $0x2f8] sm:$0xff]  }
  0xa7   : > { %4645 = vmatprep.mubr.bf16.mxu0 %v4932_v36  ;;  %4745 = vmatprep.mubr.bf16.mxu1 %v4933_v37  ;;  %v4996_v36 = vld [vmem:[%s5307_s25 + $0x170] sm:$0xff]   ;;  %v4997_v37 = vld [vmem:[%s5307_s25 + $0x300] sm:$0xff]  }
  0xae   : > { %4646 = vmatmul.mubr.bf16.gmra.mrb[28].mxu0 %v4934_v38  ;;  %4746 = vmatmul.mubr.bf16.gmra.mrb[28].mxu1 %v4935_v39  ;;  %v4998_v38 = vld [vmem:[%s5307_s25 + $0x178] sm:$0xff]   ;;  %v4999_v39 = vld [vmem:[%s5307_s25 + $0x308] sm:$0xff]  }
  0xaf   : > { %4649 = vmatprep.mubr.bf16.mxu0 %v4936_v40  ;;  %4749 = vmatprep.mubr.bf16.mxu1 %v4937_v41  ;;  %v5000_v40 = vld [vmem:[%s5307_s25 + $0x180] sm:$0xff]   ;;  %v5001_v41 = vld [vmem:[%s5307_s25 + $0x310] sm:$0xff]  }
  0xb6   : > { %4650 = vmatmul.mubr.bf16.gmra.mrb[32].mxu0 %v4938_v42  ;;  %4750 = vmatmul.mubr.bf16.gmra.mrb[32].mxu1 %v4939_v43  ;;  %v5002_v42 = vld [vmem:[%s5307_s25 + $0x188] sm:$0xff]   ;;  %v5003_v43 = vld [vmem:[%s5307_s25 + $0x318] sm:$0xff]  }
  0xb7   : > { %4653 = vmatprep.mubr.bf16.mxu0 %v4940_v44  ;;  %4753 = vmatprep.mubr.bf16.mxu1 %v4941_v45 }
  0xbe   : > { %4654 = vmatmul.mubr.bf16.gmra.mrb[36].mxu0 %v4942_v46  ;;  %4754 = vmatmul.mubr.bf16.gmra.mrb[36].mxu1 %v4943_v47 }
  0xbf   : > { %4657 = vmatprep.mubr.bf16.mxu0 %v4944_v48  ;;  %4757 = vmatprep.mubr.bf16.mxu1 %v4945_v49 }
  0xc6   : > { %4658 = vmatmul.mubr.bf16.gmra.mrb[40].mxu0 %v4946_v50  ;;  %4758 = vmatmul.mubr.bf16.gmra.mrb[40].mxu1 %v4947_v51 }
  0xc7   : > { %4661 = vmatprep.mubr.bf16.mxu0 %v4948_v52  ;;  %4761 = vmatprep.mubr.bf16.mxu1 %v4949_v53 }
  0xce   : > { %4662 = vmatmul.mubr.bf16.gmra.mrb[44].mxu0 %v4950_v54  ;;  %4762 = vmatmul.mubr.bf16.gmra.mrb[44].mxu1 %v4951_v55 }
  0xcf   : > { %4665 = vmatprep.mubr.bf16.mxu0 %v4952_v56  ;;  %4765 = vmatprep.mubr.bf16.mxu1 %v4953_v57 }
  0xd6   : > { %4666 = vmatmul.mubr.bf16.gmra.mrb[48].mxu0 %v4954_v58  ;;  %4766 = vmatmul.mubr.bf16.gmra.mrb[48].mxu1 %v4955_v59 }
  0xd7   : > { %4669 = vmatprep.mubr.bf16.mxu0 %v4956_v60  ;;  %4769 = vmatprep.mubr.bf16.mxu1 %v4957_v61 }
  0xde   : > { %4670 = vmatmul.mubr.bf16.gmra.mrb[52].mxu0 %v4958_v62  ;;  %4770 = vmatmul.mubr.bf16.gmra.mrb[52].mxu1 %v4959_v63 }
  0xdf   : > { %4673 = vmatprep.mubr.bf16.mxu0 %v4960_v0  ;;  %4773 = vmatprep.mubr.bf16.mxu1 %v4961_v1 }
  0xe6   : > { %4674 = vmatmul.mubr.bf16.gmra.mrb[56].mxu0 %v4962_v2  ;;  %4774 = vmatmul.mubr.bf16.gmra.mrb[56].mxu1 %v4963_v3 }
  0xe7   : > { %4677 = vmatprep.mubr.bf16.mxu0 %v4964_v4  ;;  %4777 = vmatprep.mubr.bf16.mxu1 %v4965_v5 }
  0xee   : > { %4678 = vmatmul.mubr.bf16.gmra.mrb[60].mxu0 %v4966_v6  ;;  %4778 = vmatmul.mubr.bf16.gmra.mrb[60].mxu1 %v4967_v7 }
  0xef   : > { %4681 = vmatprep.mubr.bf16.mxu0 %v4968_v8  ;;  %4781 = vmatprep.mubr.bf16.mxu1 %v4969_v9 }
  0xf6   : > { %4682 = vmatmul.mubr.bf16.gmra.mrb[64].mxu0 %v4970_v10  ;;  %4782 = vmatmul.mubr.bf16.gmra.mrb[64].mxu1 %v4971_v11 }
  0xf7   : > { %4685 = vmatprep.mubr.bf16.mxu0 %v4972_v12  ;;  %4785 = vmatprep.mubr.bf16.mxu1 %v4973_v13 }
  0xfe   : > { %4686 = vmatmul.mubr.bf16.gmra.mrb[68].mxu0 %v4974_v14  ;;  %4786 = vmatmul.mubr.bf16.gmra.mrb[68].mxu1 %v4975_v15 }
  0xff   : > { %4689 = vmatprep.mubr.bf16.mxu0 %v4976_v16  ;;  %4789 = vmatprep.mubr.bf16.mxu1 %v4977_v17 }
 0x106   : > { %4690 = vmatmul.mubr.bf16.gmra.mrb[72].mxu0 %v4978_v18  ;;  %4790 = vmatmul.mubr.bf16.gmra.mrb[72].mxu1 %v4979_v19 }
 0x107   : > { %4693 = vmatprep.mubr.bf16.mxu0 %v4980_v20  ;;  %4793 = vmatprep.mubr.bf16.mxu1 %v4981_v21 }
 0x10e   : > { %4694 = vmatmul.mubr.bf16.gmra.mrb[76].mxu0 %v4982_v22  ;;  %4794 = vmatmul.mubr.bf16.gmra.mrb[76].mxu1 %v4983_v23 }
 0x10f   : > { %4697 = vmatprep.mubr.bf16.mxu0 %v4984_v24  ;;  %4797 = vmatprep.mubr.bf16.mxu1 %v4985_v25 }
 0x116   : > { %4698 = vmatmul.mubr.bf16.gmra.mrb[80].mxu0 %v4986_v26  ;;  %4798 = vmatmul.mubr.bf16.gmra.mrb[80].mxu1 %v4987_v27 }
 0x117   : > { %4701 = vmatprep.mubr.bf16.mxu0 %v4988_v28  ;;  %4801 = vmatprep.mubr.bf16.mxu1 %v4989_v29 }
 0x11e   : > { %4702 = vmatmul.mubr.bf16.gmra.mrb[84].mxu0 %v4990_v30  ;;  %4802 = vmatmul.mubr.bf16.gmra.mrb[84].mxu1 %v4991_v31 }
 0x11f   : > { %4705 = vmatprep.mubr.bf16.mxu0 %v4992_v32  ;;  %4805 = vmatprep.mubr.bf16.mxu1 %v4993_v33 }
 0x126   : > { %4706 = vmatmul.mubr.bf16.gmra.mrb[88].mxu0 %v4994_v34  ;;  %4806 = vmatmul.mubr.bf16.gmra.mrb[88].mxu1 %v4995_v35 }
 0x127   : > { %4709 = vmatprep.mubr.bf16.mxu0 %v4996_v36  ;;  %4809 = vmatprep.mubr.bf16.mxu1 %v4997_v37 }
 0x12e   : > { %4710 = vmatmul.mubr.bf16.gmra.mrb[92].mxu0 %v4998_v38  ;;  %4810 = vmatmul.mubr.bf16.gmra.mrb[92].mxu1 %v4999_v39 }
 0x12f   : > { %4713 = vmatprep.mubr.bf16.mxu0 %v5000_v40  ;;  %4813 = vmatprep.mubr.bf16.mxu1 %v5001_v41 }
 0x136   : > { %4714 = vmatmul.mubr.bf16.gmra.mrb[96].mxu0 %v5002_v42  ;;  %4814 = vmatmul.mubr.bf16.gmra.mrb[96].mxu1 %v5003_v43 }
 0x149   : > { %v4619_v44 = vpop.f32.mrb[0].mxu0  ;;  %v4719_v45 = vpop.f32.mrb[0].mxu1 }
 0x14a   : > { %v1879_v46 = vmul.f32 0.2, %v4619_v44  ;;  %v1979_v47 = vmul.f32 0.2, %v4719_v45  ;;  %v1078_v48 = vpop.f32.mrb[1].mxu0  ;;  %v1478_v49 = vpop.f32.mrb[1].mxu1 }
 0x14b   : > { %v1877_v50 = vmul.f32 0.2, %v1078_v48  ;;  %v1977_v51 = vmul.f32 0.2, %v1478_v49  ;;  %v4620_v52 = vpop.f32.mrb[2].mxu0  ;;  %v4720_v53 = vpop.f32.mrb[2].mxu1 }
 0x14c   : > { %v1880_v54 = vmul.f32 0.2, %v4620_v52  ;;  %v1980_v55 = vmul.f32 0.2, %v4720_v53  ;;  %v1081_v56 = vpop.f32.mrb[3].mxu0  ;;  %v1481_v57 = vpop.f32.mrb[3].mxu1  ;;  %v2079_v60 = vmax.f32 %v4619_v44, %v1879_v46  ;;  %v2179_v61 = vmax.f32 %v4719_v45, %v1979_v47 }
 0x14d   : > { %v1878_v58 = vmul.f32 0.2, %v1081_v56  ;;  %v1978_v59 = vmul.f32 0.2, %v1481_v57  ;;  %v2077_v0 = vmax.f32 %v1078_v48, %v1877_v50  ;;  %v2177_v1 = vmax.f32 %v1478_v49, %v1977_v51 }
 0x14e   : > { %v2080_v62 = vmax.f32 %v4620_v52, %v1880_v54  ;;  %v2180_v63 = vmax.f32 %v4720_v53, %v1980_v55 }
 0x14f   : > { %v2078_v2 = vmax.f32 %v1081_v56, %v1878_v58  ;;  %v2178_v3 = vmax.f32 %v1481_v57, %v1978_v59 }
 0x150   : > { %v3902_v4 = vpack.c.bf16 %v2080_v62, %v2079_v60  ;;  %v4152_v5 = vpack.c.bf16 %v2180_v63, %v2179_v61 }
 0x151   : > { %v3897_v6 = vpack.c.bf16 %v2078_v2, %v2077_v0  ;;  %v4147_v7 = vpack.c.bf16 %v2178_v3, %v2177_v1  ;;  %v4623_v8 = vpop.f32.mrb[4].mxu0  ;;  %v4723_v9 = vpop.f32.mrb[4].mxu1 }
 0x152   : > { %4394 = vst [vmem:[%s5419_s15 + $0x8] sm:$0xff] %v3902_v4   ;;  %4444 = vst [vmem:[%s5419_s15 + $0x198] sm:$0xff] %v4152_v5   ;;  %v1883_v10 = vmul.f32 0.2, %v4623_v8  ;;  %v1983_v11 = vmul.f32 0.2, %v4723_v9 }
 0x153   : > { %v1094_v12 = vpop.f32.mrb[5].mxu0  ;;  %v1494_v13 = vpop.f32.mrb[5].mxu1  ;;  %3898 = vst [vmem:[%s5419_s15] sm:$0xff] %v3897_v6   ;;  %4443 = vst [vmem:[%s5419_s15 + $0x190] sm:$0xff] %v4147_v7  }
 0x154   : > { %v1881_v14 = vmul.f32 0.2, %v1094_v12  ;;  %v1981_v15 = vmul.f32 0.2, %v1494_v13  ;;  %v4624_v16 = vpop.f32.mrb[6].mxu0  ;;  %v4724_v17 = vpop.f32.mrb[6].mxu1  ;;  %v2083_v24 = vmax.f32 %v4623_v8, %v1883_v10  ;;  %v2183_v25 = vmax.f32 %v4723_v9, %v1983_v11 }
 0x155   : > { %v1884_v18 = vmul.f32 0.2, %v4624_v16  ;;  %v1984_v19 = vmul.f32 0.2, %v4724_v17  ;;  %v1097_v20 = vpop.f32.mrb[7].mxu0  ;;  %v1497_v21 = vpop.f32.mrb[7].mxu1 }
 0x156   : > { %v1882_v22 = vmul.f32 0.2, %v1097_v20  ;;  %v1982_v23 = vmul.f32 0.2, %v1497_v21  ;;  %v2081_v28 = vmax.f32 %v1094_v12, %v1881_v14  ;;  %v2181_v29 = vmax.f32 %v1494_v13, %v1981_v15 }
 0x157   : > { %v2084_v26 = vmax.f32 %v4624_v16, %v1884_v18  ;;  %v2184_v27 = vmax.f32 %v4724_v17, %v1984_v19 }
 0x158   : > { %v2082_v30 = vmax.f32 %v1097_v20, %v1882_v22  ;;  %v2182_v31 = vmax.f32 %v1497_v21, %v1982_v23 }
 0x159   : > { %v3912_v32 = vpack.c.bf16 %v2084_v26, %v2083_v24  ;;  %v4162_v33 = vpack.c.bf16 %v2184_v27, %v2183_v25  ;;  %v4627_v36 = vpop.f32.mrb[8].mxu0  ;;  %v4727_v37 = vpop.f32.mrb[8].mxu1 }
 0x15a   : > { %v3907_v34 = vpack.c.bf16 %v2082_v30, %v2081_v28  ;;  %v4157_v35 = vpack.c.bf16 %v2182_v31, %v2181_v29  ;;  %v1887_v38 = vmul.f32 0.2, %v4627_v36  ;;  %v1987_v39 = vmul.f32 0.2, %v4727_v37  ;;  %v1110_v40 = vpop.f32.mrb[9].mxu0  ;;  %v1510_v41 = vpop.f32.mrb[9].mxu1 }
 0x15b   : > { %4396 = vst [vmem:[%s5419_s15 + $0x18] sm:$0xff] %v3912_v32   ;;  %4446 = vst [vmem:[%s5419_s15 + $0x1a8] sm:$0xff] %v4162_v33   ;;  %v1885_v42 = vmul.f32 0.2, %v1110_v40  ;;  %v1985_v43 = vmul.f32 0.2, %v1510_v41 }
 0x15c   : > { %4395 = vst [vmem:[%s5419_s15 + $0x10] sm:$0xff] %v3907_v34   ;;  %4445 = vst [vmem:[%s5419_s15 + $0x1a0] sm:$0xff] %v4157_v35   ;;  %v4628_v44 = vpop.f32.mrb[10].mxu0  ;;  %v4728_v45 = vpop.f32.mrb[10].mxu1  ;;  %v2087_v52 = vmax.f32 %v4627_v36, %v1887_v38  ;;  %v2187_v53 = vmax.f32 %v4727_v37, %v1987_v39 }
 0x15d   : > { %v1888_v46 = vmul.f32 0.2, %v4628_v44  ;;  %v1988_v47 = vmul.f32 0.2, %v4728_v45  ;;  %v1113_v48 = vpop.f32.mrb[11].mxu0  ;;  %v1513_v49 = vpop.f32.mrb[11].mxu1  ;;  %v2085_v56 = vmax.f32 %v1110_v40, %v1885_v42  ;;  %v2185_v57 = vmax.f32 %v1510_v41, %v1985_v43 }
 0x15e   : > { %v1886_v50 = vmul.f32 0.2, %v1113_v48  ;;  %v1986_v51 = vmul.f32 0.2, %v1513_v49 }
 0x15f   : > { %v2088_v54 = vmax.f32 %v4628_v44, %v1888_v46  ;;  %v2188_v55 = vmax.f32 %v4728_v45, %v1988_v47 }
 0x160   : > { %v2086_v58 = vmax.f32 %v1113_v48, %v1886_v50  ;;  %v2186_v59 = vmax.f32 %v1513_v49, %v1986_v51 }
 0x161   : > { %v3922_v60 = vpack.c.bf16 %v2088_v54, %v2087_v52  ;;  %v4172_v61 = vpack.c.bf16 %v2188_v55, %v2187_v53  ;;  %v4631_v0 = vpop.f32.mrb[12].mxu0  ;;  %v4731_v1 = vpop.f32.mrb[12].mxu1 }
 0x162   : > { %v3917_v62 = vpack.c.bf16 %v2086_v58, %v2085_v56  ;;  %v4167_v63 = vpack.c.bf16 %v2186_v59, %v2185_v57  ;;  %v1891_v2 = vmul.f32 0.2, %v4631_v0  ;;  %v1991_v3 = vmul.f32 0.2, %v4731_v1  ;;  %v1126_v4 = vpop.f32.mrb[13].mxu0  ;;  %v1526_v5 = vpop.f32.mrb[13].mxu1 }
 0x163   : > { %4398 = vst [vmem:[%s5419_s15 + $0x28] sm:$0xff] %v3922_v60   ;;  %4448 = vst [vmem:[%s5419_s15 + $0x1b8] sm:$0xff] %v4172_v61   ;;  %v1889_v6 = vmul.f32 0.2, %v1126_v4  ;;  %v1989_v7 = vmul.f32 0.2, %v1526_v5 }
 0x164   : > { %4397 = vst [vmem:[%s5419_s15 + $0x20] sm:$0xff] %v3917_v62   ;;  %4447 = vst [vmem:[%s5419_s15 + $0x1b0] sm:$0xff] %v4167_v63   ;;  %v4632_v8 = vpop.f32.mrb[14].mxu0  ;;  %v4732_v9 = vpop.f32.mrb[14].mxu1  ;;  %v2091_v16 = vmax.f32 %v4631_v0, %v1891_v2  ;;  %v2191_v17 = vmax.f32 %v4731_v1, %v1991_v3 }
 0x165   : > { %v1892_v10 = vmul.f32 0.2, %v4632_v8  ;;  %v1992_v11 = vmul.f32 0.2, %v4732_v9  ;;  %v1129_v12 = vpop.f32.mrb[15].mxu0  ;;  %v1529_v13 = vpop.f32.mrb[15].mxu1  ;;  %v2089_v20 = vmax.f32 %v1126_v4, %v1889_v6  ;;  %v2189_v21 = vmax.f32 %v1526_v5, %v1989_v7 }
 0x166   : > { %v1890_v14 = vmul.f32 0.2, %v1129_v12  ;;  %v1990_v15 = vmul.f32 0.2, %v1529_v13 }
 0x167   : > { %v2092_v18 = vmax.f32 %v4632_v8, %v1892_v10  ;;  %v2192_v19 = vmax.f32 %v4732_v9, %v1992_v11 }
 0x168   : > { %v2090_v22 = vmax.f32 %v1129_v12, %v1890_v14  ;;  %v2190_v23 = vmax.f32 %v1529_v13, %v1990_v15 }
 0x169   : > { %v3932_v24 = vpack.c.bf16 %v2092_v18, %v2091_v16  ;;  %v4182_v25 = vpack.c.bf16 %v2192_v19, %v2191_v17  ;;  %v4635_v28 = vpop.f32.mrb[16].mxu0  ;;  %v4735_v29 = vpop.f32.mrb[16].mxu1 }
 0x16a   : > { %v3927_v26 = vpack.c.bf16 %v2090_v22, %v2089_v20  ;;  %v4177_v27 = vpack.c.bf16 %v2190_v23, %v2189_v21  ;;  %v1895_v30 = vmul.f32 0.2, %v4635_v28  ;;  %v1995_v31 = vmul.f32 0.2, %v4735_v29  ;;  %v1142_v32 = vpop.f32.mrb[17].mxu0  ;;  %v1542_v33 = vpop.f32.mrb[17].mxu1 }
 0x16b   : > { %4400 = vst [vmem:[%s5419_s15 + $0x38] sm:$0xff] %v3932_v24   ;;  %4450 = vst [vmem:[%s5419_s15 + $0x1c8] sm:$0xff] %v4182_v25   ;;  %v1893_v34 = vmul.f32 0.2, %v1142_v32  ;;  %v1993_v35 = vmul.f32 0.2, %v1542_v33 }
 0x16c   : > { %4399 = vst [vmem:[%s5419_s15 + $0x30] sm:$0xff] %v3927_v26   ;;  %4449 = vst [vmem:[%s5419_s15 + $0x1c0] sm:$0xff] %v4177_v27   ;;  %v4636_v36 = vpop.f32.mrb[18].mxu0  ;;  %v4736_v37 = vpop.f32.mrb[18].mxu1  ;;  %v2095_v44 = vmax.f32 %v4635_v28, %v1895_v30  ;;  %v2195_v45 = vmax.f32 %v4735_v29, %v1995_v31 }
 0x16d   : > { %v1896_v38 = vmul.f32 0.2, %v4636_v36  ;;  %v1996_v39 = vmul.f32 0.2, %v4736_v37  ;;  %v1145_v40 = vpop.f32.mrb[19].mxu0  ;;  %v1545_v41 = vpop.f32.mrb[19].mxu1  ;;  %v2093_v48 = vmax.f32 %v1142_v32, %v1893_v34  ;;  %v2193_v49 = vmax.f32 %v1542_v33, %v1993_v35 }
 0x16e   : > { %v1894_v42 = vmul.f32 0.2, %v1145_v40  ;;  %v1994_v43 = vmul.f32 0.2, %v1545_v41 }
 0x16f   : > { %v2096_v46 = vmax.f32 %v4636_v36, %v1896_v38  ;;  %v2196_v47 = vmax.f32 %v4736_v37, %v1996_v39 }
 0x170   : > { %v2094_v50 = vmax.f32 %v1145_v40, %v1894_v42  ;;  %v2194_v51 = vmax.f32 %v1545_v41, %v1994_v43 }
 0x171   : > { %v3942_v52 = vpack.c.bf16 %v2096_v46, %v2095_v44  ;;  %v4192_v53 = vpack.c.bf16 %v2196_v47, %v2195_v45  ;;  %v4639_v56 = vpop.f32.mrb[20].mxu0  ;;  %v4739_v57 = vpop.f32.mrb[20].mxu1 }
 0x172   : > { %v3937_v54 = vpack.c.bf16 %v2094_v50, %v2093_v48  ;;  %v4187_v55 = vpack.c.bf16 %v2194_v51, %v2193_v49  ;;  %v1899_v58 = vmul.f32 0.2, %v4639_v56  ;;  %v1999_v59 = vmul.f32 0.2, %v4739_v57  ;;  %v1158_v60 = vpop.f32.mrb[21].mxu0  ;;  %v1558_v61 = vpop.f32.mrb[21].mxu1 }
 0x173   : > { %4402 = vst [vmem:[%s5419_s15 + $0x48] sm:$0xff] %v3942_v52   ;;  %4452 = vst [vmem:[%s5419_s15 + $0x1d8] sm:$0xff] %v4192_v53   ;;  %v1897_v62 = vmul.f32 0.2, %v1158_v60  ;;  %v1997_v63 = vmul.f32 0.2, %v1558_v61 }
 0x174   : > { %4401 = vst [vmem:[%s5419_s15 + $0x40] sm:$0xff] %v3937_v54   ;;  %4451 = vst [vmem:[%s5419_s15 + $0x1d0] sm:$0xff] %v4187_v55   ;;  %v4640_v0 = vpop.f32.mrb[22].mxu0  ;;  %v4740_v1 = vpop.f32.mrb[22].mxu1  ;;  %v2099_v8 = vmax.f32 %v4639_v56, %v1899_v58  ;;  %v2199_v9 = vmax.f32 %v4739_v57, %v1999_v59 }
 0x175   : > { %v1900_v2 = vmul.f32 0.2, %v4640_v0  ;;  %v2000_v3 = vmul.f32 0.2, %v4740_v1  ;;  %v1161_v4 = vpop.f32.mrb[23].mxu0  ;;  %v1561_v5 = vpop.f32.mrb[23].mxu1  ;;  %v2097_v12 = vmax.f32 %v1158_v60, %v1897_v62  ;;  %v2197_v13 = vmax.f32 %v1558_v61, %v1997_v63 }
 0x176   : > { %v1898_v6 = vmul.f32 0.2, %v1161_v4  ;;  %v1998_v7 = vmul.f32 0.2, %v1561_v5 }
 0x177   : > { %v2100_v10 = vmax.f32 %v4640_v0, %v1900_v2  ;;  %v2200_v11 = vmax.f32 %v4740_v1, %v2000_v3 }
 0x178   : > { %v2098_v14 = vmax.f32 %v1161_v4, %v1898_v6  ;;  %v2198_v15 = vmax.f32 %v1561_v5, %v1998_v7 }
 0x179   : > { %v3952_v16 = vpack.c.bf16 %v2100_v10, %v2099_v8  ;;  %v4202_v17 = vpack.c.bf16 %v2200_v11, %v2199_v9  ;;  %v4643_v20 = vpop.f32.mrb[24].mxu0  ;;  %v4743_v21 = vpop.f32.mrb[24].mxu1 }
 0x17a   : > { %v3947_v18 = vpack.c.bf16 %v2098_v14, %v2097_v12  ;;  %v4197_v19 = vpack.c.bf16 %v2198_v15, %v2197_v13  ;;  %v1903_v22 = vmul.f32 0.2, %v4643_v20  ;;  %v2003_v23 = vmul.f32 0.2, %v4743_v21  ;;  %v1174_v24 = vpop.f32.mrb[25].mxu0  ;;  %v1574_v25 = vpop.f32.mrb[25].mxu1 }
 0x17b   : > { %4404 = vst [vmem:[%s5419_s15 + $0x58] sm:$0xff] %v3952_v16   ;;  %4454 = vst [vmem:[%s5419_s15 + $0x1e8] sm:$0xff] %v4202_v17   ;;  %v1901_v26 = vmul.f32 0.2, %v1174_v24  ;;  %v2001_v27 = vmul.f32 0.2, %v1574_v25 }
 0x17c   : > { %4403 = vst [vmem:[%s5419_s15 + $0x50] sm:$0xff] %v3947_v18   ;;  %4453 = vst [vmem:[%s5419_s15 + $0x1e0] sm:$0xff] %v4197_v19   ;;  %v4644_v28 = vpop.f32.mrb[26].mxu0  ;;  %v4744_v29 = vpop.f32.mrb[26].mxu1  ;;  %v2103_v36 = vmax.f32 %v4643_v20, %v1903_v22  ;;  %v2203_v37 = vmax.f32 %v4743_v21, %v2003_v23 }
 0x17d   : > { %v1904_v30 = vmul.f32 0.2, %v4644_v28  ;;  %v2004_v31 = vmul.f32 0.2, %v4744_v29  ;;  %v1177_v32 = vpop.f32.mrb[27].mxu0  ;;  %v1577_v33 = vpop.f32.mrb[27].mxu1  ;;  %v2101_v40 = vmax.f32 %v1174_v24, %v1901_v26  ;;  %v2201_v41 = vmax.f32 %v1574_v25, %v2001_v27 }
 0x17e   : > { %v1902_v34 = vmul.f32 0.2, %v1177_v32  ;;  %v2002_v35 = vmul.f32 0.2, %v1577_v33 }
 0x17f   : > { %v2104_v38 = vmax.f32 %v4644_v28, %v1904_v30  ;;  %v2204_v39 = vmax.f32 %v4744_v29, %v2004_v31 }
 0x180   : > { %v2102_v42 = vmax.f32 %v1177_v32, %v1902_v34  ;;  %v2202_v43 = vmax.f32 %v1577_v33, %v2002_v35 }
 0x181   : > { %v3962_v44 = vpack.c.bf16 %v2104_v38, %v2103_v36  ;;  %v4212_v45 = vpack.c.bf16 %v2204_v39, %v2203_v37  ;;  %v4647_v48 = vpop.f32.mrb[28].mxu0  ;;  %v4747_v49 = vpop.f32.mrb[28].mxu1 }
 0x182   : > { %v3957_v46 = vpack.c.bf16 %v2102_v42, %v2101_v40  ;;  %v4207_v47 = vpack.c.bf16 %v2202_v43, %v2201_v41  ;;  %v1907_v50 = vmul.f32 0.2, %v4647_v48  ;;  %v2007_v51 = vmul.f32 0.2, %v4747_v49  ;;  %v1190_v52 = vpop.f32.mrb[29].mxu0  ;;  %v1590_v53 = vpop.f32.mrb[29].mxu1 }
 0x183   : > { %4406 = vst [vmem:[%s5419_s15 + $0x68] sm:$0xff] %v3962_v44   ;;  %4456 = vst [vmem:[%s5419_s15 + $0x1f8] sm:$0xff] %v4212_v45   ;;  %v1905_v54 = vmul.f32 0.2, %v1190_v52  ;;  %v2005_v55 = vmul.f32 0.2, %v1590_v53 }
 0x184   : > { %4405 = vst [vmem:[%s5419_s15 + $0x60] sm:$0xff] %v3957_v46   ;;  %4455 = vst [vmem:[%s5419_s15 + $0x1f0] sm:$0xff] %v4207_v47   ;;  %v4648_v56 = vpop.f32.mrb[30].mxu0  ;;  %v4748_v57 = vpop.f32.mrb[30].mxu1  ;;  %v2107_v0 = vmax.f32 %v4647_v48, %v1907_v50  ;;  %v2207_v1 = vmax.f32 %v4747_v49, %v2007_v51 }
 0x185   : > { %v1908_v58 = vmul.f32 0.2, %v4648_v56  ;;  %v2008_v59 = vmul.f32 0.2, %v4748_v57  ;;  %v1193_v60 = vpop.f32.mrb[31].mxu0  ;;  %v1593_v61 = vpop.f32.mrb[31].mxu1  ;;  %v2105_v4 = vmax.f32 %v1190_v52, %v1905_v54  ;;  %v2205_v5 = vmax.f32 %v1590_v53, %v2005_v55 }
 0x186   : > { %v1906_v62 = vmul.f32 0.2, %v1193_v60  ;;  %v2006_v63 = vmul.f32 0.2, %v1593_v61 }
 0x187   : > { %v2108_v2 = vmax.f32 %v4648_v56, %v1908_v58  ;;  %v2208_v3 = vmax.f32 %v4748_v57, %v2008_v59 }
 0x188   : > { %v2106_v6 = vmax.f32 %v1193_v60, %v1906_v62  ;;  %v2206_v7 = vmax.f32 %v1593_v61, %v2006_v63 }
 0x189   : > { %v3972_v8 = vpack.c.bf16 %v2108_v2, %v2107_v0  ;;  %v4222_v9 = vpack.c.bf16 %v2208_v3, %v2207_v1  ;;  %v4651_v12 = vpop.f32.mrb[32].mxu0  ;;  %v4751_v13 = vpop.f32.mrb[32].mxu1 }
 0x18a   : > { %v3967_v10 = vpack.c.bf16 %v2106_v6, %v2105_v4  ;;  %v4217_v11 = vpack.c.bf16 %v2206_v7, %v2205_v5  ;;  %v1911_v14 = vmul.f32 0.2, %v4651_v12  ;;  %v2011_v15 = vmul.f32 0.2, %v4751_v13  ;;  %v1206_v16 = vpop.f32.mrb[33].mxu0  ;;  %v1606_v17 = vpop.f32.mrb[33].mxu1 }
 0x18b   : > { %4408 = vst [vmem:[%s5419_s15 + $0x78] sm:$0xff] %v3972_v8   ;;  %4458 = vst [vmem:[%s5419_s15 + $0x208] sm:$0xff] %v4222_v9   ;;  %v1909_v18 = vmul.f32 0.2, %v1206_v16  ;;  %v2009_v19 = vmul.f32 0.2, %v1606_v17 }
 0x18c   : > { %4407 = vst [vmem:[%s5419_s15 + $0x70] sm:$0xff] %v3967_v10   ;;  %4457 = vst [vmem:[%s5419_s15 + $0x200] sm:$0xff] %v4217_v11   ;;  %v4652_v20 = vpop.f32.mrb[34].mxu0  ;;  %v4752_v21 = vpop.f32.mrb[34].mxu1  ;;  %v2111_v28 = vmax.f32 %v4651_v12, %v1911_v14  ;;  %v2211_v29 = vmax.f32 %v4751_v13, %v2011_v15 }
 0x18d   : > { %v1912_v22 = vmul.f32 0.2, %v4652_v20  ;;  %v2012_v23 = vmul.f32 0.2, %v4752_v21  ;;  %v1209_v24 = vpop.f32.mrb[35].mxu0  ;;  %v1609_v25 = vpop.f32.mrb[35].mxu1  ;;  %v2109_v32 = vmax.f32 %v1206_v16, %v1909_v18  ;;  %v2209_v33 = vmax.f32 %v1606_v17, %v2009_v19 }
 0x18e   : > { %v1910_v26 = vmul.f32 0.2, %v1209_v24  ;;  %v2010_v27 = vmul.f32 0.2, %v1609_v25 }
 0x18f   : > { %v2112_v30 = vmax.f32 %v4652_v20, %v1912_v22  ;;  %v2212_v31 = vmax.f32 %v4752_v21, %v2012_v23 }
 0x190   : > { %v2110_v34 = vmax.f32 %v1209_v24, %v1910_v26  ;;  %v2210_v35 = vmax.f32 %v1609_v25, %v2010_v27 }
 0x191   : > { %v3982_v36 = vpack.c.bf16 %v2112_v30, %v2111_v28  ;;  %v4232_v37 = vpack.c.bf16 %v2212_v31, %v2211_v29  ;;  %v4655_v40 = vpop.f32.mrb[36].mxu0  ;;  %v4755_v41 = vpop.f32.mrb[36].mxu1 }
 0x192   : > { %v3977_v38 = vpack.c.bf16 %v2110_v34, %v2109_v32  ;;  %v4227_v39 = vpack.c.bf16 %v2210_v35, %v2209_v33  ;;  %v1915_v42 = vmul.f32 0.2, %v4655_v40  ;;  %v2015_v43 = vmul.f32 0.2, %v4755_v41  ;;  %v1222_v44 = vpop.f32.mrb[37].mxu0  ;;  %v1622_v45 = vpop.f32.mrb[37].mxu1 }
 0x193   : > { %4410 = vst [vmem:[%s5419_s15 + $0x88] sm:$0xff] %v3982_v36   ;;  %4460 = vst [vmem:[%s5419_s15 + $0x218] sm:$0xff] %v4232_v37   ;;  %v1913_v46 = vmul.f32 0.2, %v1222_v44  ;;  %v2013_v47 = vmul.f32 0.2, %v1622_v45 }
 0x194   : > { %4409 = vst [vmem:[%s5419_s15 + $0x80] sm:$0xff] %v3977_v38   ;;  %4459 = vst [vmem:[%s5419_s15 + $0x210] sm:$0xff] %v4227_v39   ;;  %v4656_v48 = vpop.f32.mrb[38].mxu0  ;;  %v4756_v49 = vpop.f32.mrb[38].mxu1  ;;  %v2115_v56 = vmax.f32 %v4655_v40, %v1915_v42  ;;  %v2215_v57 = vmax.f32 %v4755_v41, %v2015_v43 }
 0x195   : > { %v1916_v50 = vmul.f32 0.2, %v4656_v48  ;;  %v2016_v51 = vmul.f32 0.2, %v4756_v49  ;;  %v1225_v52 = vpop.f32.mrb[39].mxu0  ;;  %v1625_v53 = vpop.f32.mrb[39].mxu1  ;;  %v2113_v60 = vmax.f32 %v1222_v44, %v1913_v46  ;;  %v2213_v61 = vmax.f32 %v1622_v45, %v2013_v47 }
 0x196   : > { %v1914_v54 = vmul.f32 0.2, %v1225_v52  ;;  %v2014_v55 = vmul.f32 0.2, %v1625_v53 }
 0x197   : > { %v2116_v58 = vmax.f32 %v4656_v48, %v1916_v50  ;;  %v2216_v59 = vmax.f32 %v4756_v49, %v2016_v51 }
 0x198   : > { %v2114_v62 = vmax.f32 %v1225_v52, %v1914_v54  ;;  %v2214_v63 = vmax.f32 %v1625_v53, %v2014_v55 }
 0x199   : > { %v3992_v0 = vpack.c.bf16 %v2116_v58, %v2115_v56  ;;  %v4242_v1 = vpack.c.bf16 %v2216_v59, %v2215_v57  ;;  %v4659_v4 = vpop.f32.mrb[40].mxu0  ;;  %v4759_v5 = vpop.f32.mrb[40].mxu1 }
 0x19a   : > { %v3987_v2 = vpack.c.bf16 %v2114_v62, %v2113_v60  ;;  %v4237_v3 = vpack.c.bf16 %v2214_v63, %v2213_v61  ;;  %v1919_v6 = vmul.f32 0.2, %v4659_v4  ;;  %v2019_v7 = vmul.f32 0.2, %v4759_v5  ;;  %v1238_v8 = vpop.f32.mrb[41].mxu0  ;;  %v1638_v9 = vpop.f32.mrb[41].mxu1 }
 0x19b   : > { %4412 = vst [vmem:[%s5419_s15 + $0x98] sm:$0xff] %v3992_v0   ;;  %4462 = vst [vmem:[%s5419_s15 + $0x228] sm:$0xff] %v4242_v1   ;;  %v1917_v10 = vmul.f32 0.2, %v1238_v8  ;;  %v2017_v11 = vmul.f32 0.2, %v1638_v9 }
 0x19c   : > { %4411 = vst [vmem:[%s5419_s15 + $0x90] sm:$0xff] %v3987_v2   ;;  %4461 = vst [vmem:[%s5419_s15 + $0x220] sm:$0xff] %v4237_v3   ;;  %v4660_v12 = vpop.f32.mrb[42].mxu0  ;;  %v4760_v13 = vpop.f32.mrb[42].mxu1  ;;  %v2119_v20 = vmax.f32 %v4659_v4, %v1919_v6  ;;  %v2219_v21 = vmax.f32 %v4759_v5, %v2019_v7 }
 0x19d   : > { %v1920_v14 = vmul.f32 0.2, %v4660_v12  ;;  %v2020_v15 = vmul.f32 0.2, %v4760_v13  ;;  %v1241_v16 = vpop.f32.mrb[43].mxu0  ;;  %v1641_v17 = vpop.f32.mrb[43].mxu1  ;;  %v2117_v24 = vmax.f32 %v1238_v8, %v1917_v10  ;;  %v2217_v25 = vmax.f32 %v1638_v9, %v2017_v11 }
 0x19e   : > { %v1918_v18 = vmul.f32 0.2, %v1241_v16  ;;  %v2018_v19 = vmul.f32 0.2, %v1641_v17 }
 0x19f   : > { %v2120_v22 = vmax.f32 %v4660_v12, %v1920_v14  ;;  %v2220_v23 = vmax.f32 %v4760_v13, %v2020_v15 }
 0x1a0   : > { %v2118_v26 = vmax.f32 %v1241_v16, %v1918_v18  ;;  %v2218_v27 = vmax.f32 %v1641_v17, %v2018_v19 }
 0x1a1   : > { %v4002_v28 = vpack.c.bf16 %v2120_v22, %v2119_v20  ;;  %v4252_v29 = vpack.c.bf16 %v2220_v23, %v2219_v21  ;;  %v4663_v32 = vpop.f32.mrb[44].mxu0  ;;  %v4763_v33 = vpop.f32.mrb[44].mxu1 }
 0x1a2   : > { %v3997_v30 = vpack.c.bf16 %v2118_v26, %v2117_v24  ;;  %v4247_v31 = vpack.c.bf16 %v2218_v27, %v2217_v25  ;;  %v1923_v34 = vmul.f32 0.2, %v4663_v32  ;;  %v2023_v35 = vmul.f32 0.2, %v4763_v33  ;;  %v1254_v36 = vpop.f32.mrb[45].mxu0  ;;  %v1654_v37 = vpop.f32.mrb[45].mxu1 }
 0x1a3   : > { %4414 = vst [vmem:[%s5419_s15 + $0xa8] sm:$0xff] %v4002_v28   ;;  %4464 = vst [vmem:[%s5419_s15 + $0x238] sm:$0xff] %v4252_v29   ;;  %v1921_v38 = vmul.f32 0.2, %v1254_v36  ;;  %v2021_v39 = vmul.f32 0.2, %v1654_v37 }
 0x1a4   : > { %4413 = vst [vmem:[%s5419_s15 + $0xa0] sm:$0xff] %v3997_v30   ;;  %4463 = vst [vmem:[%s5419_s15 + $0x230] sm:$0xff] %v4247_v31   ;;  %v4664_v40 = vpop.f32.mrb[46].mxu0  ;;  %v4764_v41 = vpop.f32.mrb[46].mxu1  ;;  %v2123_v48 = vmax.f32 %v4663_v32, %v1923_v34  ;;  %v2223_v49 = vmax.f32 %v4763_v33, %v2023_v35 }
 0x1a5   : > { %v1924_v42 = vmul.f32 0.2, %v4664_v40  ;;  %v2024_v43 = vmul.f32 0.2, %v4764_v41  ;;  %v1257_v44 = vpop.f32.mrb[47].mxu0  ;;  %v1657_v45 = vpop.f32.mrb[47].mxu1  ;;  %v2121_v52 = vmax.f32 %v1254_v36, %v1921_v38  ;;  %v2221_v53 = vmax.f32 %v1654_v37, %v2021_v39 }
 0x1a6   : > { %v1922_v46 = vmul.f32 0.2, %v1257_v44  ;;  %v2022_v47 = vmul.f32 0.2, %v1657_v45 }
 0x1a7   : > { %v2124_v50 = vmax.f32 %v4664_v40, %v1924_v42  ;;  %v2224_v51 = vmax.f32 %v4764_v41, %v2024_v43 }
 0x1a8   : > { %v2122_v54 = vmax.f32 %v1257_v44, %v1922_v46  ;;  %v2222_v55 = vmax.f32 %v1657_v45, %v2022_v47 }
 0x1a9   : > { %v4012_v56 = vpack.c.bf16 %v2124_v50, %v2123_v48  ;;  %v4262_v57 = vpack.c.bf16 %v2224_v51, %v2223_v49  ;;  %v4667_v60 = vpop.f32.mrb[48].mxu0  ;;  %v4767_v61 = vpop.f32.mrb[48].mxu1 }
 0x1aa   : > { %v4007_v58 = vpack.c.bf16 %v2122_v54, %v2121_v52  ;;  %v4257_v59 = vpack.c.bf16 %v2222_v55, %v2221_v53  ;;  %v1927_v62 = vmul.f32 0.2, %v4667_v60  ;;  %v2027_v63 = vmul.f32 0.2, %v4767_v61  ;;  %v1270_v0 = vpop.f32.mrb[49].mxu0  ;;  %v1670_v1 = vpop.f32.mrb[49].mxu1 }
 0x1ab   : > { %4416 = vst [vmem:[%s5419_s15 + $0xb8] sm:$0xff] %v4012_v56   ;;  %4466 = vst [vmem:[%s5419_s15 + $0x248] sm:$0xff] %v4262_v57   ;;  %v1925_v2 = vmul.f32 0.2, %v1270_v0  ;;  %v2025_v3 = vmul.f32 0.2, %v1670_v1 }
 0x1ac   : > { %4415 = vst [vmem:[%s5419_s15 + $0xb0] sm:$0xff] %v4007_v58   ;;  %4465 = vst [vmem:[%s5419_s15 + $0x240] sm:$0xff] %v4257_v59   ;;  %v4668_v4 = vpop.f32.mrb[50].mxu0  ;;  %v4768_v5 = vpop.f32.mrb[50].mxu1  ;;  %v2127_v12 = vmax.f32 %v4667_v60, %v1927_v62  ;;  %v2227_v13 = vmax.f32 %v4767_v61, %v2027_v63 }
 0x1ad   : > { %v1928_v6 = vmul.f32 0.2, %v4668_v4  ;;  %v2028_v7 = vmul.f32 0.2, %v4768_v5  ;;  %v1273_v8 = vpop.f32.mrb[51].mxu0  ;;  %v1673_v9 = vpop.f32.mrb[51].mxu1  ;;  %v2125_v16 = vmax.f32 %v1270_v0, %v1925_v2  ;;  %v2225_v17 = vmax.f32 %v1670_v1, %v2025_v3 }
 0x1ae   : > { %v1926_v10 = vmul.f32 0.2, %v1273_v8  ;;  %v2026_v11 = vmul.f32 0.2, %v1673_v9 }
 0x1af   : > { %v2128_v14 = vmax.f32 %v4668_v4, %v1928_v6  ;;  %v2228_v15 = vmax.f32 %v4768_v5, %v2028_v7 }
 0x1b0   : > { %v2126_v18 = vmax.f32 %v1273_v8, %v1926_v10  ;;  %v2226_v19 = vmax.f32 %v1673_v9, %v2026_v11 }
 0x1b1   : > { %v4022_v20 = vpack.c.bf16 %v2128_v14, %v2127_v12  ;;  %v4272_v21 = vpack.c.bf16 %v2228_v15, %v2227_v13  ;;  %v4671_v24 = vpop.f32.mrb[52].mxu0  ;;  %v4771_v25 = vpop.f32.mrb[52].mxu1 }
 0x1b2   : > { %v4017_v22 = vpack.c.bf16 %v2126_v18, %v2125_v16  ;;  %v4267_v23 = vpack.c.bf16 %v2226_v19, %v2225_v17  ;;  %v1931_v26 = vmul.f32 0.2, %v4671_v24  ;;  %v2031_v27 = vmul.f32 0.2, %v4771_v25  ;;  %v1286_v28 = vpop.f32.mrb[53].mxu0  ;;  %v1686_v29 = vpop.f32.mrb[53].mxu1 }
 0x1b3   : > { %4418 = vst [vmem:[%s5419_s15 + $0xc8] sm:$0xff] %v4022_v20   ;;  %4468 = vst [vmem:[%s5419_s15 + $0x258] sm:$0xff] %v4272_v21   ;;  %v1929_v30 = vmul.f32 0.2, %v1286_v28  ;;  %v2029_v31 = vmul.f32 0.2, %v1686_v29 }
 0x1b4   : > { %4417 = vst [vmem:[%s5419_s15 + $0xc0] sm:$0xff] %v4017_v22   ;;  %4467 = vst [vmem:[%s5419_s15 + $0x250] sm:$0xff] %v4267_v23   ;;  %v4672_v32 = vpop.f32.mrb[54].mxu0  ;;  %v4772_v33 = vpop.f32.mrb[54].mxu1  ;;  %v2131_v40 = vmax.f32 %v4671_v24, %v1931_v26  ;;  %v2231_v41 = vmax.f32 %v4771_v25, %v2031_v27 }
 0x1b5   : > { %v1932_v34 = vmul.f32 0.2, %v4672_v32  ;;  %v2032_v35 = vmul.f32 0.2, %v4772_v33  ;;  %v1289_v36 = vpop.f32.mrb[55].mxu0  ;;  %v1689_v37 = vpop.f32.mrb[55].mxu1  ;;  %v2129_v44 = vmax.f32 %v1286_v28, %v1929_v30  ;;  %v2229_v45 = vmax.f32 %v1686_v29, %v2029_v31 }
 0x1b6   : > { %v1930_v38 = vmul.f32 0.2, %v1289_v36  ;;  %v2030_v39 = vmul.f32 0.2, %v1689_v37 }
 0x1b7   : > { %v2132_v42 = vmax.f32 %v4672_v32, %v1932_v34  ;;  %v2232_v43 = vmax.f32 %v4772_v33, %v2032_v35 }
 0x1b8   : > { %v2130_v46 = vmax.f32 %v1289_v36, %v1930_v38  ;;  %v2230_v47 = vmax.f32 %v1689_v37, %v2030_v39 }
 0x1b9   : > { %v4032_v48 = vpack.c.bf16 %v2132_v42, %v2131_v40  ;;  %v4282_v49 = vpack.c.bf16 %v2232_v43, %v2231_v41  ;;  %v4675_v52 = vpop.f32.mrb[56].mxu0  ;;  %v4775_v53 = vpop.f32.mrb[56].mxu1 }
 0x1ba   : > { %v4027_v50 = vpack.c.bf16 %v2130_v46, %v2129_v44  ;;  %v4277_v51 = vpack.c.bf16 %v2230_v47, %v2229_v45  ;;  %v1935_v54 = vmul.f32 0.2, %v4675_v52  ;;  %v2035_v55 = vmul.f32 0.2, %v4775_v53  ;;  %v1302_v56 = vpop.f32.mrb[57].mxu0  ;;  %v1702_v57 = vpop.f32.mrb[57].mxu1 }
 0x1bb   : > { %4420 = vst [vmem:[%s5419_s15 + $0xd8] sm:$0xff] %v4032_v48   ;;  %4470 = vst [vmem:[%s5419_s15 + $0x268] sm:$0xff] %v4282_v49   ;;  %v1933_v58 = vmul.f32 0.2, %v1302_v56  ;;  %v2033_v59 = vmul.f32 0.2, %v1702_v57 }
 0x1bc   : > { %4419 = vst [vmem:[%s5419_s15 + $0xd0] sm:$0xff] %v4027_v50   ;;  %4469 = vst [vmem:[%s5419_s15 + $0x260] sm:$0xff] %v4277_v51   ;;  %v4676_v60 = vpop.f32.mrb[58].mxu0  ;;  %v4776_v61 = vpop.f32.mrb[58].mxu1  ;;  %v2135_v4 = vmax.f32 %v4675_v52, %v1935_v54  ;;  %v2235_v5 = vmax.f32 %v4775_v53, %v2035_v55 }
 0x1bd   : > { %v1936_v62 = vmul.f32 0.2, %v4676_v60  ;;  %v2036_v63 = vmul.f32 0.2, %v4776_v61  ;;  %v1305_v0 = vpop.f32.mrb[59].mxu0  ;;  %v1705_v1 = vpop.f32.mrb[59].mxu1  ;;  %v2133_v8 = vmax.f32 %v1302_v56, %v1933_v58  ;;  %v2233_v9 = vmax.f32 %v1702_v57, %v2033_v59 }
 0x1be   : > { %v1934_v2 = vmul.f32 0.2, %v1305_v0  ;;  %v2034_v3 = vmul.f32 0.2, %v1705_v1 }
 0x1bf   : > { %v2136_v6 = vmax.f32 %v4676_v60, %v1936_v62  ;;  %v2236_v7 = vmax.f32 %v4776_v61, %v2036_v63 }
 0x1c0   : > { %v2134_v10 = vmax.f32 %v1305_v0, %v1934_v2  ;;  %v2234_v11 = vmax.f32 %v1705_v1, %v2034_v3 }
 0x1c1   : > { %v4042_v12 = vpack.c.bf16 %v2136_v6, %v2135_v4  ;;  %v4292_v13 = vpack.c.bf16 %v2236_v7, %v2235_v5  ;;  %v4679_v16 = vpop.f32.mrb[60].mxu0  ;;  %v4779_v17 = vpop.f32.mrb[60].mxu1 }
 0x1c2   : > { %v4037_v14 = vpack.c.bf16 %v2134_v10, %v2133_v8  ;;  %v4287_v15 = vpack.c.bf16 %v2234_v11, %v2233_v9  ;;  %v1939_v18 = vmul.f32 0.2, %v4679_v16  ;;  %v2039_v19 = vmul.f32 0.2, %v4779_v17  ;;  %v1318_v20 = vpop.f32.mrb[61].mxu0  ;;  %v1718_v21 = vpop.f32.mrb[61].mxu1 }
 0x1c3   : > { %4422 = vst [vmem:[%s5419_s15 + $0xe8] sm:$0xff] %v4042_v12   ;;  %4472 = vst [vmem:[%s5419_s15 + $0x278] sm:$0xff] %v4292_v13   ;;  %v1937_v22 = vmul.f32 0.2, %v1318_v20  ;;  %v2037_v23 = vmul.f32 0.2, %v1718_v21 }
 0x1c4   : > { %4421 = vst [vmem:[%s5419_s15 + $0xe0] sm:$0xff] %v4037_v14   ;;  %4471 = vst [vmem:[%s5419_s15 + $0x270] sm:$0xff] %v4287_v15   ;;  %v4680_v24 = vpop.f32.mrb[62].mxu0  ;;  %v4780_v25 = vpop.f32.mrb[62].mxu1  ;;  %v2139_v32 = vmax.f32 %v4679_v16, %v1939_v18  ;;  %v2239_v33 = vmax.f32 %v4779_v17, %v2039_v19 }
 0x1c5   : > { %v1940_v26 = vmul.f32 0.2, %v4680_v24  ;;  %v2040_v27 = vmul.f32 0.2, %v4780_v25  ;;  %v1321_v28 = vpop.f32.mrb[63].mxu0  ;;  %v1721_v29 = vpop.f32.mrb[63].mxu1  ;;  %v2137_v36 = vmax.f32 %v1318_v20, %v1937_v22  ;;  %v2237_v37 = vmax.f32 %v1718_v21, %v2037_v23 }
 0x1c6   : > { %v1938_v30 = vmul.f32 0.2, %v1321_v28  ;;  %v2038_v31 = vmul.f32 0.2, %v1721_v29 }
 0x1c7   : > { %v2140_v34 = vmax.f32 %v4680_v24, %v1940_v26  ;;  %v2240_v35 = vmax.f32 %v4780_v25, %v2040_v27 }
 0x1c8   : > { %v2138_v38 = vmax.f32 %v1321_v28, %v1938_v30  ;;  %v2238_v39 = vmax.f32 %v1721_v29, %v2038_v31 }
 0x1c9   : > { %v4052_v40 = vpack.c.bf16 %v2140_v34, %v2139_v32  ;;  %v4302_v41 = vpack.c.bf16 %v2240_v35, %v2239_v33  ;;  %v4683_v44 = vpop.f32.mrb[64].mxu0  ;;  %v4783_v45 = vpop.f32.mrb[64].mxu1 }
 0x1ca   : > { %v4047_v42 = vpack.c.bf16 %v2138_v38, %v2137_v36  ;;  %v4297_v43 = vpack.c.bf16 %v2238_v39, %v2237_v37  ;;  %v1943_v46 = vmul.f32 0.2, %v4683_v44  ;;  %v2043_v47 = vmul.f32 0.2, %v4783_v45  ;;  %v1334_v48 = vpop.f32.mrb[65].mxu0  ;;  %v1734_v49 = vpop.f32.mrb[65].mxu1 }
 0x1cb   : > { %4424 = vst [vmem:[%s5419_s15 + $0xf8] sm:$0xff] %v4052_v40   ;;  %4474 = vst [vmem:[%s5419_s15 + $0x288] sm:$0xff] %v4302_v41   ;;  %v1941_v50 = vmul.f32 0.2, %v1334_v48  ;;  %v2041_v51 = vmul.f32 0.2, %v1734_v49 }
 0x1cc   : > { %4423 = vst [vmem:[%s5419_s15 + $0xf0] sm:$0xff] %v4047_v42   ;;  %4473 = vst [vmem:[%s5419_s15 + $0x280] sm:$0xff] %v4297_v43   ;;  %v4684_v52 = vpop.f32.mrb[66].mxu0  ;;  %v4784_v53 = vpop.f32.mrb[66].mxu1  ;;  %v2143_v60 = vmax.f32 %v4683_v44, %v1943_v46  ;;  %v2243_v61 = vmax.f32 %v4783_v45, %v2043_v47 }
 0x1cd   : > { %v1944_v54 = vmul.f32 0.2, %v4684_v52  ;;  %v2044_v55 = vmul.f32 0.2, %v4784_v53  ;;  %v1337_v56 = vpop.f32.mrb[67].mxu0  ;;  %v1737_v57 = vpop.f32.mrb[67].mxu1  ;;  %v2141_v0 = vmax.f32 %v1334_v48, %v1941_v50  ;;  %v2241_v1 = vmax.f32 %v1734_v49, %v2041_v51 }
 0x1ce   : > { %v1942_v58 = vmul.f32 0.2, %v1337_v56  ;;  %v2042_v59 = vmul.f32 0.2, %v1737_v57 }
 0x1cf   : > { %v2144_v62 = vmax.f32 %v4684_v52, %v1944_v54  ;;  %v2244_v63 = vmax.f32 %v4784_v53, %v2044_v55 }
 0x1d0   : > { %v2142_v2 = vmax.f32 %v1337_v56, %v1942_v58  ;;  %v2242_v3 = vmax.f32 %v1737_v57, %v2042_v59 }
 0x1d1   : > { %v4062_v4 = vpack.c.bf16 %v2144_v62, %v2143_v60  ;;  %v4312_v5 = vpack.c.bf16 %v2244_v63, %v2243_v61  ;;  %v4687_v8 = vpop.f32.mrb[68].mxu0  ;;  %v4787_v9 = vpop.f32.mrb[68].mxu1 }
 0x1d2   : > { %v4057_v6 = vpack.c.bf16 %v2142_v2, %v2141_v0  ;;  %v4307_v7 = vpack.c.bf16 %v2242_v3, %v2241_v1  ;;  %v1947_v10 = vmul.f32 0.2, %v4687_v8  ;;  %v2047_v11 = vmul.f32 0.2, %v4787_v9  ;;  %v1350_v12 = vpop.f32.mrb[69].mxu0  ;;  %v1750_v13 = vpop.f32.mrb[69].mxu1 }
 0x1d3   : > { %4426 = vst [vmem:[%s5419_s15 + $0x108] sm:$0xff] %v4062_v4   ;;  %4476 = vst [vmem:[%s5419_s15 + $0x298] sm:$0xff] %v4312_v5   ;;  %v1945_v14 = vmul.f32 0.2, %v1350_v12  ;;  %v2045_v15 = vmul.f32 0.2, %v1750_v13 }
 0x1d4   : > { %4425 = vst [vmem:[%s5419_s15 + $0x100] sm:$0xff] %v4057_v6   ;;  %4475 = vst [vmem:[%s5419_s15 + $0x290] sm:$0xff] %v4307_v7   ;;  %v4688_v16 = vpop.f32.mrb[70].mxu0  ;;  %v4788_v17 = vpop.f32.mrb[70].mxu1  ;;  %v2147_v24 = vmax.f32 %v4687_v8, %v1947_v10  ;;  %v2247_v25 = vmax.f32 %v4787_v9, %v2047_v11 }
 0x1d5   : > { %v1948_v18 = vmul.f32 0.2, %v4688_v16  ;;  %v2048_v19 = vmul.f32 0.2, %v4788_v17  ;;  %v1353_v20 = vpop.f32.mrb[71].mxu0  ;;  %v1753_v21 = vpop.f32.mrb[71].mxu1  ;;  %v2145_v28 = vmax.f32 %v1350_v12, %v1945_v14  ;;  %v2245_v29 = vmax.f32 %v1750_v13, %v2045_v15 }
 0x1d6   : > { %v1946_v22 = vmul.f32 0.2, %v1353_v20  ;;  %v2046_v23 = vmul.f32 0.2, %v1753_v21 }
 0x1d7   : > { %v2148_v26 = vmax.f32 %v4688_v16, %v1948_v18  ;;  %v2248_v27 = vmax.f32 %v4788_v17, %v2048_v19 }
 0x1d8   : > { %v2146_v30 = vmax.f32 %v1353_v20, %v1946_v22  ;;  %v2246_v31 = vmax.f32 %v1753_v21, %v2046_v23 }
 0x1d9   : > { %v4072_v32 = vpack.c.bf16 %v2148_v26, %v2147_v24  ;;  %v4322_v33 = vpack.c.bf16 %v2248_v27, %v2247_v25  ;;  %v4691_v36 = vpop.f32.mrb[72].mxu0  ;;  %v4791_v37 = vpop.f32.mrb[72].mxu1 }
 0x1da   : > { %v4067_v34 = vpack.c.bf16 %v2146_v30, %v2145_v28  ;;  %v4317_v35 = vpack.c.bf16 %v2246_v31, %v2245_v29  ;;  %v1951_v38 = vmul.f32 0.2, %v4691_v36  ;;  %v2051_v39 = vmul.f32 0.2, %v4791_v37  ;;  %v1366_v40 = vpop.f32.mrb[73].mxu0  ;;  %v1766_v41 = vpop.f32.mrb[73].mxu1 }
 0x1db   : > { %4428 = vst [vmem:[%s5419_s15 + $0x118] sm:$0xff] %v4072_v32   ;;  %4478 = vst [vmem:[%s5419_s15 + $0x2a8] sm:$0xff] %v4322_v33   ;;  %v1949_v42 = vmul.f32 0.2, %v1366_v40  ;;  %v2049_v43 = vmul.f32 0.2, %v1766_v41 }
 0x1dc   : > { %4427 = vst [vmem:[%s5419_s15 + $0x110] sm:$0xff] %v4067_v34   ;;  %4477 = vst [vmem:[%s5419_s15 + $0x2a0] sm:$0xff] %v4317_v35   ;;  %v4692_v44 = vpop.f32.mrb[74].mxu0  ;;  %v4792_v45 = vpop.f32.mrb[74].mxu1  ;;  %v2151_v52 = vmax.f32 %v4691_v36, %v1951_v38  ;;  %v2251_v53 = vmax.f32 %v4791_v37, %v2051_v39 }
 0x1dd   : > { %v1952_v46 = vmul.f32 0.2, %v4692_v44  ;;  %v2052_v47 = vmul.f32 0.2, %v4792_v45  ;;  %v1369_v48 = vpop.f32.mrb[75].mxu0  ;;  %v1769_v49 = vpop.f32.mrb[75].mxu1  ;;  %v2149_v56 = vmax.f32 %v1366_v40, %v1949_v42  ;;  %v2249_v57 = vmax.f32 %v1766_v41, %v2049_v43 }
 0x1de   : > { %v1950_v50 = vmul.f32 0.2, %v1369_v48  ;;  %v2050_v51 = vmul.f32 0.2, %v1769_v49 }
 0x1df   : > { %v2152_v54 = vmax.f32 %v4692_v44, %v1952_v46  ;;  %v2252_v55 = vmax.f32 %v4792_v45, %v2052_v47 }
 0x1e0   : > { %v2150_v58 = vmax.f32 %v1369_v48, %v1950_v50  ;;  %v2250_v59 = vmax.f32 %v1769_v49, %v2050_v51 }
 0x1e1   : > { %v4082_v60 = vpack.c.bf16 %v2152_v54, %v2151_v52  ;;  %v4332_v61 = vpack.c.bf16 %v2252_v55, %v2251_v53  ;;  %v4695_v0 = vpop.f32.mrb[76].mxu0  ;;  %v4795_v1 = vpop.f32.mrb[76].mxu1 }
 0x1e2   : > { %v4077_v62 = vpack.c.bf16 %v2150_v58, %v2149_v56  ;;  %v4327_v63 = vpack.c.bf16 %v2250_v59, %v2249_v57  ;;  %v1955_v2 = vmul.f32 0.2, %v4695_v0  ;;  %v2055_v3 = vmul.f32 0.2, %v4795_v1  ;;  %v1382_v4 = vpop.f32.mrb[77].mxu0  ;;  %v1782_v5 = vpop.f32.mrb[77].mxu1 }
 0x1e3   : > { %4430 = vst [vmem:[%s5419_s15 + $0x128] sm:$0xff] %v4082_v60   ;;  %4480 = vst [vmem:[%s5419_s15 + $0x2b8] sm:$0xff] %v4332_v61   ;;  %v1953_v6 = vmul.f32 0.2, %v1382_v4  ;;  %v2053_v7 = vmul.f32 0.2, %v1782_v5 }
 0x1e4   : > { %4429 = vst [vmem:[%s5419_s15 + $0x120] sm:$0xff] %v4077_v62   ;;  %4479 = vst [vmem:[%s5419_s15 + $0x2b0] sm:$0xff] %v4327_v63   ;;  %v4696_v8 = vpop.f32.mrb[78].mxu0  ;;  %v4796_v9 = vpop.f32.mrb[78].mxu1  ;;  %v2155_v16 = vmax.f32 %v4695_v0, %v1955_v2  ;;  %v2255_v17 = vmax.f32 %v4795_v1, %v2055_v3 }
 0x1e5   : > { %v1956_v10 = vmul.f32 0.2, %v4696_v8  ;;  %v2056_v11 = vmul.f32 0.2, %v4796_v9  ;;  %v1385_v12 = vpop.f32.mrb[79].mxu0  ;;  %v1785_v13 = vpop.f32.mrb[79].mxu1  ;;  %v2153_v20 = vmax.f32 %v1382_v4, %v1953_v6  ;;  %v2253_v21 = vmax.f32 %v1782_v5, %v2053_v7 }
 0x1e6   : > { %v1954_v14 = vmul.f32 0.2, %v1385_v12  ;;  %v2054_v15 = vmul.f32 0.2, %v1785_v13 }
 0x1e7   : > { %v2156_v18 = vmax.f32 %v4696_v8, %v1956_v10  ;;  %v2256_v19 = vmax.f32 %v4796_v9, %v2056_v11 }
 0x1e8   : > { %v2154_v22 = vmax.f32 %v1385_v12, %v1954_v14  ;;  %v2254_v23 = vmax.f32 %v1785_v13, %v2054_v15 }
 0x1e9   : > { %v4092_v24 = vpack.c.bf16 %v2156_v18, %v2155_v16  ;;  %v4342_v25 = vpack.c.bf16 %v2256_v19, %v2255_v17  ;;  %v4699_v28 = vpop.f32.mrb[80].mxu0  ;;  %v4799_v29 = vpop.f32.mrb[80].mxu1 }
 0x1ea   : > { %v4087_v26 = vpack.c.bf16 %v2154_v22, %v2153_v20  ;;  %v4337_v27 = vpack.c.bf16 %v2254_v23, %v2253_v21  ;;  %v1959_v30 = vmul.f32 0.2, %v4699_v28  ;;  %v2059_v31 = vmul.f32 0.2, %v4799_v29  ;;  %v1398_v32 = vpop.f32.mrb[81].mxu0  ;;  %v1798_v33 = vpop.f32.mrb[81].mxu1 }
 0x1eb   : > { %4432 = vst [vmem:[%s5419_s15 + $0x138] sm:$0xff] %v4092_v24   ;;  %4482 = vst [vmem:[%s5419_s15 + $0x2c8] sm:$0xff] %v4342_v25   ;;  %v1957_v34 = vmul.f32 0.2, %v1398_v32  ;;  %v2057_v35 = vmul.f32 0.2, %v1798_v33 }
 0x1ec   : > { %4431 = vst [vmem:[%s5419_s15 + $0x130] sm:$0xff] %v4087_v26   ;;  %4481 = vst [vmem:[%s5419_s15 + $0x2c0] sm:$0xff] %v4337_v27   ;;  %v4700_v36 = vpop.f32.mrb[82].mxu0  ;;  %v4800_v37 = vpop.f32.mrb[82].mxu1  ;;  %v2159_v44 = vmax.f32 %v4699_v28, %v1959_v30  ;;  %v2259_v45 = vmax.f32 %v4799_v29, %v2059_v31 }
 0x1ed   : > { %v1960_v38 = vmul.f32 0.2, %v4700_v36  ;;  %v2060_v39 = vmul.f32 0.2, %v4800_v37  ;;  %v1401_v40 = vpop.f32.mrb[83].mxu0  ;;  %v1801_v41 = vpop.f32.mrb[83].mxu1  ;;  %v2157_v48 = vmax.f32 %v1398_v32, %v1957_v34  ;;  %v2257_v49 = vmax.f32 %v1798_v33, %v2057_v35 }
 0x1ee   : > { %v1958_v42 = vmul.f32 0.2, %v1401_v40  ;;  %v2058_v43 = vmul.f32 0.2, %v1801_v41 }
 0x1ef   : > { %v2160_v46 = vmax.f32 %v4700_v36, %v1960_v38  ;;  %v2260_v47 = vmax.f32 %v4800_v37, %v2060_v39 }
 0x1f0   : > { %v2158_v50 = vmax.f32 %v1401_v40, %v1958_v42  ;;  %v2258_v51 = vmax.f32 %v1801_v41, %v2058_v43 }
 0x1f1   : > { %v4102_v52 = vpack.c.bf16 %v2160_v46, %v2159_v44  ;;  %v4352_v53 = vpack.c.bf16 %v2260_v47, %v2259_v45  ;;  %v4703_v56 = vpop.f32.mrb[84].mxu0  ;;  %v4803_v57 = vpop.f32.mrb[84].mxu1 }
 0x1f2   : > { %v4097_v54 = vpack.c.bf16 %v2158_v50, %v2157_v48  ;;  %v4347_v55 = vpack.c.bf16 %v2258_v51, %v2257_v49  ;;  %v1963_v58 = vmul.f32 0.2, %v4703_v56  ;;  %v2063_v59 = vmul.f32 0.2, %v4803_v57  ;;  %v1414_v60 = vpop.f32.mrb[85].mxu0  ;;  %v1814_v61 = vpop.f32.mrb[85].mxu1 }
 0x1f3   : > { %4434 = vst [vmem:[%s5419_s15 + $0x148] sm:$0xff] %v4102_v52   ;;  %4484 = vst [vmem:[%s5419_s15 + $0x2d8] sm:$0xff] %v4352_v53   ;;  %v1961_v62 = vmul.f32 0.2, %v1414_v60  ;;  %v2061_v63 = vmul.f32 0.2, %v1814_v61 }
 0x1f4   : > { %4433 = vst [vmem:[%s5419_s15 + $0x140] sm:$0xff] %v4097_v54   ;;  %4483 = vst [vmem:[%s5419_s15 + $0x2d0] sm:$0xff] %v4347_v55   ;;  %v4704_v0 = vpop.f32.mrb[86].mxu0  ;;  %v4804_v1 = vpop.f32.mrb[86].mxu1  ;;  %v2163_v8 = vmax.f32 %v4703_v56, %v1963_v58  ;;  %v2263_v9 = vmax.f32 %v4803_v57, %v2063_v59 }
 0x1f5   : > { %v1964_v2 = vmul.f32 0.2, %v4704_v0  ;;  %v2064_v3 = vmul.f32 0.2, %v4804_v1  ;;  %v1417_v4 = vpop.f32.mrb[87].mxu0  ;;  %v1817_v5 = vpop.f32.mrb[87].mxu1  ;;  %v2161_v12 = vmax.f32 %v1414_v60, %v1961_v62  ;;  %v2261_v13 = vmax.f32 %v1814_v61, %v2061_v63 }
 0x1f6   : > { %v1962_v6 = vmul.f32 0.2, %v1417_v4  ;;  %v2062_v7 = vmul.f32 0.2, %v1817_v5 }
 0x1f7   : > { %v2164_v10 = vmax.f32 %v4704_v0, %v1964_v2  ;;  %v2264_v11 = vmax.f32 %v4804_v1, %v2064_v3 }
 0x1f8   : > { %v2162_v14 = vmax.f32 %v1417_v4, %v1962_v6  ;;  %v2262_v15 = vmax.f32 %v1817_v5, %v2062_v7 }
 0x1f9   : > { %v4112_v16 = vpack.c.bf16 %v2164_v10, %v2163_v8  ;;  %v4362_v17 = vpack.c.bf16 %v2264_v11, %v2263_v9  ;;  %v4707_v20 = vpop.f32.mrb[88].mxu0  ;;  %v4807_v21 = vpop.f32.mrb[88].mxu1 }
 0x1fa   : > { %v4107_v18 = vpack.c.bf16 %v2162_v14, %v2161_v12  ;;  %v4357_v19 = vpack.c.bf16 %v2262_v15, %v2261_v13  ;;  %v1967_v22 = vmul.f32 0.2, %v4707_v20  ;;  %v2067_v23 = vmul.f32 0.2, %v4807_v21  ;;  %v1430_v24 = vpop.f32.mrb[89].mxu0  ;;  %v1830_v25 = vpop.f32.mrb[89].mxu1 }
 0x1fb   : > { %4436 = vst [vmem:[%s5419_s15 + $0x158] sm:$0xff] %v4112_v16   ;;  %4486 = vst [vmem:[%s5419_s15 + $0x2e8] sm:$0xff] %v4362_v17   ;;  %v1965_v26 = vmul.f32 0.2, %v1430_v24  ;;  %v2065_v27 = vmul.f32 0.2, %v1830_v25 }
 0x1fc   : > { %4435 = vst [vmem:[%s5419_s15 + $0x150] sm:$0xff] %v4107_v18   ;;  %4485 = vst [vmem:[%s5419_s15 + $0x2e0] sm:$0xff] %v4357_v19   ;;  %v4708_v28 = vpop.f32.mrb[90].mxu0  ;;  %v4808_v29 = vpop.f32.mrb[90].mxu1  ;;  %v2167_v36 = vmax.f32 %v4707_v20, %v1967_v22  ;;  %v2267_v37 = vmax.f32 %v4807_v21, %v2067_v23 }
 0x1fd   : > { %v1968_v30 = vmul.f32 0.2, %v4708_v28  ;;  %v2068_v31 = vmul.f32 0.2, %v4808_v29  ;;  %v1433_v32 = vpop.f32.mrb[91].mxu0  ;;  %v1833_v33 = vpop.f32.mrb[91].mxu1  ;;  %v2165_v40 = vmax.f32 %v1430_v24, %v1965_v26  ;;  %v2265_v41 = vmax.f32 %v1830_v25, %v2065_v27 }
 0x1fe   : > { %v1966_v34 = vmul.f32 0.2, %v1433_v32  ;;  %v2066_v35 = vmul.f32 0.2, %v1833_v33 }
 0x1ff   : > { %v2168_v38 = vmax.f32 %v4708_v28, %v1968_v30  ;;  %v2268_v39 = vmax.f32 %v4808_v29, %v2068_v31 }
 0x200   : > { %v2166_v42 = vmax.f32 %v1433_v32, %v1966_v34  ;;  %v2266_v43 = vmax.f32 %v1833_v33, %v2066_v35 }
 0x201   : > { %v4122_v44 = vpack.c.bf16 %v2168_v38, %v2167_v36  ;;  %v4372_v45 = vpack.c.bf16 %v2268_v39, %v2267_v37  ;;  %v4711_v48 = vpop.f32.mrb[92].mxu0  ;;  %v4811_v49 = vpop.f32.mrb[92].mxu1 }
 0x202   : > { %v4117_v46 = vpack.c.bf16 %v2166_v42, %v2165_v40  ;;  %v4367_v47 = vpack.c.bf16 %v2266_v43, %v2265_v41  ;;  %v1971_v50 = vmul.f32 0.2, %v4711_v48  ;;  %v2071_v51 = vmul.f32 0.2, %v4811_v49  ;;  %v1446_v52 = vpop.f32.mrb[93].mxu0  ;;  %v1846_v53 = vpop.f32.mrb[93].mxu1 }
 0x203   : > { %4438 = vst [vmem:[%s5419_s15 + $0x168] sm:$0xff] %v4122_v44   ;;  %4488 = vst [vmem:[%s5419_s15 + $0x2f8] sm:$0xff] %v4372_v45   ;;  %v1969_v54 = vmul.f32 0.2, %v1446_v52  ;;  %v2069_v55 = vmul.f32 0.2, %v1846_v53 }
 0x204   : > { %4437 = vst [vmem:[%s5419_s15 + $0x160] sm:$0xff] %v4117_v46   ;;  %4487 = vst [vmem:[%s5419_s15 + $0x2f0] sm:$0xff] %v4367_v47   ;;  %v4712_v56 = vpop.f32.mrb[94].mxu0  ;;  %v4812_v57 = vpop.f32.mrb[94].mxu1  ;;  %v2171_v0 = vmax.f32 %v4711_v48, %v1971_v50  ;;  %v2271_v1 = vmax.f32 %v4811_v49, %v2071_v51 }
 0x205   : > { %v1972_v58 = vmul.f32 0.2, %v4712_v56  ;;  %v2072_v59 = vmul.f32 0.2, %v4812_v57  ;;  %v1449_v60 = vpop.f32.mrb[95].mxu0  ;;  %v1849_v61 = vpop.f32.mrb[95].mxu1  ;;  %v2169_v4 = vmax.f32 %v1446_v52, %v1969_v54  ;;  %v2269_v5 = vmax.f32 %v1846_v53, %v2069_v55 }
 0x206   : > { %v1970_v62 = vmul.f32 0.2, %v1449_v60  ;;  %v2070_v63 = vmul.f32 0.2, %v1849_v61 }
 0x207   : > { %v2172_v2 = vmax.f32 %v4712_v56, %v1972_v58  ;;  %v2272_v3 = vmax.f32 %v4812_v57, %v2072_v59 }
 0x208   : > { %v2170_v6 = vmax.f32 %v1449_v60, %v1970_v62  ;;  %v2270_v7 = vmax.f32 %v1849_v61, %v2070_v63 }
 0x209   : > { %v4132_v8 = vpack.c.bf16 %v2172_v2, %v2171_v0  ;;  %v4382_v9 = vpack.c.bf16 %v2272_v3, %v2271_v1  ;;  %v4715_v12 = vpop.f32.mrb[96].mxu0  ;;  %v4815_v13 = vpop.f32.mrb[96].mxu1 }
 0x20a   : > { %v4127_v10 = vpack.c.bf16 %v2170_v6, %v2169_v4  ;;  %v4377_v11 = vpack.c.bf16 %v2270_v7, %v2269_v5  ;;  %v1975_v14 = vmul.f32 0.2, %v4715_v12  ;;  %v2075_v15 = vmul.f32 0.2, %v4815_v13  ;;  %v1462_v16 = vpop.f32.mrb[97].mxu0  ;;  %v1862_v17 = vpop.f32.mrb[97].mxu1 }
 0x20b   : > { %4440 = vst [vmem:[%s5419_s15 + $0x178] sm:$0xff] %v4132_v8   ;;  %4490 = vst [vmem:[%s5419_s15 + $0x308] sm:$0xff] %v4382_v9   ;;  %v1973_v18 = vmul.f32 0.2, %v1462_v16  ;;  %v2073_v19 = vmul.f32 0.2, %v1862_v17 }
 0x20c   : > { %4439 = vst [vmem:[%s5419_s15 + $0x170] sm:$0xff] %v4127_v10   ;;  %4489 = vst [vmem:[%s5419_s15 + $0x300] sm:$0xff] %v4377_v11   ;;  %v4716_v20 = vpop.f32.mrb[98].mxu0  ;;  %v4816_v21 = vpop.f32.mrb[98].mxu1  ;;  %v2175_v28 = vmax.f32 %v4715_v12, %v1975_v14  ;;  %v2275_v29 = vmax.f32 %v4815_v13, %v2075_v15 }
 0x20d   : > { %v1976_v22 = vmul.f32 0.2, %v4716_v20  ;;  %v2076_v23 = vmul.f32 0.2, %v4816_v21  ;;  %v1465_v24 = vpop.f32.mrb[99].mxu0  ;;  %v1865_v25 = vpop.f32.mrb[99].mxu1  ;;  %v2173_v32 = vmax.f32 %v1462_v16, %v1973_v18  ;;  %v2273_v33 = vmax.f32 %v1862_v17, %v2073_v19 }
 0x20e   : > { %v1974_v26 = vmul.f32 0.2, %v1465_v24  ;;  %v2074_v27 = vmul.f32 0.2, %v1865_v25 }
 0x20f   : > { %v2176_v30 = vmax.f32 %v4716_v20, %v1976_v22  ;;  %v2276_v31 = vmax.f32 %v4816_v21, %v2076_v23 }
 0x210   : > { %v2174_v34 = vmax.f32 %v1465_v24, %v1974_v26  ;;  %v2274_v35 = vmax.f32 %v1865_v25, %v2074_v27 }
 0x211   : > { %v4142_v36 = vpack.c.bf16 %v2176_v30, %v2175_v28  ;;  %v4392_v37 = vpack.c.bf16 %v2276_v31, %v2275_v29 }
 0x212   : > { %v4137_v38 = vpack.c.bf16 %v2174_v34, %v2173_v32  ;;  %v4387_v39 = vpack.c.bf16 %v2274_v35, %v2273_v33 }
 0x213   : > { %4442 = vst [vmem:[%s5419_s15 + $0x188] sm:$0xff] %v4142_v36   ;;  %4492 = vst [vmem:[%s5419_s15 + $0x318] sm:$0xff] %v4392_v37  }
 0x214   : > { %4441 = vst [vmem:[%s5419_s15 + $0x180] sm:$0xff] %v4137_v38   ;;  %4491 = vst [vmem:[%s5419_s15 + $0x310] sm:$0xff] %v4387_v39  }
 0x215   : > { %5075 = shalt.err (!%p5072_p7)
}
 0x216   : > { %s5076_s20 = scalar_lea.hbm %s5522_s22, 12800  ;;  %s5080_s19 = scalar_lea.hbm %s5574_s2, 25600 }
 0x217   : > { %p5077_p9 = scmp.ne.s32.totalorder %s5522_s22, %s5076_s20  ;;  %p5081_p5 = scmp.lt.u32.totalorder %s5522_s22, %s5574_s2 }
 0x218   : > { %p5082_p13 = scmp.lt.u32.totalorder %s5080_s19, %s5076_s20  ;;  %p5084_p4 = scmp.lt.u32.totalorder %s5076_s20, %s5522_s22 }
 0x219   : > { %p5078_p1 = pnand %p5077_p9, %p5250_p12 }
 0x21a   : > { %p5083_p2 = por %p5082_p13, %p5081_p5 }
 0x21b   : > { %p5079_p0 = pneg %p5078_p1 }
 0x21c   : > { %p5085_p6 = por %p5084_p4, %p5083_p2 }
 0x21e   : > { %p5086_p8 = pnand %p5085_p6, %p5079_p0 }
 0x220   : > { %5089 = shalt.err (!%p5086_p8)
}
 0x221   : > { %s5139_s30 = smov 64   ;;  %s5140_s25 = smov 4  }
 0x222   : > { %4841 = dma.vmem_to_hbm [thread:$0]  (%p5250_p12), %s5524_s13, 12800, %s5522_s22, %s3278_s27, %s5139_s30, %s5139_s30, %s5140_s25  }
 0x223 PF: > { %s3306_s15 = sand.u32 1, %s5120_s9   ;;  %p5589_p10 = scmp.ne.s32.totalorder %s5579_s16, 0 }
 0x224   : > { %p5590_p11 = scmp.ge.s32.totalorder %s5132_s12, 2  ;;  %s3307_s17 = scalar_lea.sflag [#allocation4], %s3306_s15 }
 0x226   : > { %p4852_p3 = pnand %p5590_p11, %p5589_p10 }
 0x228   : > { %5115 = dma.done.wait (!%p4852_p3), %s3307_s17, 12800  }
 0x229   : > { %5117 = vsyncadd (!%p4852_p3), %s3307_s17, 4294954496  ;;  %p16_p7 = scmp.ge.s32.totalorder %s5212_s21, 4   ;;  %s5591_s9 = smov %s5124_s10 }
 0x22a   : > { %s5592_s10 = smov %s5128_s11  ;;  %s5593_s11 = smov %s5246_s8 }
 0x22b   : > { %s5594_s12 = smov %s5212_s21  ;;  %18 = sbr.rel (!%p16_p7) target bundleno = 6 (0x6), region = 77 }
 0x232   :  { %3312 = vsyncpa [#allocation3], 1 }
 0x233   :  { %3314 = vsyncpa [#allocation3 + $0x1], 1 }
 0x234   :  { %3315 = vsyncpa [#allocation6], 1 }
 0x235   :  { %3316 = vsyncpa [#allocation4], 1 }
 0x236   :  { %3318 = vsyncpa [#allocation4 + $0x1], 1 }

// kernel: discriminator_forward.5
= control target key start
LH: loop header
LB: loop body
LE: loop exit
PB: predicated region body
PF: predicated region fallthrough
CT: control target
= control target key end

     0   :  { %9 = vsyncpa [#allocation3], 0  ;;  %s5338_s0 = inlined_call_operand.hbm [shape: bf16[800,128], index: 0, kind: input, shape index: {}]   ;;  %s5339_s1 = inlined_call_operand.hbm [shape: bf16[128,128], index: 1, kind: input, shape index: {}]   ;;  %s5340_s2 = inlined_call_operand.hbm [shape: f32[1,128], index: 2, kind: input, shape index: {}]   ;;  %s5341_s3 = inlined_call_operand.hbm [shape: f32[1,128], index: 3, kind: input, shape index: {}]   ;;  %s5342_s4 = inlined_call_operand.hbm [shape: bf16[800,128], index: 4, kind: output, shape index: {}]  }
   0x1   :  { %10 = vsyncpa [#allocation6], 0 }
   0x2   :  { %11 = vsyncpa [#allocation9], 0 }
   0x3   :  { %12 = vsyncpa [#allocation4], 0  ;;  %s3152_s15 = smov [#allocation5]   ;;  %s3153_s17 = smov [#allocation2]  }
   0x4   :  { %s30_s16 = sshll.u32 %s3152_s15, 4  ;;  %s18_s18 = sshll.u32 %s3153_s17, 4  ;;  %s31_s16 = int_to_ptr.vmem [resolvable:$true] %s30_s16  ;;  %s3184_s18 = int_to_ptr.vmem [resolvable:$true] %s18_s18 }
   0x5   :  { %s3034_s21 = scalar_lea.hbm %s5339_s1, 1024 }
   0x6   :  { %p3035_p0 = scmp.ne.s32.totalorder %s5339_s1, %s3034_s21  ;;  %p3038_p1 = scmp.lt.u32.totalorder %s3034_s21, %s5339_s1 }
   0x8   :  { %p3040_p2 = pnand %p3038_p1, %p3035_p0 }
   0xa   :  { %3043 = shalt.err (!%p3040_p2)
}
   0xb   :  { %s3044_s26 = scalar_lea.vmem %s31_s16, 1024  ;;  %p3049_p4 = scmp.lt.s32.totalorder %s31_s16, %s31_s16 }
   0xc   :  { %p3045_p3 = scmp.ne.s32.totalorder %s31_s16, %s3044_s26  ;;  %p3050_p5 = scmp.lt.s32.totalorder %s3044_s26, %s3044_s26 }
   0xe   :  { %p3051_p6 = por %p3050_p5, %p3049_p4 }
  0x10   :  { %p3052_p7 = pnand %p3051_p6, %p3045_p3 }
  0x12   :  { %3055 = shalt.err (!%p3052_p7)
}
  0x13   :  { %s3154_s27 = smov 64   ;;  %s3155_s28 = smov 4  }
  0x14   :  { %36 = dma.hbm_to_vmem [thread:$0]  %s5339_s1, 1024, %s31_s16, [#allocation6], %s3154_s27, %s3154_s27, %s3155_s28  }
  0x15   :  { %s3056_s7 = scalar_lea.hbm %s5338_s0, 6400 }
  0x16   :  { %p3057_p8 = scmp.ne.s32.totalorder %s5338_s0, %s3056_s7  ;;  %p3060_p9 = scmp.lt.u32.totalorder %s3056_s7, %s5338_s0 }
  0x18   :  { %p3062_p10 = pnand %p3060_p9, %p3057_p8 }
  0x1a   :  { %3065 = shalt.err (!%p3062_p10)
}
  0x1b   :  { %s3066_s12 = scalar_lea.vmem %s3184_s18, 6400  ;;  %p3071_p12 = scmp.lt.s32.totalorder %s3184_s18, %s3184_s18 }
  0x1c   :  { %p3067_p11 = scmp.ne.s32.totalorder %s3184_s18, %s3066_s12  ;;  %p3072_p13 = scmp.lt.s32.totalorder %s3066_s12, %s3066_s12 }
  0x1e   :  { %p3073_p0 = por %p3072_p13, %p3071_p12 }
  0x20   :  { %p3074_p1 = pnand %p3073_p0, %p3067_p11 }
  0x22   :  { %3077 = shalt.err (!%p3074_p1)
}
  0x23   :  { %24 = dma.hbm_to_vmem [thread:$0]  %s5338_s0, 6400, %s3184_s18, [#allocation3], %s3154_s27, %s3154_s27, %s3155_s28  }
  0x24   :  { %s3156_s14 = smov [#allocation7]   ;;  %s3157_s16 = smov [#allocation8]  }
  0x25   :  { %s43_s15 = sshll.u32 %s3156_s14, 4  ;;  %s53_s17 = sshll.u32 %s3157_s16, 4  ;;  %s44_s15 = int_to_ptr.vmem [resolvable:$true] %s43_s15  ;;  %s54_s17 = int_to_ptr.vmem [resolvable:$true] %s53_s17 }
  0x26   :  { %s3078_s21 = scalar_lea.hbm %s5340_s2, 16 }
  0x27   :  { %p3079_p2 = scmp.ne.s32.totalorder %s5340_s2, %s3078_s21  ;;  %p3082_p3 = scmp.lt.u32.totalorder %s3078_s21, %s5340_s2 }
  0x29   :  { %p3084_p4 = pnand %p3082_p3, %p3079_p2 }
  0x2b   :  { %3087 = shalt.err (!%p3084_p4)
}
  0x2c   :  { %s3088_s0 = scalar_lea.vmem %s44_s15, 16  ;;  %s3092_s18 = scalar_lea.vmem %s44_s15, 32 }
  0x2d   :  { %p3089_p5 = scmp.ne.s32.totalorder %s44_s15, %s3088_s0  ;;  %p3093_p6 = scmp.lt.s32.totalorder %s44_s15, %s44_s15 }
  0x2e   :  { %p3094_p7 = scmp.lt.s32.totalorder %s3092_s18, %s3088_s0 }
  0x30   :  { %p3095_p8 = por %p3094_p7, %p3093_p6 }
  0x32   :  { %p3096_p9 = pnand %p3095_p8, %p3089_p5 }
  0x34   :  { %3099 = shalt.err (!%p3096_p9)
}
  0x35   :  { %46 = dma.hbm_to_vmem [thread:$0]  %s5340_s2, 16, %s44_s15, [#allocation6]  }
  0x36   :  { %s3100_s6 = scalar_lea.hbm %s5341_s3, 16 }
  0x37   :  { %p3101_p10 = scmp.ne.s32.totalorder %s5341_s3, %s3100_s6  ;;  %p3104_p11 = scmp.lt.u32.totalorder %s3100_s6, %s5341_s3 }
  0x39   :  { %p3106_p12 = pnand %p3104_p11, %p3101_p10 }
  0x3b   :  { %3109 = shalt.err (!%p3106_p12)
}
  0x3c   :  { %s3110_s11 = scalar_lea.vmem %s54_s17, 16  ;;  %s3114_s12 = scalar_lea.vmem %s54_s17, 32 }
  0x3d   :  { %p3111_p13 = scmp.ne.s32.totalorder %s54_s17, %s3110_s11  ;;  %p3115_p0 = scmp.lt.s32.totalorder %s54_s17, %s54_s17 }
  0x3e   :  { %p3116_p1 = scmp.lt.s32.totalorder %s3114_s12, %s3110_s11 }
  0x40   :  { %p3117_p2 = por %p3116_p1, %p3115_p0 }
  0x42   :  { %p3118_p3 = pnand %p3117_p2, %p3111_p13 }
  0x44   :  { %3121 = shalt.err (!%p3118_p3)
}
  0x45   :  { %56 = dma.hbm_to_vmem [thread:$0]  %s5341_s3, 16, %s54_s17, [#allocation9]  }
  0x46   :  { %3144 = dma.done.wait [#allocation3], 6400  }
  0x47   :  { %3145 = vsyncadd [#allocation3], 4294960896 }
  0x48   :  { %3146 = dma.done.wait [#allocation6], 1040  }
  0x49   :  { %3147 = vsyncadd [#allocation6], 4294966256 }
  0x4a   :  { %3148 = dma.done.wait [#allocation9], 16  }
  0x4b   :  { %3149 = vsyncadd [#allocation9], 4294967280  ;;  %v2974_v0 = vld [vmem:[#allocation5] sm:$0xff]   ;;  %v2975_v1 = vld [vmem:[#allocation5 + $0x8] sm:$0xff]   ;;  %s3158_s3 = smov [#allocation10]  }
  0x4c   :  { %2835 = vmatprep.subr.bf16.mxu0 %v2974_v0  ;;  %2951 = vmatprep.subr.bf16.mxu1 %v2974_v0  ;;  %v2976_v2 = vld [vmem:[#allocation5 + $0x10] sm:$0xff]   ;;  %v2977_v3 = vld [vmem:[#allocation5 + $0x18] sm:$0xff]   ;;  %v2978_v5 = vld [vmem:[#allocation5 + $0x20] sm:$0xff]   ;;  %s2206_s13 = sshll.u32 %s3158_s3, 4  ;;  %s2207_s13 = int_to_ptr.vmem [resolvable:$true] %s2206_s13 }
  0x4d   :  { %2836 = vmatpush3.bf16.msra.mxu0 %v2974_v0  ;;  %2959 = vmatpush3.bf16.msra.mxu1 %v2974_v0  ;;  %v2982_v4 = vld [vmem:[#allocation2] sm:$0xff]   ;;  %v2979_v6 = vld [vmem:[#allocation5 + $0x28] sm:$0xff]   ;;  %v2981_v8 = vld [vmem:[#allocation5 + $0x38] sm:$0xff]   ;;  %s3122_s14 = scalar_lea.vmem %s2207_s13, 6400  ;;  %p3127_p5 = scmp.lt.s32.totalorder %s2207_s13, %s2207_s13 }
  0x4e   :  { %2837 = vmatprep.subr.bf16.mxu0 %v2975_v1  ;;  %2952 = vmatprep.subr.bf16.mxu1 %v2975_v1  ;;  %v2980_v7 = vld [vmem:[#allocation5 + $0x30] sm:$0xff]   ;;  %v2983_v9 = vld [vmem:[#allocation2 + $0x8] sm:$0xff]   ;;  %v2984_v10 = vld [vmem:[#allocation2 + $0x10] sm:$0xff]   ;;  %p3123_p4 = scmp.ne.s32.totalorder %s2207_s13, %s3122_s14  ;;  %p3128_p6 = scmp.lt.s32.totalorder %s3122_s14, %s3122_s14 }
  0x4f   :  { %2851 = vmatprep.mubr.bf16.mxu0 %v2982_v4  ;;  %v3008_v11 = vld [vmem:[#allocation2 + $0xd0] sm:$0xff]   ;;  %v3009_v12 = vld [vmem:[#allocation2 + $0xd8] sm:$0xff]   ;;  %v3010_v13 = vld [vmem:[#allocation2 + $0xe0] sm:$0xff]  }
  0x50   :  { %2903 = vmatprep.mubr.bf16.mxu1 %v3008_v11  ;;  %v2985_v14 = vld [vmem:[#allocation2 + $0x18] sm:$0xff]   ;;  %v2986_v15 = vld [vmem:[#allocation2 + $0x20] sm:$0xff]   ;;  %v3011_v16 = vld [vmem:[#allocation2 + $0xe8] sm:$0xff]   ;;  %p3129_p7 = por %p3128_p6, %p3127_p5 }
  0x51   :  { %2838 = vmatpush3.bf16.msra.mxu0 %v2975_v1  ;;  %2960 = vmatpush3.bf16.msra.mxu1 %v2975_v1  ;;  %v3012_v17 = vld [vmem:[#allocation2 + $0xf0] sm:$0xff]   ;;  %v2987_v18 = vld [vmem:[#allocation2 + $0x28] sm:$0xff]   ;;  %v3013_v20 = vld [vmem:[#allocation2 + $0xf8] sm:$0xff]  }
  0x52   :  { %2839 = vmatprep.subr.bf16.mxu0 %v2976_v2  ;;  %2953 = vmatprep.subr.bf16.mxu1 %v2976_v2  ;;  %v2988_v19 = vld [vmem:[#allocation2 + $0x30] sm:$0xff]   ;;  %v3014_v21 = vld [vmem:[#allocation2 + $0x100] sm:$0xff]   ;;  %v2989_v22 = vld [vmem:[#allocation2 + $0x38] sm:$0xff]   ;;  %p3130_p8 = pnand %p3129_p7, %p3123_p4 }
  0x53   :  { %v2990_v23 = vld [vmem:[#allocation2 + $0x40] sm:$0xff]   ;;  %v3015_v24 = vld [vmem:[#allocation2 + $0x108] sm:$0xff]   ;;  %v3016_v25 = vld [vmem:[#allocation2 + $0x110] sm:$0xff]  }
  0x54   :  { %v2991_v26 = vld [vmem:[#allocation2 + $0x48] sm:$0xff]   ;;  %v2992_v27 = vld [vmem:[#allocation2 + $0x50] sm:$0xff]   ;;  %v3017_v28 = vld [vmem:[#allocation2 + $0x118] sm:$0xff]  }
  0x55   :  { %2840 = vmatpush3.bf16.msra.mxu0 %v2976_v2  ;;  %2961 = vmatpush3.bf16.msra.mxu1 %v2976_v2  ;;  %v3018_v29 = vld [vmem:[#allocation2 + $0x120] sm:$0xff]   ;;  %v2993_v30 = vld [vmem:[#allocation2 + $0x58] sm:$0xff]   ;;  %v3019_v32 = vld [vmem:[#allocation2 + $0x128] sm:$0xff]  }
  0x56   :  { %2841 = vmatprep.subr.bf16.mxu0 %v2977_v3  ;;  %2954 = vmatprep.subr.bf16.mxu1 %v2977_v3  ;;  %v2994_v31 = vld [vmem:[#allocation2 + $0x60] sm:$0xff]   ;;  %v3020_v33 = vld [vmem:[#allocation2 + $0x130] sm:$0xff]   ;;  %v2995_v34 = vld [vmem:[#allocation2 + $0x68] sm:$0xff]  }
  0x57   :  { %v2996_v35 = vld [vmem:[#allocation2 + $0x70] sm:$0xff]   ;;  %v3021_v36 = vld [vmem:[#allocation2 + $0x138] sm:$0xff]   ;;  %v3022_v37 = vld [vmem:[#allocation2 + $0x140] sm:$0xff]  }
  0x58   :  { %v2997_v38 = vld [vmem:[#allocation2 + $0x78] sm:$0xff]   ;;  %v2998_v39 = vld [vmem:[#allocation2 + $0x80] sm:$0xff]   ;;  %v3023_v40 = vld [vmem:[#allocation2 + $0x148] sm:$0xff]  }
  0x59   :  { %2842 = vmatpush3.bf16.msra.mxu0 %v2977_v3  ;;  %2962 = vmatpush3.bf16.msra.mxu1 %v2977_v3  ;;  %v3024_v41 = vld [vmem:[#allocation2 + $0x150] sm:$0xff]   ;;  %v2999_v42 = vld [vmem:[#allocation2 + $0x88] sm:$0xff]   ;;  %v3025_v44 = vld [vmem:[#allocation2 + $0x158] sm:$0xff]  }
  0x5a   :  { %2843 = vmatprep.subr.bf16.mxu0 %v2978_v5  ;;  %2955 = vmatprep.subr.bf16.mxu1 %v2978_v5  ;;  %v3000_v43 = vld [vmem:[#allocation2 + $0x90] sm:$0xff]   ;;  %v3026_v45 = vld [vmem:[#allocation2 + $0x160] sm:$0xff]   ;;  %v3001_v46 = vld [vmem:[#allocation2 + $0x98] sm:$0xff]  }
  0x5b   :  { %v3002_v47 = vld [vmem:[#allocation2 + $0xa0] sm:$0xff]   ;;  %v3027_v48 = vld [vmem:[#allocation2 + $0x168] sm:$0xff]   ;;  %v3028_v49 = vld [vmem:[#allocation2 + $0x170] sm:$0xff]  }
  0x5c   :  { %v3003_v50 = vld [vmem:[#allocation2 + $0xa8] sm:$0xff]   ;;  %v3004_v51 = vld [vmem:[#allocation2 + $0xb0] sm:$0xff]   ;;  %v3029_v52 = vld [vmem:[#allocation2 + $0x178] sm:$0xff]  }
  0x5d   :  { %2844 = vmatpush3.bf16.msra.mxu0 %v2978_v5  ;;  %2963 = vmatpush3.bf16.msra.mxu1 %v2978_v5  ;;  %v3030_v53 = vld [vmem:[#allocation2 + $0x180] sm:$0xff]   ;;  %v3005_v54 = vld [vmem:[#allocation2 + $0xb8] sm:$0xff]   ;;  %v3031_v56 = vld [vmem:[#allocation2 + $0x188] sm:$0xff]  }
  0x5e   :  { %2845 = vmatprep.subr.bf16.mxu0 %v2979_v6  ;;  %2956 = vmatprep.subr.bf16.mxu1 %v2979_v6  ;;  %v3006_v55 = vld [vmem:[#allocation2 + $0xc0] sm:$0xff]   ;;  %v3007_v57 = vld [vmem:[#allocation2 + $0xc8] sm:$0xff]  }
  0x61   :  { %2846 = vmatpush3.bf16.msra.mxu0 %v2979_v6  ;;  %2964 = vmatpush3.bf16.msra.mxu1 %v2979_v6 }
  0x62   :  { %2847 = vmatprep.subr.bf16.mxu0 %v2980_v7  ;;  %2957 = vmatprep.subr.bf16.mxu1 %v2980_v7 }
  0x65   :  { %2848 = vmatpush3.bf16.msra.mxu0 %v2980_v7  ;;  %2965 = vmatpush3.bf16.msra.mxu1 %v2980_v7 }
  0x66   :  { %2849 = vmatprep.subr.bf16.mxu0 %v2981_v8  ;;  %2958 = vmatprep.subr.bf16.mxu1 %v2981_v8 }
  0x69   :  { %2850 = vmatpush3.bf16.msra.mxu0 %v2981_v8  ;;  %2966 = vmatpush3.bf16.msra.mxu1 %v2981_v8 }
  0x6c   :  { %2852 = vmatmul.mubr.bf16.vlgmr.msra.gmra.mrb[0].mxu0 %v2983_v9  ;;  %2904 = vmatmul.mubr.bf16.vlgmr.msra.gmra.mrb[0].mxu1 %v3009_v12 }
  0x6d   :  { %2855 = vmatprep.mubr.bf16.mxu0 %v2984_v10  ;;  %2907 = vmatprep.mubr.bf16.mxu1 %v3010_v13 }
  0x74   :  { %2856 = vmatmul.mubr.bf16.gmra.mrb[4].mxu0 %v2985_v14  ;;  %2908 = vmatmul.mubr.bf16.gmra.mrb[4].mxu1 %v3011_v16 }
  0x75   :  { %2859 = vmatprep.mubr.bf16.mxu0 %v2986_v15  ;;  %2911 = vmatprep.mubr.bf16.mxu1 %v3012_v17 }
  0x7c   :  { %2860 = vmatmul.mubr.bf16.gmra.mrb[8].mxu0 %v2987_v18  ;;  %2912 = vmatmul.mubr.bf16.gmra.mrb[8].mxu1 %v3013_v20 }
  0x7d   :  { %2863 = vmatprep.mubr.bf16.mxu0 %v2988_v19  ;;  %2915 = vmatprep.mubr.bf16.mxu1 %v3014_v21 }
  0x84   :  { %2864 = vmatmul.mubr.bf16.gmra.mrb[12].mxu0 %v2989_v22  ;;  %2916 = vmatmul.mubr.bf16.gmra.mrb[12].mxu1 %v3015_v24 }
  0x85   :  { %2867 = vmatprep.mubr.bf16.mxu0 %v2990_v23  ;;  %2919 = vmatprep.mubr.bf16.mxu1 %v3016_v25 }
  0x8c   :  { %2868 = vmatmul.mubr.bf16.gmra.mrb[16].mxu0 %v2991_v26  ;;  %2920 = vmatmul.mubr.bf16.gmra.mrb[16].mxu1 %v3017_v28 }
  0x8d   :  { %2871 = vmatprep.mubr.bf16.mxu0 %v2992_v27  ;;  %2923 = vmatprep.mubr.bf16.mxu1 %v3018_v29 }
  0x94   :  { %2872 = vmatmul.mubr.bf16.gmra.mrb[20].mxu0 %v2993_v30  ;;  %2924 = vmatmul.mubr.bf16.gmra.mrb[20].mxu1 %v3019_v32 }
  0x95   :  { %2875 = vmatprep.mubr.bf16.mxu0 %v2994_v31  ;;  %2927 = vmatprep.mubr.bf16.mxu1 %v3020_v33 }
  0x9c   :  { %2876 = vmatmul.mubr.bf16.gmra.mrb[24].mxu0 %v2995_v34  ;;  %2928 = vmatmul.mubr.bf16.gmra.mrb[24].mxu1 %v3021_v36 }
  0x9d   :  { %2879 = vmatprep.mubr.bf16.mxu0 %v2996_v35  ;;  %2931 = vmatprep.mubr.bf16.mxu1 %v3022_v37 }
  0xa4   :  { %2880 = vmatmul.mubr.bf16.gmra.mrb[28].mxu0 %v2997_v38  ;;  %2932 = vmatmul.mubr.bf16.gmra.mrb[28].mxu1 %v3023_v40 }
  0xa5   :  { %2883 = vmatprep.mubr.bf16.mxu0 %v2998_v39  ;;  %2935 = vmatprep.mubr.bf16.mxu1 %v3024_v41 }
  0xac   :  { %2884 = vmatmul.mubr.bf16.gmra.mrb[32].mxu0 %v2999_v42  ;;  %2936 = vmatmul.mubr.bf16.gmra.mrb[32].mxu1 %v3025_v44 }
  0xad   :  { %2887 = vmatprep.mubr.bf16.mxu0 %v3000_v43  ;;  %2939 = vmatprep.mubr.bf16.mxu1 %v3026_v45 }
  0xb4   :  { %2888 = vmatmul.mubr.bf16.gmra.mrb[36].mxu0 %v3001_v46  ;;  %2940 = vmatmul.mubr.bf16.gmra.mrb[36].mxu1 %v3027_v48 }
  0xb5   :  { %2891 = vmatprep.mubr.bf16.mxu0 %v3002_v47  ;;  %2943 = vmatprep.mubr.bf16.mxu1 %v3028_v49 }
  0xbc   :  { %2892 = vmatmul.mubr.bf16.gmra.mrb[40].mxu0 %v3003_v50  ;;  %2944 = vmatmul.mubr.bf16.gmra.mrb[40].mxu1 %v3029_v52 }
  0xbd   :  { %2895 = vmatprep.mubr.bf16.mxu0 %v3004_v51  ;;  %2947 = vmatprep.mubr.bf16.mxu1 %v3030_v53 }
  0xc4   :  { %2896 = vmatmul.mubr.bf16.gmra.mrb[44].mxu0 %v3005_v54  ;;  %2948 = vmatmul.mubr.bf16.gmra.mrb[44].mxu1 %v3031_v56 }
  0xc5   :  { %2899 = vmatprep.mubr.bf16.mxu0 %v3006_v55 }
  0xcc   :  { %2900 = vmatmul.mubr.bf16.gmra.mrb[48].mxu0 %v3007_v57 }
 0x13f   :  { %v3245_v58 = vpop.f32.mrb[0].mxu0  ;;  %v3253_v62 = vpop.f32.mrb[0].mxu1 }
 0x140   :  { %5616 = vst [vmem:[#allocation15_spill] sm:$0xff] %v3245_v58  ;;  %v3247_v59 = vpop.f32.mrb[1].mxu0  ;;  %v3261_v2 = vpop.f32.mrb[1].mxu1  ;;  %v1075_v4 = vmul.f32 %v3245_v58, %v3245_v58 }
 0x141   :  { %5617 = vst [vmem:[#allocation16_spill] sm:$0xff] %v3247_v59  ;;  %v3249_v60 = vpop.f32.mrb[2].mxu0  ;;  %v1073_v63 = vmul.f32 %v3247_v59, %v3247_v59  ;;  %v3263_v3 = vpop.f32.mrb[2].mxu1 }
 0x142   :  { %5618 = vst [vmem:[#allocation17_spill] sm:$0xff] %v3249_v60  ;;  %v3251_v61 = vpop.f32.mrb[3].mxu0  ;;  %v3268_v7 = vpop.f32.mrb[3].mxu1  ;;  %v1076_v8 = vmul.f32 %v3249_v60, %v3249_v60 }
 0x143   :  { %5619 = vst [vmem:[#allocation18_spill] sm:$0xff] %v3251_v61  ;;  %v967_v0 = vadd.f32 %v3251_v61, %v3247_v59  ;;  %v1074_v1 = vmul.f32 %v3251_v61, %v3251_v61 }
 0x145   :  { %v968_v5 = vadd.f32 %v3245_v58, %v967_v0  ;;  %v1173_v6 = vadd.f32 %v1074_v1, %v1073_v63 }
 0x147   :  { %v1174_v9 = vadd.f32 %v1173_v6, %v1075_v4  ;;  %v3272_v10 = vpop.f32.mrb[4].mxu0  ;;  %v969_v11 = vadd.f32 %v3249_v60, %v968_v5  ;;  %v3284_v18 = vpop.f32.mrb[4].mxu1 }
 0x148   :  { %5620 = vst [vmem:[#allocation19_spill] sm:$0xff] %v3272_v10  ;;  %v3275_v12 = vpop.f32.mrb[5].mxu0  ;;  %v3289_v22 = vpop.f32.mrb[5].mxu1  ;;  %v1079_v24 = vmul.f32 %v3272_v10, %v3272_v10 }
 0x149   :  { %5621 = vst [vmem:[#allocation20_spill] sm:$0xff] %v3275_v12  ;;  %v970_v13 = vadd.f32 %v969_v11, %v3275_v12  ;;  %v1077_v14 = vmul.f32 %v3275_v12, %v3275_v12  ;;  %v1175_v15 = vadd.f32 %v1174_v9, %v1076_v8  ;;  %v3280_v16 = vpop.f32.mrb[6].mxu0  ;;  %v3291_v23 = vpop.f32.mrb[6].mxu1 }
 0x14a   :  { %5622 = vst [vmem:[#allocation21_spill] sm:$0xff] %v3280_v16  ;;  %v3282_v17 = vpop.f32.mrb[7].mxu0  ;;  %v3296_v27 = vpop.f32.mrb[7].mxu1  ;;  %v1080_v28 = vmul.f32 %v3280_v16, %v3280_v16 }
 0x14b   :  { %5623 = vst [vmem:[#allocation22_spill] sm:$0xff] %v3282_v17  ;;  %v1176_v19 = vadd.f32 %v1175_v15, %v1077_v14  ;;  %v971_v20 = vadd.f32 %v970_v13, %v3282_v17  ;;  %v1078_v21 = vmul.f32 %v3282_v17, %v3282_v17 }
 0x14d   :  { %v972_v25 = vadd.f32 %v3272_v10, %v971_v20  ;;  %v1177_v26 = vadd.f32 %v1176_v19, %v1078_v21 }
 0x14f   :  { %v1178_v29 = vadd.f32 %v1177_v26, %v1079_v24  ;;  %v3300_v30 = vpop.f32.mrb[8].mxu0  ;;  %v973_v31 = vadd.f32 %v3280_v16, %v972_v25  ;;  %v3312_v38 = vpop.f32.mrb[8].mxu1 }
 0x150   :  { %5624 = vst [vmem:[#allocation23_spill] sm:$0xff] %v3300_v30  ;;  %v3303_v32 = vpop.f32.mrb[9].mxu0  ;;  %v3317_v42 = vpop.f32.mrb[9].mxu1  ;;  %v1083_v44 = vmul.f32 %v3300_v30, %v3300_v30 }
 0x151   :  { %5625 = vst [vmem:[#allocation24_spill] sm:$0xff] %v3303_v32  ;;  %v974_v33 = vadd.f32 %v973_v31, %v3303_v32  ;;  %v1081_v34 = vmul.f32 %v3303_v32, %v3303_v32  ;;  %v1179_v35 = vadd.f32 %v1178_v29, %v1080_v28  ;;  %v3308_v36 = vpop.f32.mrb[10].mxu0  ;;  %v3319_v43 = vpop.f32.mrb[10].mxu1 }
 0x152   :  { %5626 = vst [vmem:[#allocation25_spill] sm:$0xff] %v3308_v36  ;;  %v3310_v37 = vpop.f32.mrb[11].mxu0  ;;  %v3324_v47 = vpop.f32.mrb[11].mxu1  ;;  %v1084_v48 = vmul.f32 %v3308_v36, %v3308_v36 }
 0x153   :  { %5627 = vst [vmem:[#allocation26_spill] sm:$0xff] %v3310_v37  ;;  %v1180_v39 = vadd.f32 %v1179_v35, %v1081_v34  ;;  %v975_v40 = vadd.f32 %v974_v33, %v3310_v37  ;;  %v1082_v41 = vmul.f32 %v3310_v37, %v3310_v37 }
 0x155   :  { %v976_v45 = vadd.f32 %v3300_v30, %v975_v40  ;;  %v1181_v46 = vadd.f32 %v1180_v39, %v1082_v41 }
 0x157   :  { %v1182_v49 = vadd.f32 %v1181_v46, %v1083_v44  ;;  %v3328_v50 = vpop.f32.mrb[12].mxu0  ;;  %v977_v51 = vadd.f32 %v3308_v36, %v976_v45  ;;  %v3340_v63 = vpop.f32.mrb[12].mxu1 }
 0x158   :  { %5628 = vst [vmem:[#allocation27_spill] sm:$0xff] %v3328_v50  ;;  %v3331_v52 = vpop.f32.mrb[13].mxu0  ;;  %v3345_v5 = vpop.f32.mrb[13].mxu1  ;;  %v1087_v8 = vmul.f32 %v3328_v50, %v3328_v50 }
 0x159   :  { %5629 = vst [vmem:[#allocation28_spill] sm:$0xff] %v3331_v52  ;;  %v978_v53 = vadd.f32 %v977_v51, %v3331_v52  ;;  %v1085_v54 = vmul.f32 %v3331_v52, %v3331_v52  ;;  %v1183_v55 = vadd.f32 %v1182_v49, %v1084_v48  ;;  %v3336_v56 = vpop.f32.mrb[14].mxu0  ;;  %v3347_v6 = vpop.f32.mrb[14].mxu1 }
 0x15a   :  { %5630 = vst [vmem:[#allocation29_spill] sm:$0xff] %v3336_v56  ;;  %v3338_v57 = vpop.f32.mrb[15].mxu0  ;;  %v3352_v13 = vpop.f32.mrb[15].mxu1  ;;  %v1088_v14 = vmul.f32 %v3336_v56, %v3336_v56 }
 0x15b   :  { %5631 = vst [vmem:[#allocation30_spill] sm:$0xff] %v3338_v57  ;;  %v1184_v0 = vadd.f32 %v1183_v55, %v1085_v54  ;;  %v979_v1 = vadd.f32 %v978_v53, %v3338_v57  ;;  %v1086_v4 = vmul.f32 %v3338_v57, %v3338_v57 }
 0x15d   :  { %v980_v9 = vadd.f32 %v3328_v50, %v979_v1  ;;  %v1185_v11 = vadd.f32 %v1184_v0, %v1086_v4 }
 0x15f   :  { %v1186_v15 = vadd.f32 %v1185_v11, %v1087_v8  ;;  %v3356_v19 = vpop.f32.mrb[16].mxu0  ;;  %v981_v20 = vadd.f32 %v3336_v56, %v980_v9  ;;  %v3368_v31 = vpop.f32.mrb[16].mxu1 }
 0x160   :  { %5632 = vst [vmem:[#allocation31_spill] sm:$0xff] %v3356_v19  ;;  %v3359_v21 = vpop.f32.mrb[17].mxu0  ;;  %v3373_v39 = vpop.f32.mrb[17].mxu1  ;;  %v1091_v41 = vmul.f32 %v3356_v19, %v3356_v19 }
 0x161   :  { %5633 = vst [vmem:[#allocation32_spill] sm:$0xff] %v3359_v21  ;;  %v982_v24 = vadd.f32 %v981_v20, %v3359_v21  ;;  %v1089_v25 = vmul.f32 %v3359_v21, %v3359_v21  ;;  %v1187_v26 = vadd.f32 %v1186_v15, %v1088_v14  ;;  %v3364_v28 = vpop.f32.mrb[18].mxu0  ;;  %v3375_v40 = vpop.f32.mrb[18].mxu1 }
 0x162   :  { %5634 = vst [vmem:[#allocation33_spill] sm:$0xff] %v3364_v28  ;;  %v3366_v29 = vpop.f32.mrb[19].mxu0  ;;  %v3380_v46 = vpop.f32.mrb[19].mxu1  ;;  %v1092_v48 = vmul.f32 %v3364_v28, %v3364_v28 }
 0x163   :  { %5635 = vst [vmem:[#allocation34_spill] sm:$0xff] %v3366_v29  ;;  %v1188_v33 = vadd.f32 %v1187_v26, %v1089_v25  ;;  %v983_v34 = vadd.f32 %v982_v24, %v3366_v29  ;;  %v1090_v35 = vmul.f32 %v3366_v29, %v3366_v29 }
 0x165   :  { %v984_v44 = vadd.f32 %v3356_v19, %v983_v34  ;;  %v1189_v45 = vadd.f32 %v1188_v33, %v1090_v35 }
 0x167   :  { %v1190_v49 = vadd.f32 %v1189_v45, %v1091_v41  ;;  %v3384_v51 = vpop.f32.mrb[20].mxu0  ;;  %v985_v53 = vadd.f32 %v3364_v28, %v984_v44  ;;  %v3396_v9 = vpop.f32.mrb[20].mxu1 }
 0x168   :  { %5636 = vst [vmem:[#allocation35_spill] sm:$0xff] %v3384_v51  ;;  %v3387_v54 = vpop.f32.mrb[21].mxu0  ;;  %v3401_v20 = vpop.f32.mrb[21].mxu1  ;;  %v1095_v25 = vmul.f32 %v3384_v51, %v3384_v51 }
 0x169   :  { %5637 = vst [vmem:[#allocation36_spill] sm:$0xff] %v3387_v54  ;;  %v986_v55 = vadd.f32 %v985_v53, %v3387_v54  ;;  %v1093_v0 = vmul.f32 %v3387_v54, %v3387_v54  ;;  %v1191_v1 = vadd.f32 %v1190_v49, %v1092_v48  ;;  %v3392_v4 = vpop.f32.mrb[22].mxu0  ;;  %v3403_v24 = vpop.f32.mrb[22].mxu1 }
 0x16a   :  { %5638 = vst [vmem:[#allocation37_spill] sm:$0xff] %v3392_v4  ;;  %v3394_v8 = vpop.f32.mrb[23].mxu0  ;;  %v3408_v34 = vpop.f32.mrb[23].mxu1  ;;  %v1096_v35 = vmul.f32 %v3392_v4, %v3392_v4 }
 0x16b   :  { %5639 = vst [vmem:[#allocation38_spill] sm:$0xff] %v3394_v8  ;;  %v1192_v11 = vadd.f32 %v1191_v1, %v1093_v0  ;;  %v987_v14 = vadd.f32 %v986_v55, %v3394_v8  ;;  %v1094_v15 = vmul.f32 %v3394_v8, %v3394_v8 }
 0x16d   :  { %v988_v26 = vadd.f32 %v3384_v51, %v987_v14  ;;  %v1193_v33 = vadd.f32 %v1192_v11, %v1094_v15 }
 0x16f   :  { %v1194_v41 = vadd.f32 %v1193_v33, %v1095_v25  ;;  %v3412_v44 = vpop.f32.mrb[24].mxu0  ;;  %v989_v45 = vadd.f32 %v3392_v4, %v988_v26  ;;  %v3424_v11 = vpop.f32.mrb[24].mxu1 }
 0x170   :  { %5640 = vst [vmem:[#allocation39_spill] sm:$0xff] %v3412_v44  ;;  %v3415_v48 = vpop.f32.mrb[25].mxu0  ;;  %v3429_v26 = vpop.f32.mrb[25].mxu1 }
 0x171   :  { %5641 = vst [vmem:[#allocation40_spill] sm:$0xff] %v3415_v48  ;;  %v990_v49 = vadd.f32 %v989_v45, %v3415_v48  ;;  %v1097_v53 = vmul.f32 %v3415_v48, %v3415_v48  ;;  %v1195_v55 = vadd.f32 %v1194_v41, %v1096_v35  ;;  %v3420_v0 = vpop.f32.mrb[26].mxu0  ;;  %v3431_v33 = vpop.f32.mrb[26].mxu1  ;;  %v1099_v45 = vmul.f32 %v3412_v44, %v3412_v44 }
 0x172   :  { %5642 = vst [vmem:[#allocation41_spill] sm:$0xff] %v3420_v0  ;;  %v3422_v1 = vpop.f32.mrb[27].mxu0  ;;  %v3436_v48 = vpop.f32.mrb[27].mxu1 }
 0x173   :  { %5643 = vst [vmem:[#allocation42_spill] sm:$0xff] %v3422_v1  ;;  %v1196_v14 = vadd.f32 %v1195_v55, %v1097_v53  ;;  %v991_v15 = vadd.f32 %v990_v49, %v3422_v1  ;;  %v1098_v25 = vmul.f32 %v3422_v1, %v3422_v1  ;;  %v1100_v53 = vmul.f32 %v3420_v0, %v3420_v0 }
 0x175   :  { %v992_v35 = vadd.f32 %v3412_v44, %v991_v15  ;;  %v1197_v41 = vadd.f32 %v1196_v14, %v1098_v25 }
 0x177   :  { %v1198_v55 = vadd.f32 %v1197_v41, %v1099_v45  ;;  %v3440_v49 = vpop.f32.mrb[28].mxu0  ;;  %v993_v1 = vadd.f32 %v3420_v0, %v992_v35  ;;  %v3452_v25 = vpop.f32.mrb[28].mxu1 }
 0x178   :  { %5644 = vst [vmem:[#allocation43_spill] sm:$0xff] %v3440_v49  ;;  %v3443_v4 = vpop.f32.mrb[29].mxu0  ;;  %v3457_v41 = vpop.f32.mrb[29].mxu1 }
 0x179   :  { %5645 = vst [vmem:[#allocation44_spill] sm:$0xff] %v3443_v4  ;;  %v994_v51 = vadd.f32 %v993_v1, %v3443_v4  ;;  %v1101_v8 = vmul.f32 %v3443_v4, %v3443_v4  ;;  %v1199_v54 = vadd.f32 %v1198_v55, %v1100_v53  ;;  %v3448_v15 = vpop.f32.mrb[30].mxu0  ;;  %v3459_v0 = vpop.f32.mrb[30].mxu1  ;;  %v1103_v1 = vmul.f32 %v3440_v49, %v3440_v49 }
 0x17a   :  { %5646 = vst [vmem:[#allocation45_spill] sm:$0xff] %v3448_v15  ;;  %v3450_v14 = vpop.f32.mrb[31].mxu0  ;;  %v3464_v4 = vpop.f32.mrb[31].mxu1 }
 0x17b   :  { %5647 = vst [vmem:[#allocation46_spill] sm:$0xff] %v3450_v14  ;;  %v1200_v44 = vadd.f32 %v1199_v54, %v1101_v8  ;;  %v995_v45 = vadd.f32 %v994_v51, %v3450_v14  ;;  %v1102_v35 = vmul.f32 %v3450_v14, %v3450_v14  ;;  %v1104_v54 = vmul.f32 %v3448_v15, %v3448_v15 }
 0x17d   :  { %v996_v53 = vadd.f32 %v3440_v49, %v995_v45  ;;  %v1201_v55 = vadd.f32 %v1200_v44, %v1102_v35 }
 0x17f   :  { %v1202_v8 = vadd.f32 %v1201_v55, %v1103_v1  ;;  %v3468_v51 = vpop.f32.mrb[32].mxu0  ;;  %v997_v14 = vadd.f32 %v3448_v15, %v996_v53  ;;  %v3480_v35 = vpop.f32.mrb[32].mxu1 }
 0x180   :  { %5648 = vst [vmem:[#allocation47_spill] sm:$0xff] %v3468_v51  ;;  %v3471_v28 = vpop.f32.mrb[33].mxu0  ;;  %v3485_v55 = vpop.f32.mrb[33].mxu1 }
 0x181   :  { %5649 = vst [vmem:[#allocation48_spill] sm:$0xff] %v3471_v28  ;;  %v998_v19 = vadd.f32 %v997_v14, %v3471_v28  ;;  %v1105_v29 = vmul.f32 %v3471_v28, %v3471_v28  ;;  %v1203_v21 = vadd.f32 %v1202_v8, %v1104_v54  ;;  %v3476_v45 = vpop.f32.mrb[34].mxu0  ;;  %v3487_v15 = vpop.f32.mrb[34].mxu1  ;;  %v1107_v14 = vmul.f32 %v3468_v51, %v3468_v51 }
 0x182   :  { %5650 = vst [vmem:[#allocation49_spill] sm:$0xff] %v3476_v45  ;;  %v3478_v44 = vpop.f32.mrb[35].mxu0  ;;  %5652 = vst [vmem:[#allocation51_spill] sm:$0xff] %v3487_v15  ;;  %v3492_v28 = vpop.f32.mrb[35].mxu1 }
 0x183   :  { %5651 = vst [vmem:[#allocation50_spill] sm:$0xff] %v3478_v44  ;;  %v1204_v49 = vadd.f32 %v1203_v21, %v1105_v29  ;;  %v999_v1 = vadd.f32 %v998_v19, %v3478_v44  ;;  %v1106_v53 = vmul.f32 %v3478_v44, %v3478_v44  ;;  %v1108_v21 = vmul.f32 %v3476_v45, %v3476_v45 }
 0x185   :  { %v1000_v54 = vadd.f32 %v3468_v51, %v999_v1  ;;  %v1205_v8 = vadd.f32 %v1204_v49, %v1106_v53 }
 0x187   :  { %v1206_v29 = vadd.f32 %v1205_v8, %v1107_v14  ;;  %v3496_v19 = vpop.f32.mrb[36].mxu0  ;;  %v1001_v44 = vadd.f32 %v3476_v45, %v1000_v54  ;;  %v3508_v53 = vpop.f32.mrb[36].mxu1 }
 0x188   :  { %5653 = vst [vmem:[#allocation52_spill] sm:$0xff] %v3496_v19  ;;  %v3499_v56 = vpop.f32.mrb[37].mxu0  ;;  %5657 = vst [vmem:[#allocation56_spill] sm:$0xff] %v3508_v53  ;;  %v3513_v8 = vpop.f32.mrb[37].mxu1 }
 0x189   :  { %5654 = vst [vmem:[#allocation53_spill] sm:$0xff] %v3499_v56  ;;  %v1002_v50 = vadd.f32 %v1001_v44, %v3499_v56  ;;  %v1109_v57 = vmul.f32 %v3499_v56, %v3499_v56  ;;  %v1207_v52 = vadd.f32 %v1206_v29, %v1108_v21  ;;  %v3504_v1 = vpop.f32.mrb[38].mxu0  ;;  %5658 = vst [vmem:[#allocation57_spill] sm:$0xff] %v3513_v8  ;;  %v3515_v45 = vpop.f32.mrb[38].mxu1 }
 0x18a   :  { %5655 = vst [vmem:[#allocation54_spill] sm:$0xff] %v3504_v1  ;;  %v3506_v49 = vpop.f32.mrb[39].mxu0  ;;  %5659 = vst [vmem:[#allocation58_spill] sm:$0xff] %v3515_v45  ;;  %v1111_v44 = vmul.f32 %v3496_v19, %v3496_v19  ;;  %v3520_v56 = vpop.f32.mrb[39].mxu1 }
 0x18b   :  { %5656 = vst [vmem:[#allocation55_spill] sm:$0xff] %v3506_v49  ;;  %v1208_v51 = vadd.f32 %v1207_v52, %v1109_v57  ;;  %v1003_v14 = vadd.f32 %v1002_v50, %v3506_v49  ;;  %v1110_v54 = vmul.f32 %v3506_v49, %v3506_v49  ;;  %5660 = vst [vmem:[#allocation59_spill] sm:$0xff] %v3520_v56 }
 0x18c   :  { %v1112_v52 = vmul.f32 %v3504_v1, %v3504_v1 }
 0x18d   :  { %v1004_v21 = vadd.f32 %v3496_v19, %v1003_v14  ;;  %v1209_v29 = vadd.f32 %v1208_v51, %v1110_v54 }
 0x18f   :  { %v1210_v57 = vadd.f32 %v1209_v29, %v1111_v44  ;;  %v3524_v50 = vpop.f32.mrb[40].mxu0  ;;  %v1005_v49 = vadd.f32 %v3504_v1, %v1004_v21  ;;  %v3536_v54 = vpop.f32.mrb[40].mxu1 }
 0x190   :  { %5661 = vst [vmem:[#allocation60_spill] sm:$0xff] %v3524_v50  ;;  %v3527_v36 = vpop.f32.mrb[41].mxu0  ;;  %5665 = vst [vmem:[#allocation64_spill] sm:$0xff] %v3536_v54  ;;  %v3541_v29 = vpop.f32.mrb[41].mxu1 }
 0x191   :  { %5662 = vst [vmem:[#allocation61_spill] sm:$0xff] %v3527_v36  ;;  %v1006_v30 = vadd.f32 %v1005_v49, %v3527_v36  ;;  %v1113_v37 = vmul.f32 %v3527_v36, %v3527_v36  ;;  %v1211_v32 = vadd.f32 %v1210_v57, %v1112_v52  ;;  %v3532_v14 = vpop.f32.mrb[42].mxu0  ;;  %5666 = vst [vmem:[#allocation65_spill] sm:$0xff] %v3541_v29  ;;  %v3543_v1 = vpop.f32.mrb[42].mxu1 }
 0x192   :  { %5663 = vst [vmem:[#allocation62_spill] sm:$0xff] %v3532_v14  ;;  %v3534_v51 = vpop.f32.mrb[43].mxu0  ;;  %5667 = vst [vmem:[#allocation66_spill] sm:$0xff] %v3543_v1  ;;  %v1115_v49 = vmul.f32 %v3524_v50, %v3524_v50  ;;  %v3548_v36 = vpop.f32.mrb[43].mxu1 }
 0x193   :  { %5664 = vst [vmem:[#allocation63_spill] sm:$0xff] %v3534_v51  ;;  %v1212_v19 = vadd.f32 %v1211_v32, %v1113_v37  ;;  %v1007_v44 = vadd.f32 %v1006_v30, %v3534_v51  ;;  %v1114_v21 = vmul.f32 %v3534_v51, %v3534_v51  ;;  %5668 = vst [vmem:[#allocation67_spill] sm:$0xff] %v3548_v36 }
 0x194   :  { %v1116_v32 = vmul.f32 %v3532_v14, %v3532_v14 }
 0x195   :  { %v1008_v52 = vadd.f32 %v3524_v50, %v1007_v44  ;;  %v1213_v57 = vadd.f32 %v1212_v19, %v1114_v21 }
 0x197   :  { %v1214_v37 = vadd.f32 %v1213_v57, %v1115_v49  ;;  %v3552_v30 = vpop.f32.mrb[44].mxu0  ;;  %v1009_v51 = vadd.f32 %v3532_v14, %v1008_v52  ;;  %v3564_v21 = vpop.f32.mrb[44].mxu1 }
 0x198   :  { %5669 = vst [vmem:[#allocation68_spill] sm:$0xff] %v3552_v30  ;;  %v3555_v16 = vpop.f32.mrb[45].mxu0  ;;  %5673 = vst [vmem:[#allocation72_spill] sm:$0xff] %v3564_v21  ;;  %v3569_v57 = vpop.f32.mrb[45].mxu1 }
 0x199   :  { %5670 = vst [vmem:[#allocation69_spill] sm:$0xff] %v3555_v16  ;;  %v1010_v10 = vadd.f32 %v1009_v51, %v3555_v16  ;;  %v1117_v17 = vmul.f32 %v3555_v16, %v3555_v16  ;;  %v1215_v12 = vadd.f32 %v1214_v37, %v1116_v32  ;;  %v3560_v44 = vpop.f32.mrb[46].mxu0  ;;  %v3571_v14 = vpop.f32.mrb[46].mxu1  ;;  %v1119_v51 = vmul.f32 %v3552_v30, %v3552_v30 }
 0x19a   :  { %5671 = vst [vmem:[#allocation70_spill] sm:$0xff] %v3560_v44  ;;  %v3562_v19 = vpop.f32.mrb[47].mxu0  ;;  %5674 = vst [vmem:[#allocation73_spill] sm:$0xff] %v3571_v14  ;;  %v3576_v16 = vpop.f32.mrb[47].mxu1  ;;  %v1126_v14 = vmul.f32 %v3268_v7, %v3268_v7 }
 0x19b   :  { %5672 = vst [vmem:[#allocation71_spill] sm:$0xff] %v3562_v19  ;;  %v1216_v50 = vadd.f32 %v1215_v12, %v1117_v17  ;;  %v1011_v49 = vadd.f32 %v1010_v10, %v3562_v19  ;;  %v1118_v52 = vmul.f32 %v3562_v19, %v3562_v19  ;;  %v1120_v12 = vmul.f32 %v3560_v44, %v3560_v44 }
 0x19d   :  { %v1012_v32 = vadd.f32 %v3552_v30, %v1011_v49  ;;  %v1217_v37 = vadd.f32 %v1216_v50, %v1118_v52 }
 0x19f   :  { %v1218_v17 = vadd.f32 %v1217_v37, %v1119_v51  ;;  %v3580_v10 = vpop.f32.mrb[48].mxu0  ;;  %v1013_v19 = vadd.f32 %v3560_v44, %v1012_v32 }
 0x1a0   :  { %v3583_v60 = vpop.f32.mrb[49].mxu0  ;;  %v1123_v32 = vmul.f32 %v3580_v10, %v3580_v10 }
 0x1a1   :  { %5675 = vst [vmem:[#allocation74_spill] sm:$0xff] %v3583_v60  ;;  %v1014_v58 = vadd.f32 %v1013_v19, %v3583_v60  ;;  %v1121_v61 = vmul.f32 %v3583_v60, %v3583_v60  ;;  %v1219_v59 = vadd.f32 %v1218_v17, %v1120_v12  ;;  %v3588_v49 = vpop.f32.mrb[50].mxu0 }
 0x1a2   :  { %v3590_v50 = vpop.f32.mrb[51].mxu0  ;;  %v1124_v60 = vmul.f32 %v3588_v49, %v3588_v49 }
 0x1a3   :  { %5676 = vst [vmem:[#allocation75_spill] sm:$0xff] %v3590_v50  ;;  %v1220_v52 = vadd.f32 %v1219_v59, %v1121_v61  ;;  %v1015_v30 = vadd.f32 %v1014_v58, %v3590_v50  ;;  %v1122_v51 = vmul.f32 %v3590_v50, %v3590_v50  ;;  %v1125_v59 = vmul.f32 %v3261_v2, %v3261_v2 }
 0x1a5   :  { %v1016_v37 = vadd.f32 %v3580_v10, %v1015_v30  ;;  %v1221_v19 = vadd.f32 %v1220_v52, %v1122_v51  ;;  %v1127_v30 = vmul.f32 %v3253_v62, %v3253_v62 }
 0x1a7   :  { %v1222_v12 = vadd.f32 %v1221_v19, %v1123_v32  ;;  %v1017_v17 = vadd.f32 %v3588_v49, %v1016_v37  ;;  %v1128_v32 = vmul.f32 %v3263_v3, %v3263_v3 }
 0x1a9   :  { %v1018_v58 = vadd.f32 %v1017_v17, %v3261_v2  ;;  %v1223_v61 = vadd.f32 %v1222_v12, %v1124_v60  ;;  %v1129_v60 = vmul.f32 %v3289_v22, %v3289_v22 }
 0x1ab   :  { %v1224_v44 = vadd.f32 %v1223_v61, %v1125_v59  ;;  %v1019_v50 = vadd.f32 %v1018_v58, %v3268_v7  ;;  %v1130_v61 = vmul.f32 %v3296_v27, %v3296_v27 }
 0x1ad   :  { %v1020_v52 = vadd.f32 %v3253_v62, %v1019_v50  ;;  %v1225_v51 = vadd.f32 %v1224_v44, %v1126_v14  ;;  %v1131_v14 = vmul.f32 %v3284_v18, %v3284_v18 }
 0x1af   :  { %v1226_v37 = vadd.f32 %v1225_v51, %v1127_v30  ;;  %v1021_v19 = vadd.f32 %v3263_v3, %v1020_v52  ;;  %v1132_v30 = vmul.f32 %v3291_v23, %v3291_v23 }
 0x1b1   :  { %v1022_v12 = vadd.f32 %v1021_v19, %v3289_v22  ;;  %v1227_v17 = vadd.f32 %v1226_v37, %v1128_v32  ;;  %v1133_v32 = vmul.f32 %v3317_v42, %v3317_v42 }
 0x1b3   :  { %v1228_v59 = vadd.f32 %v1227_v17, %v1129_v60  ;;  %v1023_v58 = vadd.f32 %v1022_v12, %v3296_v27  ;;  %v1134_v17 = vmul.f32 %v3324_v47, %v3324_v47 }
 0x1b5   :  { %v1024_v44 = vadd.f32 %v3284_v18, %v1023_v58  ;;  %v1229_v50 = vadd.f32 %v1228_v59, %v1130_v61  ;;  %v1135_v59 = vmul.f32 %v3312_v38, %v3312_v38 }
 0x1b7   :  { %v1230_v52 = vadd.f32 %v1229_v50, %v1131_v14  ;;  %v1025_v51 = vadd.f32 %v3291_v23, %v1024_v44  ;;  %v1136_v14 = vmul.f32 %v3319_v43, %v3319_v43 }
 0x1b9   :  { %v1026_v37 = vadd.f32 %v1025_v51, %v3317_v42  ;;  %v1231_v19 = vadd.f32 %v1230_v52, %v1132_v30  ;;  %v1137_v30 = vmul.f32 %v3345_v5, %v3345_v5 }
 0x1bb   :  { %v1232_v60 = vadd.f32 %v1231_v19, %v1133_v32  ;;  %v1027_v12 = vadd.f32 %v1026_v37, %v3324_v47  ;;  %v1138_v19 = vmul.f32 %v3352_v13, %v3352_v13 }
 0x1bd   :  { %v1028_v58 = vadd.f32 %v3312_v38, %v1027_v12  ;;  %v1233_v61 = vadd.f32 %v1232_v60, %v1134_v17  ;;  %v1139_v60 = vmul.f32 %v3340_v63, %v3340_v63 }
 0x1bf   :  { %v1234_v44 = vadd.f32 %v1233_v61, %v1135_v59  ;;  %v1029_v50 = vadd.f32 %v3319_v43, %v1028_v58  ;;  %v1140_v59 = vmul.f32 %v3347_v6, %v3347_v6 }
 0x1c1   :  { %v1030_v52 = vadd.f32 %v1029_v50, %v3345_v5  ;;  %v1235_v51 = vadd.f32 %v1234_v44, %v1136_v14  ;;  %v1141_v14 = vmul.f32 %v3373_v39, %v3373_v39 }
 0x1c3   :  { %v1236_v32 = vadd.f32 %v1235_v51, %v1137_v30  ;;  %v1031_v37 = vadd.f32 %v1030_v52, %v3352_v13  ;;  %v1142_v51 = vmul.f32 %v3380_v46, %v3380_v46 }
 0x1c5   :  { %v1032_v12 = vadd.f32 %v3340_v63, %v1031_v37  ;;  %v1237_v17 = vadd.f32 %v1236_v32, %v1138_v19  ;;  %v1143_v32 = vmul.f32 %v3368_v31, %v3368_v31 }
 0x1c7   :  { %v1238_v58 = vadd.f32 %v1237_v17, %v1139_v60  ;;  %v1033_v61 = vadd.f32 %v3347_v6, %v1032_v12  ;;  %v1144_v60 = vmul.f32 %v3375_v40, %v3375_v40 }
 0x1c9   :  { %v1034_v44 = vadd.f32 %v1033_v61, %v3373_v39  ;;  %v1239_v50 = vadd.f32 %v1238_v58, %v1140_v59  ;;  %v1145_v59 = vmul.f32 %v3401_v20, %v3401_v20 }
 0x1cb   :  { %v1240_v30 = vadd.f32 %v1239_v50, %v1141_v14  ;;  %v1035_v52 = vadd.f32 %v1034_v44, %v3380_v46  ;;  %v1146_v50 = vmul.f32 %v3408_v34, %v3408_v34 }
 0x1cd   :  { %v1036_v37 = vadd.f32 %v3368_v31, %v1035_v52  ;;  %v1241_v19 = vadd.f32 %v1240_v30, %v1142_v51  ;;  %v1147_v30 = vmul.f32 %v3396_v9, %v3396_v9 }
 0x1cf   :  { %v1242_v12 = vadd.f32 %v1241_v19, %v1143_v32  ;;  %v1037_v17 = vadd.f32 %v3375_v40, %v1036_v37  ;;  %v1148_v32 = vmul.f32 %v3403_v24, %v3403_v24 }
 0x1d1   :  { %v1038_v58 = vadd.f32 %v1037_v17, %v3401_v20  ;;  %v1243_v61 = vadd.f32 %v1242_v12, %v1144_v60  ;;  %v1149_v60 = vmul.f32 %v3429_v26, %v3429_v26 }
 0x1d3   :  { %v1244_v14 = vadd.f32 %v1243_v61, %v1145_v59  ;;  %v1039_v44 = vadd.f32 %v1038_v58, %v3408_v34  ;;  %v1150_v61 = vmul.f32 %v3436_v48, %v3436_v48 }
 0x1d5   :  { %v1040_v52 = vadd.f32 %v3396_v9, %v1039_v44  ;;  %v1245_v51 = vadd.f32 %v1244_v14, %v1146_v50  ;;  %v1151_v14 = vmul.f32 %v3424_v11, %v3424_v11 }
 0x1d7   :  { %v1246_v37 = vadd.f32 %v1245_v51, %v1147_v30  ;;  %v1041_v19 = vadd.f32 %v3403_v24, %v1040_v52  ;;  %v1152_v30 = vmul.f32 %v3431_v33, %v3431_v33 }
 0x1d9   :  { %v1042_v12 = vadd.f32 %v1041_v19, %v3429_v26  ;;  %v1247_v17 = vadd.f32 %v1246_v37, %v1148_v32  ;;  %v1153_v32 = vmul.f32 %v3457_v41, %v3457_v41 }
 0x1db   :  { %v1248_v59 = vadd.f32 %v1247_v17, %v1149_v60  ;;  %v1043_v58 = vadd.f32 %v1042_v12, %v3436_v48  ;;  %v1154_v17 = vmul.f32 %v3464_v4, %v3464_v4 }
 0x1dd   :  { %v1044_v44 = vadd.f32 %v3424_v11, %v1043_v58  ;;  %v1249_v50 = vadd.f32 %v1248_v59, %v1150_v61  ;;  %v1155_v59 = vmul.f32 %v3452_v25, %v3452_v25 }
 0x1df   :  { %v1250_v52 = vadd.f32 %v1249_v50, %v1151_v14  ;;  %v1045_v51 = vadd.f32 %v3431_v33, %v1044_v44  ;;  %v1156_v14 = vmul.f32 %v3459_v0, %v3459_v0 }
 0x1e1   :  { %v1046_v37 = vadd.f32 %v1045_v51, %v3457_v41  ;;  %v1251_v19 = vadd.f32 %v1250_v52, %v1152_v30  ;;  %v1157_v30 = vmul.f32 %v3485_v55, %v3485_v55 }
 0x1e3   :  { %v1252_v60 = vadd.f32 %v1251_v19, %v1153_v32  ;;  %v1047_v12 = vadd.f32 %v1046_v37, %v3464_v4  ;;  %v1158_v19 = vmul.f32 %v3492_v28, %v3492_v28 }
 0x1e5   :  { %v1048_v58 = vadd.f32 %v3452_v25, %v1047_v12  ;;  %v1253_v61 = vadd.f32 %v1252_v60, %v1154_v17  ;;  %v1159_v60 = vmul.f32 %v3480_v35, %v3480_v35 }
 0x1e7   :  { %v1254_v44 = vadd.f32 %v1253_v61, %v1155_v59  ;;  %v1049_v50 = vadd.f32 %v3459_v0, %v1048_v58  ;;  %v1160_v59 = vmul.f32 %v3487_v15, %v3487_v15 }
 0x1e9   :  { %v1050_v52 = vadd.f32 %v1049_v50, %v3485_v55  ;;  %v1255_v51 = vadd.f32 %v1254_v44, %v1156_v14  ;;  %v1161_v14 = vmul.f32 %v3513_v8, %v3513_v8 }
 0x1eb   :  { %v1256_v32 = vadd.f32 %v1255_v51, %v1157_v30  ;;  %v1051_v37 = vadd.f32 %v1050_v52, %v3492_v28  ;;  %v1162_v51 = vmul.f32 %v3520_v56, %v3520_v56 }
 0x1ed   :  { %v1052_v12 = vadd.f32 %v3480_v35, %v1051_v37  ;;  %v1257_v17 = vadd.f32 %v1256_v32, %v1158_v19  ;;  %v1163_v32 = vmul.f32 %v3508_v53, %v3508_v53 }
 0x1ef   :  { %v1258_v58 = vadd.f32 %v1257_v17, %v1159_v60  ;;  %v1053_v61 = vadd.f32 %v3487_v15, %v1052_v12  ;;  %v1164_v60 = vmul.f32 %v3515_v45, %v3515_v45 }
 0x1f1   :  { %v1054_v44 = vadd.f32 %v1053_v61, %v3513_v8  ;;  %v1259_v50 = vadd.f32 %v1258_v58, %v1160_v59  ;;  %v1165_v59 = vmul.f32 %v3541_v29, %v3541_v29 }
 0x1f3   :  { %v1260_v30 = vadd.f32 %v1259_v50, %v1161_v14  ;;  %v1055_v52 = vadd.f32 %v1054_v44, %v3520_v56  ;;  %v1166_v50 = vmul.f32 %v3548_v36, %v3548_v36 }
 0x1f5   :  { %v1056_v37 = vadd.f32 %v3508_v53, %v1055_v52  ;;  %v1261_v19 = vadd.f32 %v1260_v30, %v1162_v51  ;;  %v1167_v30 = vmul.f32 %v3536_v54, %v3536_v54 }
 0x1f7   :  { %v1262_v12 = vadd.f32 %v1261_v19, %v1163_v32  ;;  %v1057_v17 = vadd.f32 %v3515_v45, %v1056_v37  ;;  %v1168_v32 = vmul.f32 %v3543_v1, %v3543_v1 }
 0x1f9   :  { %v1058_v58 = vadd.f32 %v1057_v17, %v3541_v29  ;;  %v1263_v61 = vadd.f32 %v1262_v12, %v1164_v60  ;;  %v1169_v60 = vmul.f32 %v3569_v57, %v3569_v57 }
 0x1fb   :  { %v1264_v14 = vadd.f32 %v1263_v61, %v1165_v59  ;;  %v1059_v44 = vadd.f32 %v1058_v58, %v3548_v36  ;;  %v1170_v61 = vmul.f32 %v3576_v16, %v3576_v16 }
 0x1fd   :  { %v1060_v52 = vadd.f32 %v3536_v54, %v1059_v44  ;;  %v1265_v51 = vadd.f32 %v1264_v14, %v1166_v50  ;;  %v1171_v14 = vmul.f32 %v3564_v21, %v3564_v21 }
 0x1ff   :  { %v1266_v37 = vadd.f32 %v1265_v51, %v1167_v30  ;;  %v1061_v19 = vadd.f32 %v3543_v1, %v1060_v52  ;;  %v5677_v30 = vld [vmem:[#allocation73_spill] sm:$0xff] }
 0x200   :  { %v1172_v52 = vmul.f32 %v5677_v30, %v5677_v30 }
 0x201   :  { %v1062_v12 = vadd.f32 %v1061_v19, %v3569_v57  ;;  %v1267_v17 = vadd.f32 %v1266_v37, %v1168_v32 }
 0x203   :  { %v1268_v59 = vadd.f32 %v1267_v17, %v1169_v60  ;;  %v1063_v58 = vadd.f32 %v1062_v12, %v3576_v16 }
 0x205   :  { %v1064_v44 = vadd.f32 %v3564_v21, %v1063_v58  ;;  %v1269_v50 = vadd.f32 %v1268_v59, %v1170_v61 }
 0x207   :  { %v1065_v51 = vadd.f32 %v5677_v30, %v1064_v44  ;;  %v1270_v1 = vadd.f32 %v1269_v50, %v1171_v14  ;;  %v1290_v14 = vlaneseq  ;;  %v1282_v50 = vld [vmem:[#allocation7] sm:$0x1] }
 0x209   :  { %v1066_v19 = vrot.slane %v1065_v51, 4  ;;  %v1271_v32 = vadd.f32 %v1270_v1, %v1172_v52  ;;  %v1291_v1 = vshrl.u32 %v1290_v14, 7 }
 0x20b   :  { %v1067_v37 = vadd.f32 %v1066_v19, %v1065_v51  ;;  %v1272_v60 = vrot.slane %v1271_v32, 4  ;;  %v1292_v52 = vsub.s32 0, %v1291_v1  ;;  %v5685_v1 = vld [vmem:[#allocation21_spill] sm:$0xff] }
 0x20d   :  { %v1068_v12 = vrot.slane %v1067_v37, 2  ;;  %v1273_v17 = vadd.f32 %v1272_v60, %v1271_v32  ;;  %v1286_v32 = vld [vmem:[#allocation8] sm:$0x1] }
 0x20f   :  { %v1069_v54 = vadd.f32 %v1068_v12, %v1067_v37  ;;  %v1274_v36 = vrot.slane %v1273_v17, 2  ;;  %v5681_v12 = vld [vmem:[#allocation17_spill] sm:$0xff] }
 0x211   :  { %v1070_v29 = vrot.slane %v1069_v54, 1  ;;  %v1275_v45 = vadd.f32 %v1274_v36, %v1273_v17 }
 0x213   :  { %v1071_v53 = vadd.f32 %v1070_v29, %v1069_v54  ;;  %v1276_v56 = vrot.slane %v1275_v45, 1  ;;  %v5680_v29 = vld [vmem:[#allocation15_spill] sm:$0xff] }
 0x215   :  { %v1072_v58 = vmul.f32 0.00125, %v1071_v53  ;;  %v1277_v59 = vadd.f32 %v1276_v56, %v1275_v45  ;;  %v5678_v53 = vld [vmem:[#allocation16_spill] sm:$0xff] }
 0x217   :  { %v1278_v61 = vmul.f32 0.00125, %v1277_v59  ;;  %v1279_v21 = vmul.f32 %v1072_v58, %v1072_v58  ;;  %v5683_v59 = vld [vmem:[#allocation22_spill] sm:$0xff] }
 0x219   :  { %v1280_v8 = vsub.f32 %v1278_v61, %v1279_v21 }
 0x21b   :  { %v1281_v15 = vmax.f32 %v1280_v8, 0.0  ;;  %v5679_v8 = vld [vmem:[#allocation18_spill] sm:$0xff] }
 0x21d   :  { %v1283_v44 = vadd.f32 1e-05, %v1281_v15 }
 0x21f   :  { %3032 = vrsqrt.f32 %v1283_v44  ;;  %v5684_v44 = vld [vmem:[#allocation19_spill] sm:$0xff] }
 0x229   :  { %v3033_v51 = vpop.eup %3032 }
 0x22a   :  { %v1285_v19 = vmul.f32 %v3033_v51, %v1282_v50  ;;  %v5686_v51 = vld [vmem:[#allocation24_spill] sm:$0xff] }
 0x22c   :  { %v1287_v37 = vmul.f32 %v1285_v19, %v1072_v58  ;;  %v3745_v60 = vrot.slane %v1285_v19, %v1292_v52 }
 0x22e   :  { %v1288_v36 = vsub.f32 %v1286_v32, %v1287_v37  ;;  %v1391_v56 = vmul.f32 %v3745_v60, %v3569_v57  ;;  %v1392_v45 = vmul.f32 %v3745_v60, %v3576_v16  ;;  %v3753_v15 = vmul.f32 %v3745_v60, %v5678_v53  ;;  %v5682_v57 = vld [vmem:[#allocation20_spill] sm:$0xff]  ;;  %v5688_v32 = vld [vmem:[#allocation26_spill] sm:$0xff]  ;;  %v5690_v37 = vld [vmem:[#allocation23_spill] sm:$0xff] }
 0x22f   :  { %v3757_v54 = vmul.f32 %v3745_v60, %v5679_v8  ;;  %v3761_v21 = vmul.f32 %v5680_v29, %v3745_v60  ;;  %v3765_v17 = vmul.f32 %v5681_v12, %v3745_v60  ;;  %v3769_v58 = vmul.f32 %v3745_v60, %v5682_v57  ;;  %v5692_v53 = vld [vmem:[#allocation25_spill] sm:$0xff]  ;;  %v5694_v57 = vld [vmem:[#allocation28_spill] sm:$0xff] }
 0x230   :  { %v3771_v16 = vrot.slane %v1288_v36, %v1292_v52  ;;  %v3775_v61 = vmul.f32 %v3745_v60, %v5683_v59  ;;  %v3779_v14 = vmul.f32 %v5684_v44, %v3745_v60  ;;  %v3783_v50 = vmul.f32 %v5685_v1, %v3745_v60  ;;  %v5696_v44 = vld [vmem:[#allocation30_spill] sm:$0xff] }
 0x231   :  { %v3787_v19 = vmul.f32 %v3745_v60, %v5686_v51  ;;  %v3791_v52 = vmul.f32 %v3745_v60, %v5688_v32  ;;  %v3795_v36 = vmul.f32 %v5690_v37, %v3745_v60  ;;  %v3799_v8 = vmul.f32 %v5692_v53, %v3745_v60  ;;  %v5698_v51 = vld [vmem:[#allocation27_spill] sm:$0xff]  ;;  %v5700_v37 = vld [vmem:[#allocation29_spill] sm:$0xff] }
 0x232   :  { %v1497_v29 = vadd.f32 %v3771_v16, %v1391_v56  ;;  %v1498_v12 = vadd.f32 %v3771_v16, %v1392_v45  ;;  %v3805_v59 = vmul.f32 %v3745_v60, %v5694_v57  ;;  %v3809_v1 = vmul.f32 %v3745_v60, %v5696_v44  ;;  %v5704_v45 = vld [vmem:[#allocation34_spill] sm:$0xff]  ;;  %v5706_v44 = vld [vmem:[#allocation31_spill] sm:$0xff] }
 0x233   :  { %5687 = vst [vmem:[#allocation73_spill] sm:$0xff] %v3787_v19  ;;  %5689 = vst [vmem:[#allocation16_spill] sm:$0xff] %v3791_v52  ;;  %v3813_v32 = vmul.f32 %v5698_v51, %v3745_v60  ;;  %v3817_v53 = vmul.f32 %v5700_v37, %v3745_v60  ;;  %v3825_v57 = vmul.f32 %v3745_v60, %v5704_v45  ;;  %v5708_v51 = vld [vmem:[#allocation33_spill] sm:$0xff]  ;;  %v5710_v37 = vld [vmem:[#allocation36_spill] sm:$0xff] }
 0x234   :  { %5691 = vst [vmem:[#allocation18_spill] sm:$0xff] %v3795_v36  ;;  %5693 = vst [vmem:[#allocation15_spill] sm:$0xff] %v3799_v8  ;;  %v5702_v8 = vld [vmem:[#allocation32_spill] sm:$0xff]  ;;  %v1598_v36 = vmul.f32 0.2, %v1498_v12  ;;  %v5714_v45 = vld [vmem:[#allocation35_spill] sm:$0xff] }
 0x235   :  { %5695 = vst [vmem:[#allocation17_spill] sm:$0xff] %v3805_v59  ;;  %5697 = vst [vmem:[#allocation20_spill] sm:$0xff] %v3809_v1  ;;  %v3821_v56 = vmul.f32 %v3745_v60, %v5702_v8  ;;  %v1597_v59 = vmul.f32 0.2, %v1497_v29  ;;  %v3829_v1 = vmul.f32 %v5706_v44, %v3745_v60  ;;  %v5712_v8 = vld [vmem:[#allocation38_spill] sm:$0xff]  ;;  %v5716_v52 = vld [vmem:[#allocation37_spill] sm:$0xff] }
 0x236   :  { %5699 = vst [vmem:[#allocation22_spill] sm:$0xff] %v3813_v32  ;;  %5701 = vst [vmem:[#allocation19_spill] sm:$0xff] %v3817_v53  ;;  %v3833_v32 = vmul.f32 %v5708_v51, %v3745_v60  ;;  %v3837_v53 = vmul.f32 %v3745_v60, %v5710_v37  ;;  %v3849_v44 = vmul.f32 %v5716_v52, %v3745_v60  ;;  %v5717_v51 = vld [vmem:[#allocation40_spill] sm:$0xff]  ;;  %v5718_v37 = vld [vmem:[#allocation42_spill] sm:$0xff] }
 0x237   :  { %5703 = vst [vmem:[#allocation21_spill] sm:$0xff] %v3821_v56  ;;  %5705 = vst [vmem:[#allocation24_spill] sm:$0xff] %v3825_v57  ;;  %v3841_v56 = vmul.f32 %v3745_v60, %v5712_v8  ;;  %v3845_v57 = vmul.f32 %v5714_v45, %v3745_v60  ;;  %v1698_v19 = vmax.f32 %v1498_v12, %v1598_v36  ;;  %v5720_v8 = vld [vmem:[#allocation39_spill] sm:$0xff]  ;;  %v5722_v45 = vld [vmem:[#allocation41_spill] sm:$0xff] }
 0x238   :  { %5707 = vst [vmem:[#allocation26_spill] sm:$0xff] %v3829_v1  ;;  %5709 = vst [vmem:[#allocation23_spill] sm:$0xff] %v3833_v32  ;;  %v1697_v1 = vmax.f32 %v1497_v29, %v1597_v59  ;;  %v3853_v32 = vmul.f32 %v3745_v60, %v5717_v51  ;;  %v5724_v52 = vld [vmem:[#allocation44_spill] sm:$0xff]  ;;  %v5725_v36 = vld [vmem:[#allocation46_spill] sm:$0xff] }
 0x239   :  { %5711 = vst [vmem:[#allocation25_spill] sm:$0xff] %v3837_v53  ;;  %5713 = vst [vmem:[#allocation28_spill] sm:$0xff] %v3841_v56  ;;  %v3857_v53 = vmul.f32 %v3745_v60, %v5718_v37  ;;  %v3861_v56 = vmul.f32 %v5720_v8, %v3745_v60  ;;  %v3869_v29 = vmul.f32 %v3745_v60, %v5724_v52  ;;  %v5727_v51 = vld [vmem:[#allocation43_spill] sm:$0xff]  ;;  %v5728_v8 = vld [vmem:[#allocation45_spill] sm:$0xff] }
 0x23a   :  { %5715 = vst [vmem:[#allocation30_spill] sm:$0xff] %v3845_v57  ;;  %v3865_v57 = vmul.f32 %v5722_v45, %v3745_v60  ;;  %v3873_v12 = vmul.f32 %v3745_v60, %v5725_v36  ;;  %v2721_v59 = vpack.c.bf16 %v1698_v19, %v1697_v1  ;;  %v3877_v37 = vmul.f32 %v5727_v51, %v3745_v60  ;;  %v5734_v36 = vld [vmem:[#allocation47_spill] sm:$0xff]  ;;  %v5736_v19 = vld [vmem:[#allocation49_spill] sm:$0xff] }
 0x23b   :  { %5719 = vst [vmem:[#allocation27_spill] sm:$0xff] %v3857_v53  ;;  %5721 = vst [vmem:[#allocation29_spill] sm:$0xff] %v3861_v56  ;;  %v3881_v56 = vmul.f32 %v5728_v8, %v3745_v60  ;;  %v5730_v53 = vld [vmem:[#allocation48_spill] sm:$0xff]  ;;  %v3897_v1 = vmul.f32 %v5736_v19, %v3745_v60  ;;  %v5738_v51 = vld [vmem:[#allocation53_spill] sm:$0xff] }
 0x23c   :  { %5723 = vst [vmem:[#allocation32_spill] sm:$0xff] %v3865_v57  ;;  %5726 = vst [vmem:[#allocation34_spill] sm:$0xff] %v3873_v12  ;;  %v3885_v45 = vmul.f32 %v3745_v60, %v5730_v53  ;;  %v5732_v57 = vld [vmem:[#allocation50_spill] sm:$0xff]  ;;  %v3893_v12 = vmul.f32 %v5734_v36, %v3745_v60  ;;  %v3901_v8 = vmul.f32 %v3745_v60, %v5738_v51 }
 0x23d   :  { %5729 = vst [vmem:[#allocation31_spill] sm:$0xff] %v3881_v56  ;;  %v3889_v52 = vmul.f32 %v3745_v60, %v5732_v57  ;;  %5737 = vst [vmem:[#allocation35_spill] sm:$0xff] %v3897_v1  ;;  %v5739_v56 = vld [vmem:[#allocation55_spill] sm:$0xff]  ;;  %v5741_v57 = vld [vmem:[#allocation52_spill] sm:$0xff] }
 0x23e   :  { %5731 = vst [vmem:[#allocation33_spill] sm:$0xff] %v3885_v45  ;;  %5735 = vst [vmem:[#allocation38_spill] sm:$0xff] %v3893_v12  ;;  %v3905_v53 = vmul.f32 %v3745_v60, %v5739_v56  ;;  %v5743_v36 = vld [vmem:[#allocation54_spill] sm:$0xff]  ;;  %v5745_v45 = vld [vmem:[#allocation61_spill] sm:$0xff] }
 0x23f   :  { %5733 = vst [vmem:[#allocation36_spill] sm:$0xff] %v3889_v52  ;;  %2775 = vst [vmem:[#allocation10 + $0x180] sm:$0xff] %v2721_v59   ;;  %v3909_v52 = vmul.f32 %v5741_v57, %v3745_v60  ;;  %v3913_v12 = vmul.f32 %v5743_v36, %v3745_v60  ;;  %v3917_v19 = vmul.f32 %v3745_v60, %v5745_v45  ;;  %v5747_v1 = vld [vmem:[#allocation63_spill] sm:$0xff]  ;;  %v5749_v59 = vld [vmem:[#allocation60_spill] sm:$0xff] }
 0x240   :  { %5740 = vst [vmem:[#allocation37_spill] sm:$0xff] %v3905_v53  ;;  %v3921_v51 = vmul.f32 %v3745_v60, %v5747_v1  ;;  %v3925_v56 = vmul.f32 %v5749_v59, %v3745_v60  ;;  %v5751_v53 = vld [vmem:[#allocation62_spill] sm:$0xff] }
 0x241   :  { %5742 = vst [vmem:[#allocation40_spill] sm:$0xff] %v3909_v52  ;;  %5744 = vst [vmem:[#allocation42_spill] sm:$0xff] %v3913_v12  ;;  %v3929_v57 = vmul.f32 %v5751_v53, %v3745_v60  ;;  %v5753_v52 = vld [vmem:[#allocation69_spill] sm:$0xff]  ;;  %v5754_v12 = vld [vmem:[#allocation71_spill] sm:$0xff] }
 0x242   :  { %5746 = vst [vmem:[#allocation39_spill] sm:$0xff] %v3917_v19  ;;  %5748 = vst [vmem:[#allocation41_spill] sm:$0xff] %v3921_v51  ;;  %v3933_v36 = vmul.f32 %v3745_v60, %v5753_v52  ;;  %v3937_v45 = vmul.f32 %v3745_v60, %v5754_v12  ;;  %v5755_v19 = vld [vmem:[#allocation68_spill] sm:$0xff]  ;;  %v5756_v51 = vld [vmem:[#allocation70_spill] sm:$0xff]  ;;  %v3957_v12 = vmul.f32 %v3580_v10, %v3745_v60 }
 0x243   :  { %5750 = vst [vmem:[#allocation44_spill] sm:$0xff] %v3925_v56  ;;  %5752 = vst [vmem:[#allocation46_spill] sm:$0xff] %v3929_v57  ;;  %v3941_v1 = vmul.f32 %v5755_v19, %v3745_v60  ;;  %v3945_v59 = vmul.f32 %v5756_v51, %v3745_v60  ;;  %v5757_v56 = vld [vmem:[#allocation74_spill] sm:$0xff]  ;;  %v5758_v57 = vld [vmem:[#allocation75_spill] sm:$0xff]  ;;  %v3961_v19 = vmul.f32 %v3588_v49, %v3745_v60 }
 0x244   :  { %v3949_v53 = vmul.f32 %v3745_v60, %v5757_v56  ;;  %v3953_v52 = vmul.f32 %v3745_v60, %v5758_v57  ;;  %v3965_v51 = vmul.f32 %v3745_v60, %v3261_v2  ;;  %v3969_v56 = vmul.f32 %v3745_v60, %v3268_v7 }
 0x245   :  { %v3973_v57 = vmul.f32 %v3253_v62, %v3745_v60  ;;  %v3977_v10 = vmul.f32 %v3263_v3, %v3745_v60  ;;  %v3981_v49 = vmul.f32 %v3745_v60, %v3289_v22  ;;  %v3985_v2 = vmul.f32 %v3745_v60, %v3296_v27 }
 0x246   :  { %v3989_v7 = vmul.f32 %v3284_v18, %v3745_v60  ;;  %v3993_v62 = vmul.f32 %v3291_v23, %v3745_v60  ;;  %v3997_v3 = vmul.f32 %v3745_v60, %v3317_v42  ;;  %v4001_v22 = vmul.f32 %v3745_v60, %v3324_v47 }
 0x247   :  { %v4005_v27 = vmul.f32 %v3312_v38, %v3745_v60  ;;  %v4009_v18 = vmul.f32 %v3319_v43, %v3745_v60  ;;  %v4013_v23 = vmul.f32 %v3745_v60, %v3345_v5  ;;  %v4017_v42 = vmul.f32 %v3745_v60, %v3352_v13 }
 0x248   :  { %v4021_v47 = vmul.f32 %v3340_v63, %v3745_v60  ;;  %v4025_v38 = vmul.f32 %v3347_v6, %v3745_v60  ;;  %v4029_v43 = vmul.f32 %v3745_v60, %v3373_v39  ;;  %v4033_v5 = vmul.f32 %v3745_v60, %v3380_v46 }
 0x249   :  { %v4037_v13 = vmul.f32 %v3368_v31, %v3745_v60  ;;  %v4041_v63 = vmul.f32 %v3375_v40, %v3745_v60  ;;  %v4045_v6 = vmul.f32 %v3745_v60, %v3401_v20  ;;  %v4049_v39 = vmul.f32 %v3745_v60, %v3408_v34 }
 0x24a   :  { %v4053_v46 = vmul.f32 %v3396_v9, %v3745_v60  ;;  %v4057_v31 = vmul.f32 %v3403_v24, %v3745_v60  ;;  %v4061_v40 = vmul.f32 %v3745_v60, %v3429_v26  ;;  %v4065_v20 = vmul.f32 %v3745_v60, %v3436_v48 }
 0x24b   :  { %v4069_v34 = vmul.f32 %v3424_v11, %v3745_v60  ;;  %v4073_v9 = vmul.f32 %v3431_v33, %v3745_v60  ;;  %v4077_v24 = vmul.f32 %v3745_v60, %v3457_v41  ;;  %v4081_v26 = vmul.f32 %v3745_v60, %v3464_v4 }
 0x24c   :  { %v4085_v48 = vmul.f32 %v3452_v25, %v3745_v60  ;;  %v4089_v11 = vmul.f32 %v3459_v0, %v3745_v60  ;;  %v4093_v33 = vmul.f32 %v3745_v60, %v3485_v55  ;;  %v4097_v41 = vmul.f32 %v3745_v60, %v3492_v28 }
 0x24d   :  { %5759 = vst [vmem:[#allocation43_spill] sm:$0xff] %v4081_v26  ;;  %v4101_v4 = vmul.f32 %v3480_v35, %v3745_v60  ;;  %v5765_v26 = vld [vmem:[#allocation51_spill] sm:$0xff] }
 0x24e   :  { %5760 = vst [vmem:[#allocation45_spill] sm:$0xff] %v4085_v48  ;;  %5761 = vst [vmem:[#allocation48_spill] sm:$0xff] %v4089_v11  ;;  %v4105_v25 = vmul.f32 %v5765_v26, %v3745_v60  ;;  %v5767_v48 = vld [vmem:[#allocation57_spill] sm:$0xff]  ;;  %v5769_v11 = vld [vmem:[#allocation59_spill] sm:$0xff] }
 0x24f   :  { %5762 = vst [vmem:[#allocation50_spill] sm:$0xff] %v4093_v33  ;;  %5763 = vst [vmem:[#allocation47_spill] sm:$0xff] %v4097_v41  ;;  %v4109_v0 = vmul.f32 %v3745_v60, %v5767_v48  ;;  %v4113_v55 = vmul.f32 %v3745_v60, %v5769_v11  ;;  %v5771_v33 = vld [vmem:[#allocation56_spill] sm:$0xff]  ;;  %v5773_v41 = vld [vmem:[#allocation58_spill] sm:$0xff] }
 0x250   :  { %5764 = vst [vmem:[#allocation49_spill] sm:$0xff] %v4101_v4  ;;  %5766 = vst [vmem:[#allocation53_spill] sm:$0xff] %v4105_v25  ;;  %v4117_v28 = vmul.f32 %v5771_v33, %v3745_v60  ;;  %v4121_v35 = vmul.f32 %v5773_v41, %v3745_v60  ;;  %v5774_v4 = vld [vmem:[#allocation65_spill] sm:$0xff]  ;;  %v5775_v25 = vld [vmem:[#allocation67_spill] sm:$0xff] }
 0x251   :  { %5768 = vst [vmem:[#allocation55_spill] sm:$0xff] %v4109_v0  ;;  %5770 = vst [vmem:[#allocation52_spill] sm:$0xff] %v4113_v55  ;;  %v4125_v26 = vmul.f32 %v3745_v60, %v5774_v4  ;;  %v4129_v48 = vmul.f32 %v3745_v60, %v5775_v25  ;;  %v5776_v0 = vld [vmem:[#allocation64_spill] sm:$0xff]  ;;  %v5777_v55 = vld [vmem:[#allocation66_spill] sm:$0xff]  ;;  %v4145_v4 = vmul.f32 %v5677_v30, %v3745_v60 }
 0x252   :  { %5772 = vst [vmem:[#allocation54_spill] sm:$0xff] %v4117_v28  ;;  %v4133_v11 = vmul.f32 %v5776_v0, %v3745_v60  ;;  %v4137_v33 = vmul.f32 %v5777_v55, %v3745_v60  ;;  %v5778_v28 = vld [vmem:[#allocation72_spill] sm:$0xff]  ;;  %v4149_v25 = vadd.f32 %v3771_v16, %v3753_v15  ;;  %v4153_v0 = vadd.f32 %v3771_v16, %v3757_v54 }
 0x253   :  { %v4141_v41 = vmul.f32 %v5778_v28, %v3745_v60  ;;  %v4157_v55 = vadd.f32 %v3771_v16, %v3761_v21  ;;  %v4161_v28 = vadd.f32 %v3771_v16, %v3765_v17  ;;  %v4165_v30 = vadd.f32 %v3771_v16, %v3769_v58  ;;  %v5787_v21 = vld [vmem:[#allocation73_spill] sm:$0xff] }
 0x254   :  { %5779 = vst [vmem:[#allocation61_spill] sm:$0xff] %v4149_v25  ;;  %5780 = vst [vmem:[#allocation63_spill] sm:$0xff] %v4153_v0  ;;  %v4169_v60 = vadd.f32 %v3771_v16, %v3775_v61  ;;  %v4173_v15 = vadd.f32 %v3771_v16, %v3779_v14  ;;  %v4177_v54 = vadd.f32 %v3771_v16, %v3783_v50 }
 0x255   :  { %5781 = vst [vmem:[#allocation60_spill] sm:$0xff] %v4157_v55  ;;  %5782 = vst [vmem:[#allocation62_spill] sm:$0xff] %v4161_v28  ;;  %v4181_v17 = vadd.f32 %v3771_v16, %v5787_v21  ;;  %v5789_v28 = vld [vmem:[#allocation16_spill] sm:$0xff] }
 0x256   :  { %5783 = vst [vmem:[#allocation69_spill] sm:$0xff] %v4165_v30  ;;  %5784 = vst [vmem:[#allocation71_spill] sm:$0xff] %v4169_v60  ;;  %v4185_v58 = vadd.f32 %v3771_v16, %v5789_v28  ;;  %v5791_v30 = vld [vmem:[#allocation18_spill] sm:$0xff]  ;;  %v5793_v60 = vld [vmem:[#allocation15_spill] sm:$0xff] }
 0x257   :  { %5785 = vst [vmem:[#allocation68_spill] sm:$0xff] %v4173_v15  ;;  %5786 = vst [vmem:[#allocation70_spill] sm:$0xff] %v4177_v54  ;;  %v4189_v61 = vadd.f32 %v3771_v16, %v5791_v30  ;;  %v4193_v14 = vadd.f32 %v3771_v16, %v5793_v60  ;;  %v5795_v15 = vld [vmem:[#allocation17_spill] sm:$0xff]  ;;  %v5797_v54 = vld [vmem:[#allocation20_spill] sm:$0xff] }
 0x258   :  { %5788 = vst [vmem:[#allocation74_spill] sm:$0xff] %v4181_v17  ;;  %5790 = vst [vmem:[#allocation75_spill] sm:$0xff] %v4185_v58  ;;  %v4197_v50 = vadd.f32 %v3771_v16, %v5795_v15  ;;  %v4201_v21 = vadd.f32 %v3771_v16, %v5797_v54  ;;  %v5799_v17 = vld [vmem:[#allocation22_spill] sm:$0xff]  ;;  %v5801_v58 = vld [vmem:[#allocation19_spill] sm:$0xff] }
 0x259   :  { %5792 = vst [vmem:[#allocation51_spill] sm:$0xff] %v4189_v61  ;;  %5794 = vst [vmem:[#allocation57_spill] sm:$0xff] %v4193_v14  ;;  %v4205_v28 = vadd.f32 %v3771_v16, %v5799_v17  ;;  %v4209_v30 = vadd.f32 %v3771_v16, %v5801_v58  ;;  %v5803_v61 = vld [vmem:[#allocation21_spill] sm:$0xff]  ;;  %v5805_v14 = vld [vmem:[#allocation24_spill] sm:$0xff] }
 0x25a   :  { %5796 = vst [vmem:[#allocation59_spill] sm:$0xff] %v4197_v50  ;;  %5798 = vst [vmem:[#allocation56_spill] sm:$0xff] %v4201_v21  ;;  %v4213_v60 = vadd.f32 %v3771_v16, %v5803_v61  ;;  %v4217_v15 = vadd.f32 %v3771_v16, %v5805_v14  ;;  %v5807_v50 = vld [vmem:[#allocation26_spill] sm:$0xff]  ;;  %v5809_v21 = vld [vmem:[#allocation23_spill] sm:$0xff] }
 0x25b   :  { %5800 = vst [vmem:[#allocation58_spill] sm:$0xff] %v4205_v28  ;;  %5802 = vst [vmem:[#allocation65_spill] sm:$0xff] %v4209_v30  ;;  %v4221_v54 = vadd.f32 %v3771_v16, %v5807_v50  ;;  %v4225_v17 = vadd.f32 %v3771_v16, %v5809_v21  ;;  %v5811_v28 = vld [vmem:[#allocation25_spill] sm:$0xff]  ;;  %v5813_v30 = vld [vmem:[#allocation28_spill] sm:$0xff]  ;;  %v4241_v50 = vadd.f32 %v3771_v16, %v3849_v44 }
 0x25c   :  { %5804 = vst [vmem:[#allocation67_spill] sm:$0xff] %v4213_v60  ;;  %5806 = vst [vmem:[#allocation64_spill] sm:$0xff] %v4217_v15  ;;  %v4229_v58 = vadd.f32 %v3771_v16, %v5811_v28  ;;  %v4233_v61 = vadd.f32 %v3771_v16, %v5813_v30  ;;  %v5815_v60 = vld [vmem:[#allocation30_spill] sm:$0xff]  ;;  %v4245_v21 = vadd.f32 %v3771_v16, %v3853_v32 }
 0x25d   :  { %5808 = vst [vmem:[#allocation66_spill] sm:$0xff] %v4221_v54  ;;  %5810 = vst [vmem:[#allocation72_spill] sm:$0xff] %v4225_v17  ;;  %v4237_v14 = vadd.f32 %v3771_v16, %v5815_v60  ;;  %v5819_v17 = vld [vmem:[#allocation27_spill] sm:$0xff]  ;;  %v4261_v44 = vadd.f32 %v3771_v16, %v3869_v29 }
 0x25e   :  { %5812 = vst [vmem:[#allocation73_spill] sm:$0xff] %v4229_v58  ;;  %5814 = vst [vmem:[#allocation16_spill] sm:$0xff] %v4233_v61  ;;  %v4249_v28 = vadd.f32 %v3771_v16, %v5819_v17  ;;  %v5821_v58 = vld [vmem:[#allocation29_spill] sm:$0xff]  ;;  %v5823_v61 = vld [vmem:[#allocation32_spill] sm:$0xff]  ;;  %v4269_v17 = vadd.f32 %v3771_v16, %v3877_v37 }
 0x25f   :  { %5816 = vst [vmem:[#allocation18_spill] sm:$0xff] %v4237_v14  ;;  %5817 = vst [vmem:[#allocation15_spill] sm:$0xff] %v4241_v50  ;;  %v4253_v30 = vadd.f32 %v3771_v16, %v5821_v58  ;;  %v4257_v60 = vadd.f32 %v3771_v16, %v5823_v61  ;;  %v5826_v50 = vld [vmem:[#allocation34_spill] sm:$0xff] }
 0x260   :  { %5818 = vst [vmem:[#allocation17_spill] sm:$0xff] %v4245_v21  ;;  %5820 = vst [vmem:[#allocation20_spill] sm:$0xff] %v4249_v28  ;;  %v4265_v32 = vadd.f32 %v3771_v16, %v5826_v50  ;;  %v5829_v28 = vld [vmem:[#allocation31_spill] sm:$0xff] }
 0x261   :  { %5822 = vst [vmem:[#allocation22_spill] sm:$0xff] %v4253_v30  ;;  %5824 = vst [vmem:[#allocation19_spill] sm:$0xff] %v4257_v60  ;;  %v4273_v58 = vadd.f32 %v3771_v16, %v5829_v28  ;;  %v5831_v30 = vld [vmem:[#allocation33_spill] sm:$0xff]  ;;  %v5833_v60 = vld [vmem:[#allocation36_spill] sm:$0xff]  ;;  %v4293_v28 = vadd.f32 %v3771_v16, %v3901_v8 }
 0x262   :  { %5825 = vst [vmem:[#allocation21_spill] sm:$0xff] %v4261_v44  ;;  %5827 = vst [vmem:[#allocation24_spill] sm:$0xff] %v4265_v32  ;;  %v4277_v61 = vadd.f32 %v3771_v16, %v5831_v30  ;;  %v4281_v29 = vadd.f32 %v3771_v16, %v5833_v60  ;;  %v5835_v44 = vld [vmem:[#allocation38_spill] sm:$0xff]  ;;  %v5837_v32 = vld [vmem:[#allocation35_spill] sm:$0xff] }
 0x263   :  { %5828 = vst [vmem:[#allocation26_spill] sm:$0xff] %v4269_v17  ;;  %5830 = vst [vmem:[#allocation23_spill] sm:$0xff] %v4273_v58  ;;  %v4285_v50 = vadd.f32 %v3771_v16, %v5835_v44  ;;  %v4289_v37 = vadd.f32 %v3771_v16, %v5837_v32  ;;  %v5840_v58 = vld [vmem:[#allocation37_spill] sm:$0xff] }
 0x264   :  { %5832 = vst [vmem:[#allocation25_spill] sm:$0xff] %v4277_v61  ;;  %5834 = vst [vmem:[#allocation28_spill] sm:$0xff] %v4281_v29  ;;  %v4297_v30 = vadd.f32 %v3771_v16, %v5840_v58  ;;  %v5842_v61 = vld [vmem:[#allocation40_spill] sm:$0xff]  ;;  %v5843_v29 = vld [vmem:[#allocation42_spill] sm:$0xff] }
 0x265   :  { %5836 = vst [vmem:[#allocation30_spill] sm:$0xff] %v4285_v50  ;;  %5838 = vst [vmem:[#allocation27_spill] sm:$0xff] %v4289_v37  ;;  %v4301_v60 = vadd.f32 %v3771_v16, %v5842_v61  ;;  %v4305_v44 = vadd.f32 %v3771_v16, %v5843_v29  ;;  %v5845_v50 = vld [vmem:[#allocation39_spill] sm:$0xff]  ;;  %v5846_v37 = vld [vmem:[#allocation41_spill] sm:$0xff]  ;;  %v4325_v29 = vadd.f32 %v3771_v16, %v3933_v36 }
 0x266   :  { %5839 = vst [vmem:[#allocation29_spill] sm:$0xff] %v4293_v28  ;;  %5841 = vst [vmem:[#allocation32_spill] sm:$0xff] %v4297_v30  ;;  %v4309_v32 = vadd.f32 %v3771_v16, %v5845_v50  ;;  %v4313_v8 = vadd.f32 %v3771_v16, %v5846_v37  ;;  %v5847_v28 = vld [vmem:[#allocation44_spill] sm:$0xff]  ;;  %v5849_v30 = vld [vmem:[#allocation46_spill] sm:$0xff]  ;;  %v4329_v50 = vadd.f32 %v3771_v16, %v3937_v45 }
 0x267   :  { %5844 = vst [vmem:[#allocation34_spill] sm:$0xff] %v4305_v44  ;;  %v4317_v58 = vadd.f32 %v3771_v16, %v5847_v28  ;;  %v4321_v61 = vadd.f32 %v3771_v16, %v5849_v30  ;;  %v4333_v37 = vadd.f32 %v3771_v16, %v3941_v1  ;;  %v4337_v28 = vadd.f32 %v3771_v16, %v3945_v59 }
 0x268   :  { %5850 = vst [vmem:[#allocation33_spill] sm:$0xff] %v4329_v50  ;;  %v4341_v30 = vadd.f32 %v3771_v16, %v3949_v53  ;;  %v4345_v36 = vadd.f32 %v3771_v16, %v3953_v52  ;;  %v4349_v45 = vadd.f32 %v3771_v16, %v3957_v12  ;;  %v4353_v1 = vadd.f32 %v3771_v16, %v3961_v19 }
 0x269   :  { %5848 = vst [vmem:[#allocation31_spill] sm:$0xff] %v4317_v58  ;;  %5851 = vst [vmem:[#allocation36_spill] sm:$0xff] %v4337_v28  ;;  %v4357_v59 = vadd.f32 %v3771_v16, %v3965_v51  ;;  %v4361_v53 = vadd.f32 %v3771_v16, %v3969_v56  ;;  %v4365_v52 = vadd.f32 %v3771_v16, %v3973_v57 }
 0x26a   :  { %5852 = vst [vmem:[#allocation38_spill] sm:$0xff] %v4341_v30  ;;  %5853 = vst [vmem:[#allocation35_spill] sm:$0xff] %v4345_v36  ;;  %v4369_v12 = vadd.f32 %v3771_v16, %v3977_v10  ;;  %v4373_v19 = vadd.f32 %v3771_v16, %v3981_v49  ;;  %v4377_v51 = vadd.f32 %v3771_v16, %v3985_v2 }
 0x26b   :  { %5854 = vst [vmem:[#allocation37_spill] sm:$0xff] %v4353_v1  ;;  %5855 = vst [vmem:[#allocation40_spill] sm:$0xff] %v4357_v59  ;;  %v4381_v56 = vadd.f32 %v3771_v16, %v3989_v7  ;;  %v4385_v57 = vadd.f32 %v3771_v16, %v3993_v62  ;;  %v4389_v10 = vadd.f32 %v3771_v16, %v3997_v3 }
 0x26c   :  { %5856 = vst [vmem:[#allocation42_spill] sm:$0xff] %v4361_v53  ;;  %5857 = vst [vmem:[#allocation39_spill] sm:$0xff] %v4365_v52  ;;  %v4393_v49 = vadd.f32 %v3771_v16, %v4001_v22  ;;  %v4397_v2 = vadd.f32 %v3771_v16, %v4005_v27  ;;  %v4401_v7 = vadd.f32 %v3771_v16, %v4009_v18 }
 0x26d   :  { %5858 = vst [vmem:[#allocation41_spill] sm:$0xff] %v4369_v12  ;;  %5859 = vst [vmem:[#allocation44_spill] sm:$0xff] %v4373_v19  ;;  %v4405_v62 = vadd.f32 %v3771_v16, %v4013_v23  ;;  %v4409_v3 = vadd.f32 %v3771_v16, %v4017_v42  ;;  %v4413_v22 = vadd.f32 %v3771_v16, %v4021_v47 }
 0x26e   :  { %5860 = vst [vmem:[#allocation46_spill] sm:$0xff] %v4377_v51  ;;  %5861 = vst [vmem:[#allocation76_spill] sm:$0xff] %v4381_v56  ;;  %v4417_v27 = vadd.f32 %v3771_v16, %v4025_v38  ;;  %v4421_v18 = vadd.f32 %v3771_v16, %v4029_v43  ;;  %v4425_v23 = vadd.f32 %v3771_v16, %v4033_v5 }
 0x26f   :  { %5862 = vst [vmem:[#allocation77_spill] sm:$0xff] %v4385_v57  ;;  %5863 = vst [vmem:[#allocation78_spill] sm:$0xff] %v4389_v10  ;;  %v4429_v42 = vadd.f32 %v3771_v16, %v4037_v13  ;;  %v4433_v47 = vadd.f32 %v3771_v16, %v4041_v63  ;;  %v4437_v38 = vadd.f32 %v3771_v16, %v4045_v6  ;;  %v5948_v10 = vld [vmem:[#allocation16_spill] sm:$0xff] }
 0x270   :  { %5864 = vst [vmem:[#allocation79_spill] sm:$0xff] %v4393_v49  ;;  %5865 = vst [vmem:[#allocation80_spill] sm:$0xff] %v4397_v2  ;;  %v4441_v43 = vadd.f32 %v3771_v16, %v4049_v39  ;;  %v4445_v5 = vadd.f32 %v3771_v16, %v4053_v46  ;;  %v4449_v13 = vadd.f32 %v3771_v16, %v4057_v31  ;;  %v5946_v2 = vld [vmem:[#allocation73_spill] sm:$0xff] }
 0x271   :  { %5866 = vst [vmem:[#allocation81_spill] sm:$0xff] %v4401_v7  ;;  %5867 = vst [vmem:[#allocation82_spill] sm:$0xff] %v4405_v62  ;;  %v4453_v63 = vadd.f32 %v3771_v16, %v4061_v40  ;;  %v4457_v6 = vadd.f32 %v3771_v16, %v4065_v20  ;;  %v4461_v39 = vadd.f32 %v3771_v16, %v4069_v34  ;;  %v4599_v62 = vmul.f32 0.2, %v4217_v15 }
 0x272   :  { %5868 = vst [vmem:[#allocation83_spill] sm:$0xff] %v4409_v3  ;;  %5869 = vst [vmem:[#allocation84_spill] sm:$0xff] %v4413_v22  ;;  %v4465_v46 = vadd.f32 %v3771_v16, %v4073_v9  ;;  %v4469_v31 = vadd.f32 %v3771_v16, %v4077_v24  ;;  %v5938_v22 = vld [vmem:[#allocation65_spill] sm:$0xff]  ;;  %v4610_v49 = vmul.f32 0.2, %v5946_v2 }
 0x273   :  { %5870 = vst [vmem:[#allocation85_spill] sm:$0xff] %v4417_v27  ;;  %5871 = vst [vmem:[#allocation86_spill] sm:$0xff] %v4421_v18  ;;  %v5936_v18 = vld [vmem:[#allocation58_spill] sm:$0xff] }
 0x274   :  { %5872 = vst [vmem:[#allocation87_spill] sm:$0xff] %v4425_v23  ;;  %5873 = vst [vmem:[#allocation88_spill] sm:$0xff] %v4429_v42  ;;  %v5932_v42 = vld [vmem:[#allocation59_spill] sm:$0xff]  ;;  %v4588_v27 = vmul.f32 0.2, %v5936_v18 }
 0x275   :  { %5874 = vst [vmem:[#allocation89_spill] sm:$0xff] %v4433_v47  ;;  %5875 = vst [vmem:[#allocation90_spill] sm:$0xff] %v4437_v38  ;;  %v5930_v38 = vld [vmem:[#allocation57_spill] sm:$0xff]  ;;  %v4739_v18 = vmul.f32 0.2, %v4369_v12 }
 0x276   :  { %5876 = vst [vmem:[#allocation91_spill] sm:$0xff] %v4441_v43  ;;  %5877 = vst [vmem:[#allocation92_spill] sm:$0xff] %v4445_v5  ;;  %v5928_v5 = vld [vmem:[#allocation51_spill] sm:$0xff]  ;;  %v4577_v47 = vmul.f32 0.2, %v5930_v38 }
 0x277   :  { %5878 = vst [vmem:[#allocation93_spill] sm:$0xff] %v4449_v13  ;;  %5879 = vst [vmem:[#allocation94_spill] sm:$0xff] %v4453_v63  ;;  %v5884_v13 = vld [vmem:[#allocation43_spill] sm:$0xff]  ;;  %v5886_v63 = vld [vmem:[#allocation45_spill] sm:$0xff]  ;;  %v4574_v43 = vmul.f32 0.2, %v5928_v5 }
 0x278   :  { %5880 = vst [vmem:[#allocation95_spill] sm:$0xff] %v4457_v6  ;;  %5881 = vst [vmem:[#allocation96_spill] sm:$0xff] %v4461_v39  ;;  %v4473_v40 = vadd.f32 %v3771_v16, %v5884_v13  ;;  %v4477_v20 = vadd.f32 %v3771_v16, %v5886_v63  ;;  %v5888_v6 = vld [vmem:[#allocation48_spill] sm:$0xff]  ;;  %v5890_v39 = vld [vmem:[#allocation50_spill] sm:$0xff]  ;;  %v4695_v5 = vmul.f32 0.2, %v4321_v61 }
 0x279   :  { %5882 = vst [vmem:[#allocation97_spill] sm:$0xff] %v4465_v46  ;;  %5883 = vst [vmem:[#allocation98_spill] sm:$0xff] %v4469_v31  ;;  %v4481_v34 = vadd.f32 %v3771_v16, %v5888_v6  ;;  %v4485_v9 = vadd.f32 %v3771_v16, %v5890_v39  ;;  %v5892_v46 = vld [vmem:[#allocation47_spill] sm:$0xff]  ;;  %v5894_v31 = vld [vmem:[#allocation49_spill] sm:$0xff]  ;;  %v4706_v38 = vmul.f32 0.2, %v4333_v37 }
 0x27a   :  { %5885 = vst [vmem:[#allocation43_spill] sm:$0xff] %v4473_v40  ;;  %5887 = vst [vmem:[#allocation45_spill] sm:$0xff] %v4477_v20  ;;  %v4489_v24 = vadd.f32 %v3771_v16, %v5892_v46  ;;  %v4493_v13 = vadd.f32 %v3771_v16, %v5894_v31  ;;  %v5896_v40 = vld [vmem:[#allocation53_spill] sm:$0xff]  ;;  %v5898_v20 = vld [vmem:[#allocation55_spill] sm:$0xff]  ;;  %v4513_v31 = vadd.f32 %v3771_v16, %v4121_v35 }
 0x27b   :  { %5889 = vst [vmem:[#allocation48_spill] sm:$0xff] %v4481_v34  ;;  %5891 = vst [vmem:[#allocation50_spill] sm:$0xff] %v4485_v9  ;;  %v4497_v63 = vadd.f32 %v3771_v16, %v5896_v40  ;;  %v4501_v6 = vadd.f32 %v3771_v16, %v5898_v20  ;;  %v5900_v34 = vld [vmem:[#allocation52_spill] sm:$0xff]  ;;  %v5902_v9 = vld [vmem:[#allocation54_spill] sm:$0xff]  ;;  %v4517_v40 = vadd.f32 %v3771_v16, %v4125_v26 }
 0x27c   :  { %5893 = vst [vmem:[#allocation47_spill] sm:$0xff] %v4489_v24  ;;  %5895 = vst [vmem:[#allocation49_spill] sm:$0xff] %v4493_v13  ;;  %v4505_v39 = vadd.f32 %v3771_v16, %v5900_v34  ;;  %v4509_v46 = vadd.f32 %v3771_v16, %v5902_v9  ;;  %v4521_v20 = vadd.f32 %v3771_v16, %v4129_v48  ;;  %v4543_v48 = vmul.f32 0.2, %v4153_v0  ;;  %v5940_v0 = vld [vmem:[#allocation67_spill] sm:$0xff]  ;;  %v6001_v15 = vld [vmem:[#allocation82_spill] sm:$0xff] }
 0x27d   :  { %5897 = vst [vmem:[#allocation53_spill] sm:$0xff] %v4497_v63  ;;  %5899 = vst [vmem:[#allocation55_spill] sm:$0xff] %v4501_v6  ;;  %v4525_v34 = vadd.f32 %v3771_v16, %v4133_v11  ;;  %v4529_v9 = vadd.f32 %v3771_v16, %v4137_v33  ;;  %v4533_v35 = vadd.f32 %v3771_v16, %v4141_v41  ;;  %v4546_v11 = vmul.f32 0.2, %v4157_v55  ;;  %v5918_v41 = vld [vmem:[#allocation71_spill] sm:$0xff]  ;;  %v5944_v55 = vld [vmem:[#allocation72_spill] sm:$0xff] }
 0x27e   :  { %5901 = vst [vmem:[#allocation52_spill] sm:$0xff] %v4505_v39  ;;  %5903 = vst [vmem:[#allocation54_spill] sm:$0xff] %v4509_v46  ;;  %v4537_v26 = vadd.f32 %v3771_v16, %v4145_v4  ;;  %v5920_v16 = vld [vmem:[#allocation68_spill] sm:$0xff]  ;;  %v5924_v39 = vld [vmem:[#allocation74_spill] sm:$0xff]  ;;  %v4591_v24 = vmul.f32 0.2, %v5938_v22 }
 0x27f   :  { %5904 = vst [vmem:[#allocation99_spill] sm:$0xff] %v4513_v31  ;;  %5905 = vst [vmem:[#allocation100_spill] sm:$0xff] %v4517_v40  ;;  %v4540_v40 = vmul.f32 0.2, %v4149_v25  ;;  %v4558_v4 = vmul.f32 0.2, %v5920_v16 }
 0x280   :  { %5906 = vst [vmem:[#allocation101_spill] sm:$0xff] %v4521_v20  ;;  %5907 = vst [vmem:[#allocation102_spill] sm:$0xff] %v4525_v34  ;;  %v5914_v34 = vld [vmem:[#allocation62_spill] sm:$0xff]  ;;  %v4566_v6 = vmul.f32 0.2, %v5924_v39  ;;  %v5926_v63 = vld [vmem:[#allocation75_spill] sm:$0xff] }
 0x281   :  { %5908 = vst [vmem:[#allocation103_spill] sm:$0xff] %v4529_v9  ;;  %5909 = vst [vmem:[#allocation104_spill] sm:$0xff] %v4533_v35  ;;  %v4549_v33 = vmul.f32 0.2, %v5914_v34  ;;  %v5916_v9 = vld [vmem:[#allocation69_spill] sm:$0xff]  ;;  %v5922_v31 = vld [vmem:[#allocation70_spill] sm:$0xff] }
 0x282   :  { %5910 = vst [vmem:[#allocation105_spill] sm:$0xff] %v4537_v26  ;;  %5911 = vst [vmem:[#allocation106_spill] sm:$0xff] %v4540_v40  ;;  %v4552_v20 = vmul.f32 0.2, %v5916_v9  ;;  %v4555_v35 = vmul.f32 0.2, %v5918_v41 }
 0x283   :  { %5912 = vst [vmem:[#allocation107_spill] sm:$0xff] %v4543_v48  ;;  %5913 = vst [vmem:[#allocation108_spill] sm:$0xff] %v4546_v11  ;;  %v4563_v46 = vmul.f32 0.2, %v5922_v31  ;;  %v4569_v13 = vmul.f32 0.2, %v5926_v63 }
 0x284   :  { %5915 = vst [vmem:[#allocation109_spill] sm:$0xff] %v4549_v33  ;;  %5917 = vst [vmem:[#allocation110_spill] sm:$0xff] %v4552_v20  ;;  %v4580_v26 = vmul.f32 0.2, %v5932_v42  ;;  %v5934_v25 = vld [vmem:[#allocation56_spill] sm:$0xff]  ;;  %v5960_v41 = vld [vmem:[#allocation21_spill] sm:$0xff] }
 0x285   :  { %5919 = vst [vmem:[#allocation111_spill] sm:$0xff] %v4555_v35  ;;  %5921 = vst [vmem:[#allocation112_spill] sm:$0xff] %v4558_v4  ;;  %v4585_v23 = vmul.f32 0.2, %v5934_v25  ;;  %v4596_v3 = vmul.f32 0.2, %v5940_v0 }
 0x286   :  { %5923 = vst [vmem:[#allocation113_spill] sm:$0xff] %v4563_v46  ;;  %5925 = vst [vmem:[#allocation114_spill] sm:$0xff] %v4566_v6  ;;  %v4602_v40 = vmul.f32 0.2, %v4221_v54  ;;  %v4607_v7 = vmul.f32 0.2, %v5944_v55 }
 0x287   :  { %5927 = vst [vmem:[#allocation115_spill] sm:$0xff] %v4569_v13  ;;  %5929 = vst [vmem:[#allocation116_spill] sm:$0xff] %v4574_v43  ;;  %v4613_v48 = vmul.f32 0.2, %v5948_v10  ;;  %v4618_v34 = vmul.f32 0.2, %v4237_v14 }
 0x288   :  { %5931 = vst [vmem:[#allocation117_spill] sm:$0xff] %v4577_v47  ;;  %5933 = vst [vmem:[#allocation118_spill] sm:$0xff] %v4580_v26  ;;  %v5951_v54 = vld [vmem:[#allocation15_spill] sm:$0xff]  ;;  %v4624_v11 = vmul.f32 0.2, %v4245_v21  ;;  %v5954_v9 = vld [vmem:[#allocation20_spill] sm:$0xff] }
 0x289   :  { %5935 = vst [vmem:[#allocation119_spill] sm:$0xff] %v4585_v23  ;;  %5937 = vst [vmem:[#allocation120_spill] sm:$0xff] %v4588_v27  ;;  %v4629_v2 = vmul.f32 0.2, %v5954_v9  ;;  %v5956_v10 = vld [vmem:[#allocation22_spill] sm:$0xff]  ;;  %v5962_v21 = vld [vmem:[#allocation24_spill] sm:$0xff] }
 0x28a   :  { %5939 = vst [vmem:[#allocation121_spill] sm:$0xff] %v4591_v24  ;;  %5941 = vst [vmem:[#allocation122_spill] sm:$0xff] %v4596_v3  ;;  %v4646_v20 = vmul.f32 0.2, %v4269_v17  ;;  %v5965_v16 = vld [vmem:[#allocation23_spill] sm:$0xff]  ;;  %v5969_v31 = vld [vmem:[#allocation30_spill] sm:$0xff] }
 0x28b   :  { %5942 = vst [vmem:[#allocation123_spill] sm:$0xff] %v4599_v62  ;;  %5943 = vst [vmem:[#allocation124_spill] sm:$0xff] %v4602_v40  ;;  %v4621_v40 = vmul.f32 0.2, %v5951_v54  ;;  %v4640_v54 = vmul.f32 0.2, %v5960_v41 }
 0x28c   :  { %5945 = vst [vmem:[#allocation125_spill] sm:$0xff] %v4607_v7  ;;  %5947 = vst [vmem:[#allocation126_spill] sm:$0xff] %v4610_v49  ;;  %v5958_v49 = vld [vmem:[#allocation19_spill] sm:$0xff]  ;;  %v5973_v39 = vld [vmem:[#allocation32_spill] sm:$0xff]  ;;  %v4679_v46 = vmul.f32 0.2, %v4305_v44 }
 0x28d   :  { %5949 = vst [vmem:[#allocation127_spill] sm:$0xff] %v4613_v48  ;;  %5950 = vst [vmem:[#allocation128_spill] sm:$0xff] %v4618_v34  ;;  %v4632_v48 = vmul.f32 0.2, %v5956_v10  ;;  %v4635_v33 = vmul.f32 0.2, %v5958_v49 }
 0x28e   :  { %5952 = vst [vmem:[#allocation129_spill] sm:$0xff] %v4621_v40  ;;  %5953 = vst [vmem:[#allocation130_spill] sm:$0xff] %v4624_v11  ;;  %v4643_v11 = vmul.f32 0.2, %v5962_v21  ;;  %v4651_v10 = vmul.f32 0.2, %v5965_v16 }
 0x28f   :  { %5955 = vst [vmem:[#allocation131_spill] sm:$0xff] %v4629_v2  ;;  %5957 = vst [vmem:[#allocation132_spill] sm:$0xff] %v4632_v48  ;;  %v5966_v49 = vld [vmem:[#allocation25_spill] sm:$0xff]  ;;  %v5968_v48 = vld [vmem:[#allocation28_spill] sm:$0xff]  ;;  %v4662_v21 = vmul.f32 0.2, %v5969_v31 }
 0x290   :  { %5959 = vst [vmem:[#allocation133_spill] sm:$0xff] %v4635_v33  ;;  %5961 = vst [vmem:[#allocation134_spill] sm:$0xff] %v4640_v54  ;;  %v4654_v33 = vmul.f32 0.2, %v5966_v49  ;;  %v4657_v35 = vmul.f32 0.2, %v5968_v48 }
 0x291   :  { %5963 = vst [vmem:[#allocation135_spill] sm:$0xff] %v4643_v11  ;;  %5964 = vst [vmem:[#allocation136_spill] sm:$0xff] %v4646_v20  ;;  %v5970_v17 = vld [vmem:[#allocation27_spill] sm:$0xff]  ;;  %v5972_v11 = vld [vmem:[#allocation29_spill] sm:$0xff]  ;;  %v4673_v49 = vmul.f32 0.2, %v5973_v39 }
 0x292   :  { %5967 = vst [vmem:[#allocation23_spill] sm:$0xff] %v4654_v33  ;;  %v4665_v20 = vmul.f32 0.2, %v5970_v17  ;;  %v4668_v4 = vmul.f32 0.2, %v5972_v11  ;;  %5977 = vst [vmem:[#allocation138_spill] sm:$0xff] %v4706_v38 }
 0x293   :  { %v4676_v48 = vmul.f32 0.2, %v4301_v60  ;;  %v4684_v63 = vmul.f32 0.2, %v4309_v32  ;;  %v4687_v11 = vmul.f32 0.2, %v4313_v8 }
 0x294   :  { %5971 = vst [vmem:[#allocation30_spill] sm:$0xff] %v4665_v20  ;;  %v4690_v6 = vmul.f32 0.2, %v4317_v58  ;;  %v4698_v44 = vmul.f32 0.2, %v4325_v29  ;;  %5986 = vst [vmem:[#allocation147_spill] sm:$0xff] %v4739_v18 }
 0x295   :  { %5974 = vst [vmem:[#allocation27_spill] sm:$0xff] %v4676_v48  ;;  %5975 = vst [vmem:[#allocation32_spill] sm:$0xff] %v4687_v11  ;;  %v4701_v13 = vmul.f32 0.2, %v4329_v50  ;;  %v4709_v58 = vmul.f32 0.2, %v4337_v28 }
 0x296   :  { %5976 = vst [vmem:[#allocation137_spill] sm:$0xff] %v4698_v44  ;;  %v4712_v43 = vmul.f32 0.2, %v4341_v30  ;;  %v4717_v42 = vmul.f32 0.2, %v4345_v36  ;;  %v5999_v18 = vld [vmem:[#allocation81_spill] sm:$0xff] }
 0x297   :  { %5978 = vst [vmem:[#allocation139_spill] sm:$0xff] %v4709_v58  ;;  %v4720_v50 = vmul.f32 0.2, %v4349_v45  ;;  %v4723_v47 = vmul.f32 0.2, %v4353_v1  ;;  %v6023_v0 = vld [vmem:[#allocation91_spill] sm:$0xff] }
 0x298   :  { %5979 = vst [vmem:[#allocation140_spill] sm:$0xff] %v4712_v43  ;;  %5980 = vst [vmem:[#allocation141_spill] sm:$0xff] %v4717_v42  ;;  %v4728_v25 = vmul.f32 0.2, %v4357_v59  ;;  %v4731_v30 = vmul.f32 0.2, %v4361_v53 }
 0x299   :  { %5981 = vst [vmem:[#allocation142_spill] sm:$0xff] %v4720_v50  ;;  %5982 = vst [vmem:[#allocation143_spill] sm:$0xff] %v4723_v47  ;;  %v4734_v26 = vmul.f32 0.2, %v4365_v52  ;;  %v4742_v1 = vmul.f32 0.2, %v4373_v19 }
 0x29a   :  { %5983 = vst [vmem:[#allocation144_spill] sm:$0xff] %v4728_v25  ;;  %5984 = vst [vmem:[#allocation145_spill] sm:$0xff] %v4731_v30  ;;  %v4745_v23 = vmul.f32 0.2, %v4377_v51  ;;  %v4750_v22 = vmul.f32 0.2, %v4381_v56 }
 0x29b   :  { %5985 = vst [vmem:[#allocation146_spill] sm:$0xff] %v4734_v26  ;;  %5987 = vst [vmem:[#allocation148_spill] sm:$0xff] %v4742_v1  ;;  %v4753_v52 = vmul.f32 0.2, %v4385_v57  ;;  %v5991_v26 = vld [vmem:[#allocation78_spill] sm:$0xff]  ;;  %v5995_v19 = vld [vmem:[#allocation79_spill] sm:$0xff] }
 0x29c   :  { %5988 = vst [vmem:[#allocation149_spill] sm:$0xff] %v4745_v23  ;;  %5989 = vst [vmem:[#allocation150_spill] sm:$0xff] %v4750_v22  ;;  %v4756_v27 = vmul.f32 0.2, %v5991_v26  ;;  %v4761_v1 = vmul.f32 0.2, %v5995_v19 }
 0x29d   :  { %5990 = vst [vmem:[#allocation151_spill] sm:$0xff] %v4753_v52  ;;  %v5997_v51 = vld [vmem:[#allocation80_spill] sm:$0xff]  ;;  %v4767_v24 = vmul.f32 0.2, %v5999_v18  ;;  %v4772_v57 = vmul.f32 0.2, %v6001_v15 }
 0x29e   :  { %5992 = vst [vmem:[#allocation152_spill] sm:$0xff] %v4756_v27  ;;  %5996 = vst [vmem:[#allocation153_spill] sm:$0xff] %v4761_v1  ;;  %v4764_v23 = vmul.f32 0.2, %v5997_v51  ;;  %v6003_v26 = vld [vmem:[#allocation83_spill] sm:$0xff]  ;;  %v6005_v52 = vld [vmem:[#allocation84_spill] sm:$0xff] }
 0x29f   :  { %6000 = vst [vmem:[#allocation155_spill] sm:$0xff] %v4767_v24  ;;  %6002 = vst [vmem:[#allocation156_spill] sm:$0xff] %v4772_v57  ;;  %v4775_v27 = vmul.f32 0.2, %v6003_v26  ;;  %v4778_v12 = vmul.f32 0.2, %v6005_v52 }
 0x2a0   :  { %5998 = vst [vmem:[#allocation154_spill] sm:$0xff] %v4764_v23  ;;  %v6009_v51 = vld [vmem:[#allocation85_spill] sm:$0xff]  ;;  %v6011_v18 = vld [vmem:[#allocation86_spill] sm:$0xff]  ;;  %v6013_v1 = vld [vmem:[#allocation87_spill] sm:$0xff] }
 0x2a1   :  { %6004 = vst [vmem:[#allocation157_spill] sm:$0xff] %v4775_v27  ;;  %6006 = vst [vmem:[#allocation158_spill] sm:$0xff] %v4778_v12  ;;  %v4783_v23 = vmul.f32 0.2, %v6009_v51  ;;  %v4786_v24 = vmul.f32 0.2, %v6011_v18 }
 0x2a2   :  { %v4789_v62 = vmul.f32 0.2, %v6013_v1  ;;  %v6017_v26 = vld [vmem:[#allocation88_spill] sm:$0xff]  ;;  %v6019_v52 = vld [vmem:[#allocation89_spill] sm:$0xff]  ;;  %v6021_v57 = vld [vmem:[#allocation90_spill] sm:$0xff] }
 0x2a3   :  { %6010 = vst [vmem:[#allocation159_spill] sm:$0xff] %v4783_v23  ;;  %6012 = vst [vmem:[#allocation160_spill] sm:$0xff] %v4786_v24  ;;  %v4794_v27 = vmul.f32 0.2, %v6017_v26  ;;  %v4797_v12 = vmul.f32 0.2, %v6019_v52 }
 0x2a4   :  { %6014 = vst [vmem:[#allocation161_spill] sm:$0xff] %v4789_v62  ;;  %v4800_v19 = vmul.f32 0.2, %v6021_v57  ;;  %v4805_v18 = vmul.f32 0.2, %v6023_v0  ;;  %v6025_v1 = vld [vmem:[#allocation92_spill] sm:$0xff] }
 0x2a5   :  { %6018 = vst [vmem:[#allocation162_spill] sm:$0xff] %v4794_v27  ;;  %6020 = vst [vmem:[#allocation163_spill] sm:$0xff] %v4797_v12  ;;  %v4808_v62 = vmul.f32 0.2, %v6025_v1  ;;  %v6027_v24 = vld [vmem:[#allocation93_spill] sm:$0xff]  ;;  %v6030_v52 = vld [vmem:[#allocation94_spill] sm:$0xff] }
 0x2a6   :  { %6022 = vst [vmem:[#allocation164_spill] sm:$0xff] %v4800_v19  ;;  %6024 = vst [vmem:[#allocation165_spill] sm:$0xff] %v4805_v18  ;;  %v4811_v15 = vmul.f32 0.2, %v6027_v24  ;;  %v4816_v12 = vmul.f32 0.2, %v6030_v52 }
 0x2a7   :  { %6026 = vst [vmem:[#allocation166_spill] sm:$0xff] %v4808_v62  ;;  %v6032_v57 = vld [vmem:[#allocation95_spill] sm:$0xff]  ;;  %v6034_v26 = vld [vmem:[#allocation96_spill] sm:$0xff]  ;;  %v6038_v1 = vld [vmem:[#allocation97_spill] sm:$0xff] }
 0x2a8   :  { %6028 = vst [vmem:[#allocation167_spill] sm:$0xff] %v4811_v15  ;;  %6031 = vst [vmem:[#allocation168_spill] sm:$0xff] %v4816_v12  ;;  %v4819_v19 = vmul.f32 0.2, %v6032_v57  ;;  %v4822_v3 = vmul.f32 0.2, %v6034_v26 }
 0x2a9   :  { %v4827_v62 = vmul.f32 0.2, %v6038_v1  ;;  %v6040_v24 = vld [vmem:[#allocation98_spill] sm:$0xff]  ;;  %v6042_v18 = vld [vmem:[#allocation43_spill] sm:$0xff]  ;;  %v6044_v7 = vld [vmem:[#allocation45_spill] sm:$0xff] }
 0x2aa   :  { %6033 = vst [vmem:[#allocation169_spill] sm:$0xff] %v4819_v19  ;;  %6035 = vst [vmem:[#allocation170_spill] sm:$0xff] %v4822_v3  ;;  %v4830_v15 = vmul.f32 0.2, %v6040_v24  ;;  %v4833_v55 = vmul.f32 0.2, %v6042_v18 }
 0x2ab   :  { %6039 = vst [vmem:[#allocation171_spill] sm:$0xff] %v4827_v62  ;;  %v4838_v57 = vmul.f32 0.2, %v6044_v7  ;;  %v6046_v26 = vld [vmem:[#allocation48_spill] sm:$0xff]  ;;  %v6048_v19 = vld [vmem:[#allocation50_spill] sm:$0xff]  ;;  %v6052_v24 = vld [vmem:[#allocation47_spill] sm:$0xff] }
 0x2ac   :  { %6041 = vst [vmem:[#allocation172_spill] sm:$0xff] %v4830_v15  ;;  %6043 = vst [vmem:[#allocation173_spill] sm:$0xff] %v4833_v55  ;;  %v4841_v3 = vmul.f32 0.2, %v6046_v26  ;;  %v4844_v0 = vmul.f32 0.2, %v6048_v19 }
 0x2ad   :  { %6045 = vst [vmem:[#allocation174_spill] sm:$0xff] %v4838_v57  ;;  %v4849_v15 = vmul.f32 0.2, %v6052_v24  ;;  %v6054_v18 = vld [vmem:[#allocation49_spill] sm:$0xff]  ;;  %v6060_v26 = vld [vmem:[#allocation55_spill] sm:$0xff]  ;;  %v6062_v19 = vld [vmem:[#allocation52_spill] sm:$0xff] }
 0x2ae   :  { %6047 = vst [vmem:[#allocation175_spill] sm:$0xff] %v4841_v3  ;;  %6049 = vst [vmem:[#allocation176_spill] sm:$0xff] %v4844_v0  ;;  %v4852_v55 = vmul.f32 0.2, %v6054_v18  ;;  %v6056_v62 = vld [vmem:[#allocation53_spill] sm:$0xff]  ;;  %v6064_v57 = vld [vmem:[#allocation54_spill] sm:$0xff] }
 0x2af   :  { %6053 = vst [vmem:[#allocation47_spill] sm:$0xff] %v4849_v15  ;;  %v4855_v40 = vmul.f32 0.2, %v6056_v62  ;;  %v4860_v3 = vmul.f32 0.2, %v6060_v26  ;;  %v6066_v14 = vld [vmem:[#allocation99_spill] sm:$0xff] }
 0x2b0   :  { %6055 = vst [vmem:[#allocation177_spill] sm:$0xff] %v4852_v55  ;;  %v4863_v0 = vmul.f32 0.2, %v6062_v19  ;;  %v4866_v1 = vmul.f32 0.2, %v6064_v57  ;;  %v6068_v62 = vld [vmem:[#allocation100_spill] sm:$0xff] }
 0x2b1   :  { %6057 = vst [vmem:[#allocation178_spill] sm:$0xff] %v4855_v40  ;;  %6061 = vst [vmem:[#allocation179_spill] sm:$0xff] %v4860_v3  ;;  %v4871_v18 = vmul.f32 0.2, %v6066_v14  ;;  %v4874_v40 = vmul.f32 0.2, %v6068_v62 }
 0x2b2   :  { %6063 = vst [vmem:[#allocation180_spill] sm:$0xff] %v4863_v0  ;;  %6065 = vst [vmem:[#allocation181_spill] sm:$0xff] %v4866_v1  ;;  %v6070_v55 = vld [vmem:[#allocation101_spill] sm:$0xff]  ;;  %v6074_v19 = vld [vmem:[#allocation102_spill] sm:$0xff] }
 0x2b3   :  { %6067 = vst [vmem:[#allocation182_spill] sm:$0xff] %v4871_v18  ;;  %6069 = vst [vmem:[#allocation183_spill] sm:$0xff] %v4874_v40  ;;  %v4877_v7 = vmul.f32 0.2, %v6070_v55  ;;  %v4882_v0 = vmul.f32 0.2, %v6074_v19 }
 0x2b4   :  { %v6076_v57 = vld [vmem:[#allocation103_spill] sm:$0xff]  ;;  %v6078_v3 = vld [vmem:[#allocation104_spill] sm:$0xff]  ;;  %v6082_v62 = vld [vmem:[#allocation105_spill] sm:$0xff] }
 0x2b5   :  { %6071 = vst [vmem:[#allocation184_spill] sm:$0xff] %v4877_v7  ;;  %6075 = vst [vmem:[#allocation185_spill] sm:$0xff] %v4882_v0  ;;  %v4885_v1 = vmul.f32 0.2, %v6076_v57  ;;  %v4888_v34 = vmul.f32 0.2, %v6078_v3 }
 0x2b6   :  { %v4893_v40 = vmul.f32 0.2, %v6082_v62  ;;  %v6084_v26 = vld [vmem:[#allocation25_spill] sm:$0xff]  ;;  %v6085_v9 = vld [vmem:[#allocation28_spill] sm:$0xff]  ;;  %v6087_v2 = vld [vmem:[#allocation34_spill] sm:$0xff] }
 0x2b7   :  { %6077 = vst [vmem:[#allocation186_spill] sm:$0xff] %v4885_v1  ;;  %6079 = vst [vmem:[#allocation187_spill] sm:$0xff] %v4888_v34  ;;  %v6086_v14 = vld [vmem:[#allocation29_spill] sm:$0xff]  ;;  %v6088_v3 = vld [vmem:[#allocation31_spill] sm:$0xff] }
 0x2b8   :  { %6083 = vst [vmem:[#allocation188_spill] sm:$0xff] %v4893_v40  ;;  %v6089_v55 = vld [vmem:[#allocation33_spill] sm:$0xff]  ;;  %v6103_v33 = vld [vmem:[#allocation78_spill] sm:$0xff]  ;;  %v6107_v43 = vld [vmem:[#allocation80_spill] sm:$0xff] }
 0x2b9   :  { %v6091_v41 = vld [vmem:[#allocation37_spill] sm:$0xff]  ;;  %v6117_v38 = vld [vmem:[#allocation86_spill] sm:$0xff]  ;;  %v6119_v28 = vld [vmem:[#allocation87_spill] sm:$0xff] }
 0x2ba   :  { %v6101_v48 = vld [vmem:[#allocation77_spill] sm:$0xff]  ;;  %v6132_v11 = vld [vmem:[#allocation95_spill] sm:$0xff]  ;;  %v6134_v20 = vld [vmem:[#allocation96_spill] sm:$0xff] }
 0x2bb   :  { %v6144_v19 = vld [vmem:[#allocation48_spill] sm:$0xff]  ;;  %v6164_v59 = vld [vmem:[#allocation61_spill] sm:$0xff]  ;;  %v6165_v52 = vld [vmem:[#allocation106_spill] sm:$0xff] }
 0x2bc   :  { %v6166_v18 = vmax.f32 %v6164_v59, %v6165_v52  ;;  %v6167_v58 = vld [vmem:[#allocation63_spill] sm:$0xff]  ;;  %v6170_v57 = vld [vmem:[#allocation60_spill] sm:$0xff]  ;;  %v6173_v54 = vld [vmem:[#allocation62_spill] sm:$0xff] }
 0x2bd   :  { %v6168_v15 = vld [vmem:[#allocation107_spill] sm:$0xff]  ;;  %v6171_v7 = vld [vmem:[#allocation108_spill] sm:$0xff]  ;;  %v6174_v0 = vld [vmem:[#allocation109_spill] sm:$0xff] }
 0x2be   :  { %v6169_v27 = vmax.f32 %v6167_v58, %v6168_v15  ;;  %v6172_v36 = vmax.f32 %v6170_v57, %v6171_v7  ;;  %v6175_v22 = vmax.f32 %v6173_v54, %v6174_v0  ;;  %v6176_v1 = vld [vmem:[#allocation69_spill] sm:$0xff]  ;;  %v6177_v47 = vld [vmem:[#allocation110_spill] sm:$0xff]  ;;  %v6179_v34 = vld [vmem:[#allocation71_spill] sm:$0xff] }
 0x2bf   :  { %v6178_v23 = vmax.f32 %v6176_v1, %v6177_v47  ;;  %v6180_v30 = vld [vmem:[#allocation111_spill] sm:$0xff]  ;;  %v6182_v62 = vld [vmem:[#allocation68_spill] sm:$0xff]  ;;  %v6185_v12 = vld [vmem:[#allocation70_spill] sm:$0xff] }
 0x2c0   :  { %v2481_v42 = vpack.c.bf16 %v6169_v27, %v6166_v18  ;;  %v2486_v56 = vpack.c.bf16 %v6175_v22, %v6172_v36  ;;  %v6181_v53 = vmax.f32 %v6179_v34, %v6180_v30  ;;  %v6183_v59 = vld [vmem:[#allocation112_spill] sm:$0xff]  ;;  %v6186_v15 = vld [vmem:[#allocation113_spill] sm:$0xff]  ;;  %v6188_v18 = vld [vmem:[#allocation74_spill] sm:$0xff] }
 0x2c1   :  { %v6184_v52 = vmax.f32 %v6182_v62, %v6183_v59  ;;  %v6187_v58 = vmax.f32 %v6185_v12, %v6186_v15  ;;  %v6189_v57 = vld [vmem:[#allocation114_spill] sm:$0xff]  ;;  %v6191_v51 = vld [vmem:[#allocation75_spill] sm:$0xff]  ;;  %v6195_v1 = vld [vmem:[#allocation116_spill] sm:$0xff] }
 0x2c2   :  { %v2491_v40 = vpack.c.bf16 %v6181_v53, %v6178_v23  ;;  %v6190_v7 = vmax.f32 %v6188_v18, %v6189_v57  ;;  %v6192_v0 = vld [vmem:[#allocation115_spill] sm:$0xff]  ;;  %v6197_v25 = vld [vmem:[#allocation57_spill] sm:$0xff]  ;;  %v6201_v62 = vld [vmem:[#allocation118_spill] sm:$0xff]  ;;  %2482 = vst [vmem:[#allocation10] sm:$0xff] %v2481_v42  }
 0x2c3   :  { %v2496_v27 = vpack.c.bf16 %v6187_v58, %v6184_v52  ;;  %v6193_v54 = vmax.f32 %v6191_v51, %v6192_v0  ;;  %v6194_v22 = vld [vmem:[#allocation51_spill] sm:$0xff]  ;;  %v6198_v30 = vld [vmem:[#allocation117_spill] sm:$0xff]  ;;  %v6203_v44 = vld [vmem:[#allocation56_spill] sm:$0xff]  ;;  %2728 = vst [vmem:[#allocation10 + $0x8] sm:$0xff] %v2486_v56  }
 0x2c4   :  { %v6196_v47 = vmax.f32 %v6194_v22, %v6195_v1  ;;  %v6199_v53 = vmax.f32 %v6197_v25, %v6198_v30  ;;  %v6200_v34 = vld [vmem:[#allocation59_spill] sm:$0xff]  ;;  %v6206_v58 = vld [vmem:[#allocation58_spill] sm:$0xff]  ;;  %v6207_v18 = vld [vmem:[#allocation120_spill] sm:$0xff]  ;;  %2729 = vst [vmem:[#allocation10 + $0x10] sm:$0xff] %v2491_v40  }
 0x2c5   :  { %v2501_v36 = vpack.c.bf16 %v6193_v54, %v6190_v7  ;;  %v6202_v59 = vmax.f32 %v6200_v34, %v6201_v62  ;;  %v6204_v12 = vld [vmem:[#allocation119_spill] sm:$0xff]  ;;  %v6208_v57 = vmax.f32 %v6206_v58, %v6207_v18  ;;  %v6209_v50 = vld [vmem:[#allocation65_spill] sm:$0xff]  ;;  %2730 = vst [vmem:[#allocation10 + $0x18] sm:$0xff] %v2496_v27   ;;  %v6213_v54 = vld [vmem:[#allocation122_spill] sm:$0xff] }
 0x2c6   :  { %v2506_v23 = vpack.c.bf16 %v6199_v53, %v6196_v47  ;;  %v6205_v52 = vmax.f32 %v6203_v44, %v6204_v12  ;;  %v6210_v51 = vld [vmem:[#allocation121_spill] sm:$0xff]  ;;  %v6212_v25 = vld [vmem:[#allocation67_spill] sm:$0xff]  ;;  %v6215_v1 = vld [vmem:[#allocation64_spill] sm:$0xff] }
 0x2c7   :  { %v6211_v7 = vmax.f32 %v6209_v50, %v6210_v51  ;;  %v6214_v22 = vmax.f32 %v6212_v25, %v6213_v54  ;;  %v6216_v47 = vld [vmem:[#allocation123_spill] sm:$0xff]  ;;  %v6218_v44 = vld [vmem:[#allocation66_spill] sm:$0xff]  ;;  %v6219_v34 = vld [vmem:[#allocation124_spill] sm:$0xff]  ;;  %2731 = vst [vmem:[#allocation10 + $0x20] sm:$0xff] %v2501_v36  }
 0x2c8   :  { %v2511_v15 = vpack.c.bf16 %v6205_v52, %v6202_v59  ;;  %v6217_v30 = vmax.f32 %v6215_v1, %v6216_v47  ;;  %v6220_v62 = vmax.f32 %v6218_v44, %v6219_v34  ;;  %v6221_v59 = vld [vmem:[#allocation72_spill] sm:$0xff]  ;;  %v6222_v12 = vld [vmem:[#allocation125_spill] sm:$0xff]  ;;  %v6225_v18 = vld [vmem:[#allocation126_spill] sm:$0xff]  ;;  %2732 = vst [vmem:[#allocation10 + $0x28] sm:$0xff] %v2506_v23  }
 0x2c9   :  { %v2516_v0 = vpack.c.bf16 %v6211_v7, %v6208_v57  ;;  %v6223_v52 = vmax.f32 %v6221_v59, %v6222_v12  ;;  %v6224_v50 = vld [vmem:[#allocation73_spill] sm:$0xff]  ;;  %v6227_v56 = vld [vmem:[#allocation16_spill] sm:$0xff]  ;;  %v6228_v40 = vld [vmem:[#allocation127_spill] sm:$0xff] }
 0x2ca   :  { %v2521_v53 = vpack.c.bf16 %v6217_v30, %v6214_v22  ;;  %v6226_v42 = vmax.f32 %v6224_v50, %v6225_v18  ;;  %v6229_v27 = vmax.f32 %v6227_v56, %v6228_v40  ;;  %v6230_v51 = vld [vmem:[#allocation18_spill] sm:$0xff]  ;;  %v6231_v7 = vld [vmem:[#allocation128_spill] sm:$0xff]  ;;  %v6233_v54 = vld [vmem:[#allocation15_spill] sm:$0xff]  ;;  %2733 = vst [vmem:[#allocation10 + $0x30] sm:$0xff] %v2511_v15  }
 0x2cb   :  { %v2526_v58 = vpack.c.bf16 %v6223_v52, %v6220_v62  ;;  %v6232_v25 = vmax.f32 %v6230_v51, %v6231_v7  ;;  %v6234_v1 = vld [vmem:[#allocation129_spill] sm:$0xff]  ;;  %2734 = vst [vmem:[#allocation10 + $0x38] sm:$0xff] %v2516_v0   ;;  %v6237_v44 = vld [vmem:[#allocation130_spill] sm:$0xff]  ;;  %v6239_v62 = vld [vmem:[#allocation20_spill] sm:$0xff] }
 0x2cc   :  { %v2531_v57 = vpack.c.bf16 %v6229_v27, %v6226_v42  ;;  %v6235_v22 = vmax.f32 %v6233_v54, %v6234_v1  ;;  %v6236_v30 = vld [vmem:[#allocation17_spill] sm:$0xff]  ;;  %v6240_v59 = vld [vmem:[#allocation131_spill] sm:$0xff]  ;;  %v6242_v50 = vld [vmem:[#allocation22_spill] sm:$0xff]  ;;  %2735 = vst [vmem:[#allocation10 + $0x40] sm:$0xff] %v2521_v53  }
 0x2cd   :  { %v6238_v34 = vmax.f32 %v6236_v30, %v6237_v44  ;;  %v6241_v12 = vmax.f32 %v6239_v62, %v6240_v59  ;;  %v6243_v18 = vld [vmem:[#allocation132_spill] sm:$0xff]  ;;  %v6245_v56 = vld [vmem:[#allocation19_spill] sm:$0xff]  ;;  %v6246_v40 = vld [vmem:[#allocation133_spill] sm:$0xff]  ;;  %v6257_v44 = vmax.f32 %v5965_v16, %v4651_v10  ;;  %2736 = vst [vmem:[#allocation10 + $0x48] sm:$0xff] %v2526_v58   ;;  %v6264_v10 = vmax.f32 %v6086_v14, %v4668_v4 }
 0x2ce   :  { %v2536_v47 = vpack.c.bf16 %v6235_v22, %v6232_v25  ;;  %v6244_v42 = vmax.f32 %v6242_v50, %v6243_v18  ;;  %v6247_v27 = vmax.f32 %v6245_v56, %v6246_v40  ;;  %v6248_v7 = vld [vmem:[#allocation21_spill] sm:$0xff]  ;;  %v6249_v25 = vld [vmem:[#allocation134_spill] sm:$0xff]  ;;  %v6251_v23 = vld [vmem:[#allocation24_spill] sm:$0xff]  ;;  %2737 = vst [vmem:[#allocation10 + $0x50] sm:$0xff] %v2531_v57   ;;  %v6261_v18 = vmax.f32 %v5969_v31, %v4662_v21 }
 0x2cf   :  { %v2541_v52 = vpack.c.bf16 %v6241_v12, %v6238_v34  ;;  %v6250_v36 = vmax.f32 %v6248_v7, %v6249_v25  ;;  %v6252_v15 = vld [vmem:[#allocation135_spill] sm:$0xff]  ;;  %v6254_v1 = vld [vmem:[#allocation26_spill] sm:$0xff]  ;;  %v6255_v22 = vld [vmem:[#allocation136_spill] sm:$0xff]  ;;  %v6260_v12 = vmax.f32 %v6085_v9, %v4657_v35  ;;  %v6265_v16 = vmax.f32 %v5973_v39, %v4673_v49 }
 0x2d0   :  { %v2546_v51 = vpack.c.bf16 %v6247_v27, %v6244_v42  ;;  %v6253_v0 = vmax.f32 %v6251_v23, %v6252_v15  ;;  %v6256_v30 = vmax.f32 %v6254_v1, %v6255_v22  ;;  %2738 = vst [vmem:[#allocation10 + $0x58] sm:$0xff] %v2536_v47   ;;  %v6258_v62 = vld [vmem:[#allocation23_spill] sm:$0xff]  ;;  %v6262_v42 = vld [vmem:[#allocation30_spill] sm:$0xff]  ;;  %v6268_v9 = vmax.f32 %v6087_v2, %v4679_v46  ;;  %v6270_v14 = vld [vmem:[#allocation32_spill] sm:$0xff] }
 0x2d1   :  { %v6259_v59 = vmax.f32 %v6084_v26, %v6258_v62  ;;  %v6263_v56 = vmax.f32 %v5970_v17, %v6262_v42  ;;  %v2571_v53 = vpack.c.bf16 %v6265_v16, %v6264_v10  ;;  %v6266_v26 = vld [vmem:[#allocation27_spill] sm:$0xff]  ;;  %2739 = vst [vmem:[#allocation10 + $0x60] sm:$0xff] %v2541_v52   ;;  %v6269_v21 = vmax.f32 %v4309_v32, %v4684_v63  ;;  %v6274_v2 = vld [vmem:[#allocation137_spill] sm:$0xff]  ;;  %v6277_v32 = vld [vmem:[#allocation138_spill] sm:$0xff] }
 0x2d2   :  { %v2551_v54 = vpack.c.bf16 %v6253_v0, %v6250_v36  ;;  %v2556_v34 = vpack.c.bf16 %v6257_v44, %v6256_v30  ;;  %v6267_v58 = vmax.f32 %v4301_v60, %v6266_v26  ;;  %2740 = vst [vmem:[#allocation10 + $0x68] sm:$0xff] %v2546_v51   ;;  %v6271_v17 = vmax.f32 %v4313_v8, %v6270_v14  ;;  %v6279_v47 = vld [vmem:[#allocation36_spill] sm:$0xff]  ;;  %v6280_v8 = vld [vmem:[#allocation139_spill] sm:$0xff]  ;;  %v6296_v1 = vld [vmem:[#allocation145_spill] sm:$0xff] }
 0x2d3   :  { %v2561_v50 = vpack.c.bf16 %v6260_v12, %v6259_v59  ;;  %v2566_v40 = vpack.c.bf16 %v6263_v56, %v6261_v18  ;;  %v6272_v49 = vmax.f32 %v6088_v3, %v4690_v6  ;;  %v6273_v60 = vmax.f32 %v4321_v61, %v4695_v5  ;;  %2745 = vst [vmem:[#allocation10 + $0x90] sm:$0xff] %v2571_v53   ;;  %v6282_v61 = vld [vmem:[#allocation38_spill] sm:$0xff]  ;;  %v6283_v3 = vld [vmem:[#allocation140_spill] sm:$0xff]  ;;  %v6285_v6 = vld [vmem:[#allocation35_spill] sm:$0xff] }
 0x2d4   :  { %v2576_v35 = vpack.c.bf16 %v6268_v9, %v6267_v58  ;;  %2741 = vst [vmem:[#allocation10 + $0x70] sm:$0xff] %v2551_v54   ;;  %2742 = vst [vmem:[#allocation10 + $0x78] sm:$0xff] %v2556_v34   ;;  %v2581_v31 = vpack.c.bf16 %v6271_v17, %v6269_v21  ;;  %v6275_v46 = vmax.f32 %v4325_v29, %v6274_v2  ;;  %v6286_v29 = vld [vmem:[#allocation141_spill] sm:$0xff]  ;;  %v6292_v23 = vld [vmem:[#allocation40_spill] sm:$0xff] }
 0x2d5   :  { %v2586_v39 = vpack.c.bf16 %v6273_v60, %v6272_v49  ;;  %v6276_v4 = vmax.f32 %v6089_v55, %v4701_v13  ;;  %v6278_v63 = vmax.f32 %v4333_v37, %v6277_v32  ;;  %v6281_v52 = vmax.f32 %v6279_v47, %v6280_v8  ;;  %2743 = vst [vmem:[#allocation10 + $0x80] sm:$0xff] %v2561_v50   ;;  %v6288_v55 = vld [vmem:[#allocation142_spill] sm:$0xff]  ;;  %v6290_v37 = vld [vmem:[#allocation143_spill] sm:$0xff]  ;;  %v6293_v15 = vld [vmem:[#allocation144_spill] sm:$0xff] }
 0x2d6   :  { %2744 = vst [vmem:[#allocation10 + $0x88] sm:$0xff] %v2566_v40   ;;  %2746 = vst [vmem:[#allocation10 + $0x98] sm:$0xff] %v2576_v35   ;;  %v6284_v5 = vmax.f32 %v6282_v61, %v6283_v3  ;;  %v6287_v51 = vmax.f32 %v6285_v6, %v6286_v29  ;;  %v6289_v13 = vmax.f32 %v4349_v45, %v6288_v55  ;;  %v6295_v54 = vld [vmem:[#allocation42_spill] sm:$0xff]  ;;  %v6298_v44 = vld [vmem:[#allocation39_spill] sm:$0xff] }
 0x2d7   :  { %v2591_v57 = vpack.c.bf16 %v6276_v4, %v6275_v46  ;;  %v2596_v27 = vpack.c.bf16 %v6281_v52, %v6278_v63  ;;  %v6291_v25 = vmax.f32 %v6091_v41, %v6290_v37  ;;  %v6294_v0 = vmax.f32 %v6292_v23, %v6293_v15  ;;  %v6299_v34 = vld [vmem:[#allocation146_spill] sm:$0xff]  ;;  %v6301_v59 = vld [vmem:[#allocation41_spill] sm:$0xff]  ;;  %v6302_v12 = vld [vmem:[#allocation147_spill] sm:$0xff]  ;;  %2747 = vst [vmem:[#allocation10 + $0xa0] sm:$0xff] %v2581_v31  }
 0x2d8   :  { %v2601_v7 = vpack.c.bf16 %v6287_v51, %v6284_v5  ;;  %v6297_v22 = vmax.f32 %v6295_v54, %v6296_v1  ;;  %v6300_v62 = vmax.f32 %v6298_v44, %v6299_v34  ;;  %v6303_v50 = vmax.f32 %v6301_v59, %v6302_v12  ;;  %2748 = vst [vmem:[#allocation10 + $0xa8] sm:$0xff] %v2586_v39   ;;  %v6304_v45 = vld [vmem:[#allocation44_spill] sm:$0xff]  ;;  %v6307_v56 = vld [vmem:[#allocation46_spill] sm:$0xff]  ;;  %v6308_v40 = vld [vmem:[#allocation149_spill] sm:$0xff] }
 0x2d9   :  { %v2606_v36 = vpack.c.bf16 %v6291_v25, %v6289_v13  ;;  %2749 = vst [vmem:[#allocation10 + $0xb0] sm:$0xff] %v2591_v57   ;;  %2750 = vst [vmem:[#allocation10 + $0xb8] sm:$0xff] %v2596_v27   ;;  %v6305_v41 = vld [vmem:[#allocation148_spill] sm:$0xff]  ;;  %v6309_v10 = vmax.f32 %v6307_v56, %v6308_v40  ;;  %v6311_v26 = vld [vmem:[#allocation150_spill] sm:$0xff] }
 0x2da   :  { %v2611_v30 = vpack.c.bf16 %v6297_v22, %v6294_v0  ;;  %v2616_v18 = vpack.c.bf16 %v6303_v50, %v6300_v62  ;;  %v6306_v42 = vmax.f32 %v6304_v45, %v6305_v41  ;;  %v6310_v53 = vld [vmem:[#allocation76_spill] sm:$0xff]  ;;  %v6313_v9 = vld [vmem:[#allocation151_spill] sm:$0xff]  ;;  %v6318_v49 = vld [vmem:[#allocation153_spill] sm:$0xff]  ;;  %2751 = vst [vmem:[#allocation10 + $0xc0] sm:$0xff] %v2601_v7  }
 0x2db   :  { %v6312_v58 = vmax.f32 %v6310_v53, %v6311_v26  ;;  %v6314_v35 = vmax.f32 %v6101_v48, %v6313_v9  ;;  %v6315_v14 = vld [vmem:[#allocation152_spill] sm:$0xff]  ;;  %v6317_v31 = vld [vmem:[#allocation79_spill] sm:$0xff]  ;;  %v6320_v2 = vld [vmem:[#allocation154_spill] sm:$0xff]  ;;  %2752 = vst [vmem:[#allocation10 + $0xc8] sm:$0xff] %v2606_v36  }
 0x2dc   :  { %v2621_v16 = vpack.c.bf16 %v6309_v10, %v6306_v42  ;;  %v6316_v17 = vmax.f32 %v6103_v33, %v6315_v14  ;;  %v6319_v60 = vmax.f32 %v6317_v31, %v6318_v49  ;;  %v6321_v46 = vmax.f32 %v6107_v43, %v6320_v2  ;;  %v6322_v4 = vld [vmem:[#allocation81_spill] sm:$0xff]  ;;  %v6323_v57 = vld [vmem:[#allocation155_spill] sm:$0xff]  ;;  %2753 = vst [vmem:[#allocation10 + $0xd0] sm:$0xff] %v2611_v30   ;;  %v6325_v48 = vld [vmem:[#allocation82_spill] sm:$0xff] }
 0x2dd   :  { %v2626_v21 = vpack.c.bf16 %v6314_v35, %v6312_v58  ;;  %v6324_v32 = vmax.f32 %v6322_v4, %v6323_v57  ;;  %2754 = vst [vmem:[#allocation10 + $0xd8] sm:$0xff] %v2616_v18   ;;  %v6326_v47 = vld [vmem:[#allocation156_spill] sm:$0xff]  ;;  %v6328_v52 = vld [vmem:[#allocation83_spill] sm:$0xff]  ;;  %v6329_v33 = vld [vmem:[#allocation157_spill] sm:$0xff] }
 0x2de   :  { %v2631_v39 = vpack.c.bf16 %v6319_v60, %v6316_v17  ;;  %v6327_v8 = vmax.f32 %v6325_v48, %v6326_v47  ;;  %v6330_v27 = vmax.f32 %v6328_v52, %v6329_v33  ;;  %v6331_v3 = vld [vmem:[#allocation84_spill] sm:$0xff]  ;;  %v6332_v5 = vld [vmem:[#allocation158_spill] sm:$0xff]  ;;  %v6334_v29 = vld [vmem:[#allocation85_spill] sm:$0xff]  ;;  %2755 = vst [vmem:[#allocation10 + $0xe0] sm:$0xff] %v2621_v16  }
 0x2df   :  { %v2636_v63 = vpack.c.bf16 %v6324_v32, %v6321_v46  ;;  %v6333_v6 = vmax.f32 %v6331_v3, %v6332_v5  ;;  %v6335_v43 = vld [vmem:[#allocation159_spill] sm:$0xff]  ;;  %v6337_v13 = vld [vmem:[#allocation160_spill] sm:$0xff]  ;;  %v6339_v37 = vld [vmem:[#allocation161_spill] sm:$0xff]  ;;  %2756 = vst [vmem:[#allocation10 + $0xe8] sm:$0xff] %v2626_v21  }
 0x2e0   :  { %v2641_v61 = vpack.c.bf16 %v6330_v27, %v6327_v8  ;;  %v6336_v51 = vmax.f32 %v6334_v29, %v6335_v43  ;;  %v6338_v7 = vmax.f32 %v6117_v38, %v6337_v13  ;;  %v6340_v25 = vmax.f32 %v6119_v28, %v6339_v37  ;;  %v6341_v23 = vld [vmem:[#allocation88_spill] sm:$0xff]  ;;  %v6342_v15 = vld [vmem:[#allocation162_spill] sm:$0xff]  ;;  %v6344_v54 = vld [vmem:[#allocation89_spill] sm:$0xff]  ;;  %2757 = vst [vmem:[#allocation10 + $0xf0] sm:$0xff] %v2631_v39  }
 0x2e1   :  { %v6343_v0 = vmax.f32 %v6341_v23, %v6342_v15  ;;  %v6345_v1 = vld [vmem:[#allocation163_spill] sm:$0xff]  ;;  %2758 = vst [vmem:[#allocation10 + $0xf8] sm:$0xff] %v2636_v63   ;;  %v6347_v44 = vld [vmem:[#allocation90_spill] sm:$0xff]  ;;  %v6348_v34 = vld [vmem:[#allocation164_spill] sm:$0xff] }
 0x2e2   :  { %v2646_v55 = vpack.c.bf16 %v6336_v51, %v6333_v6  ;;  %v2651_v36 = vpack.c.bf16 %v6340_v25, %v6338_v7  ;;  %v6346_v22 = vmax.f32 %v6344_v54, %v6345_v1  ;;  %v6349_v62 = vmax.f32 %v6347_v44, %v6348_v34  ;;  %v6350_v59 = vld [vmem:[#allocation91_spill] sm:$0xff]  ;;  %v6351_v38 = vld [vmem:[#allocation165_spill] sm:$0xff]  ;;  %v6353_v28 = vld [vmem:[#allocation92_spill] sm:$0xff]  ;;  %2759 = vst [vmem:[#allocation10 + $0x100] sm:$0xff] %v2641_v61  }
 0x2e3   :  { %v6352_v12 = vmax.f32 %v6350_v59, %v6351_v38  ;;  %v6354_v18 = vld [vmem:[#allocation166_spill] sm:$0xff]  ;;  %v6356_v41 = vld [vmem:[#allocation93_spill] sm:$0xff]  ;;  %v6357_v42 = vld [vmem:[#allocation167_spill] sm:$0xff] }
 0x2e4   :  { %v2656_v30 = vpack.c.bf16 %v6346_v22, %v6343_v0  ;;  %v6355_v45 = vmax.f32 %v6353_v28, %v6354_v18  ;;  %v6358_v56 = vmax.f32 %v6356_v41, %v6357_v42  ;;  %v6359_v10 = vld [vmem:[#allocation94_spill] sm:$0xff]  ;;  %v6360_v53 = vld [vmem:[#allocation168_spill] sm:$0xff]  ;;  %v6362_v26 = vld [vmem:[#allocation169_spill] sm:$0xff]  ;;  %2760 = vst [vmem:[#allocation10 + $0x108] sm:$0xff] %v2646_v55  }
 0x2e5   :  { %v2661_v50 = vpack.c.bf16 %v6352_v12, %v6349_v62  ;;  %v6361_v16 = vmax.f32 %v6359_v10, %v6360_v53  ;;  %v6363_v58 = vmax.f32 %v6132_v11, %v6362_v26  ;;  %v6364_v35 = vld [vmem:[#allocation170_spill] sm:$0xff]  ;;  %v6366_v14 = vld [vmem:[#allocation97_spill] sm:$0xff]  ;;  %v6367_v17 = vld [vmem:[#allocation171_spill] sm:$0xff]  ;;  %2761 = vst [vmem:[#allocation10 + $0x110] sm:$0xff] %v2651_v36  }
 0x2e6   :  { %v2666_v40 = vpack.c.bf16 %v6358_v56, %v6355_v45  ;;  %v6365_v21 = vmax.f32 %v6134_v20, %v6364_v35  ;;  %v6368_v31 = vmax.f32 %v6366_v14, %v6367_v17  ;;  %2762 = vst [vmem:[#allocation10 + $0x118] sm:$0xff] %v2656_v30   ;;  %v6369_v60 = vld [vmem:[#allocation98_spill] sm:$0xff]  ;;  %v6370_v39 = vld [vmem:[#allocation172_spill] sm:$0xff]  ;;  %v6372_v46 = vld [vmem:[#allocation43_spill] sm:$0xff] }
 0x2e7   :  { %v2671_v9 = vpack.c.bf16 %v6363_v58, %v6361_v16  ;;  %v6371_v2 = vmax.f32 %v6369_v60, %v6370_v39  ;;  %v6373_v4 = vld [vmem:[#allocation173_spill] sm:$0xff]  ;;  %v6376_v63 = vld [vmem:[#allocation174_spill] sm:$0xff]  ;;  %v6378_v48 = vld [vmem:[#allocation175_spill] sm:$0xff]  ;;  %2763 = vst [vmem:[#allocation10 + $0x120] sm:$0xff] %v2661_v50  }
 0x2e8   :  { %v2676_v49 = vpack.c.bf16 %v6368_v31, %v6365_v21  ;;  %v6374_v11 = vmax.f32 %v6372_v46, %v6373_v4  ;;  %v6375_v32 = vld [vmem:[#allocation45_spill] sm:$0xff]  ;;  %v6379_v47 = vmax.f32 %v6144_v19, %v6378_v48  ;;  %v6380_v52 = vld [vmem:[#allocation50_spill] sm:$0xff]  ;;  %v6381_v33 = vld [vmem:[#allocation176_spill] sm:$0xff]  ;;  %2764 = vst [vmem:[#allocation10 + $0x128] sm:$0xff] %v2666_v40  }
 0x2e9   :  { %v6377_v20 = vmax.f32 %v6375_v32, %v6376_v63  ;;  %v6382_v27 = vmax.f32 %v6380_v52, %v6381_v33  ;;  %v6383_v61 = vld [vmem:[#allocation47_spill] sm:$0xff]  ;;  %v6385_v6 = vld [vmem:[#allocation49_spill] sm:$0xff]  ;;  %v6389_v55 = vld [vmem:[#allocation178_spill] sm:$0xff]  ;;  %2765 = vst [vmem:[#allocation10 + $0x130] sm:$0xff] %v2671_v9  }
 0x2ea   :  { %v2681_v57 = vpack.c.bf16 %v6374_v11, %v6371_v2  ;;  %v6384_v3 = vmax.f32 %v6052_v24, %v6383_v61  ;;  %v6386_v29 = vld [vmem:[#allocation177_spill] sm:$0xff]  ;;  %2766 = vst [vmem:[#allocation10 + $0x138] sm:$0xff] %v2676_v49   ;;  %v6391_v19 = vld [vmem:[#allocation55_spill] sm:$0xff]  ;;  %v6394_v36 = vld [vmem:[#allocation52_spill] sm:$0xff] }
 0x2eb   :  { %v2686_v8 = vpack.c.bf16 %v6379_v47, %v6377_v20  ;;  %v6387_v43 = vmax.f32 %v6385_v6, %v6386_v29  ;;  %v6388_v51 = vld [vmem:[#allocation53_spill] sm:$0xff]  ;;  %v6392_v37 = vld [vmem:[#allocation179_spill] sm:$0xff]  ;;  %v6395_v23 = vld [vmem:[#allocation180_spill] sm:$0xff] }
 0x2ec   :  { %v2691_v5 = vpack.c.bf16 %v6384_v3, %v6382_v27  ;;  %v6390_v13 = vmax.f32 %v6388_v51, %v6389_v55  ;;  %v6393_v25 = vmax.f32 %v6391_v19, %v6392_v37  ;;  %v6396_v15 = vmax.f32 %v6394_v36, %v6395_v23  ;;  %v6397_v24 = vld [vmem:[#allocation54_spill] sm:$0xff]  ;;  %v6398_v54 = vld [vmem:[#allocation181_spill] sm:$0xff]  ;;  %v6400_v22 = vld [vmem:[#allocation99_spill] sm:$0xff]  ;;  %2767 = vst [vmem:[#allocation10 + $0x140] sm:$0xff] %v2681_v57  }
 0x2ed   :  { %v6399_v1 = vmax.f32 %v6397_v24, %v6398_v54  ;;  %v6401_v30 = vld [vmem:[#allocation182_spill] sm:$0xff]  ;;  %v6403_v62 = vld [vmem:[#allocation100_spill] sm:$0xff]  ;;  %v6404_v59 = vld [vmem:[#allocation183_spill] sm:$0xff]  ;;  %2768 = vst [vmem:[#allocation10 + $0x148] sm:$0xff] %v2686_v8  }
 0x2ee   :  { %v2696_v7 = vpack.c.bf16 %v6390_v13, %v6387_v43  ;;  %v2701_v0 = vpack.c.bf16 %v6396_v15, %v6393_v25  ;;  %v6402_v44 = vmax.f32 %v6400_v22, %v6401_v30  ;;  %v6405_v38 = vmax.f32 %v6403_v62, %v6404_v59  ;;  %v6406_v12 = vld [vmem:[#allocation101_spill] sm:$0xff]  ;;  %v6407_v50 = vld [vmem:[#allocation184_spill] sm:$0xff]  ;;  %v6409_v45 = vld [vmem:[#allocation102_spill] sm:$0xff]  ;;  %2769 = vst [vmem:[#allocation10 + $0x150] sm:$0xff] %v2691_v5  }
 0x2ef   :  { %v6408_v28 = vmax.f32 %v6406_v12, %v6407_v50  ;;  %v6410_v41 = vld [vmem:[#allocation185_spill] sm:$0xff]  ;;  %v6412_v56 = vld [vmem:[#allocation103_spill] sm:$0xff]  ;;  %v6413_v40 = vld [vmem:[#allocation186_spill] sm:$0xff] }
 0x2f0   :  { %v2706_v34 = vpack.c.bf16 %v6402_v44, %v6399_v1  ;;  %v6411_v42 = vmax.f32 %v6409_v45, %v6410_v41  ;;  %v6414_v10 = vmax.f32 %v6412_v56, %v6413_v40  ;;  %2770 = vst [vmem:[#allocation10 + $0x158] sm:$0xff] %v2696_v7   ;;  %v6415_v16 = vld [vmem:[#allocation104_spill] sm:$0xff]  ;;  %v6416_v26 = vld [vmem:[#allocation187_spill] sm:$0xff]  ;;  %v6418_v9 = vld [vmem:[#allocation105_spill] sm:$0xff] }
 0x2f1   :  { %v2711_v18 = vpack.c.bf16 %v6408_v28, %v6405_v38  ;;  %v6417_v58 = vmax.f32 %v6415_v16, %v6416_v26  ;;  %v6419_v35 = vld [vmem:[#allocation188_spill] sm:$0xff]  ;;  %2771 = vst [vmem:[#allocation10 + $0x160] sm:$0xff] %v2701_v0  }
 0x2f2   :  { %v2716_v53 = vpack.c.bf16 %v6414_v10, %v6411_v42  ;;  %v6420_v21 = vmax.f32 %v6418_v9, %v6419_v35  ;;  %2772 = vst [vmem:[#allocation10 + $0x168] sm:$0xff] %v2706_v34  }
 0x2f3   :  { %2773 = vst [vmem:[#allocation10 + $0x170] sm:$0xff] %v2711_v18  }
 0x2f4   :  { %v2726_v14 = vpack.c.bf16 %v6420_v21, %v6417_v58  ;;  %2774 = vst [vmem:[#allocation10 + $0x178] sm:$0xff] %v2716_v53  }
 0x2f6   :  { %2776 = vst [vmem:[#allocation10 + $0x188] sm:$0xff] %v2726_v14  }
 0x2f7   :  { %3133 = shalt.err (!%p3130_p8)
}
 0x2f8   :  { %s3134_s17 = scalar_lea.hbm %s5342_s4, 6400 }
 0x2f9   :  { %p3135_p9 = scmp.ne.s32.totalorder %s5342_s4, %s3134_s17  ;;  %p3138_p10 = scmp.lt.u32.totalorder %s3134_s17, %s5342_s4 }
 0x2fb   :  { %p3140_p11 = pnand %p3138_p10, %p3135_p9 }
 0x2fd   :  { %3143 = shalt.err (!%p3140_p11)
}
 0x2fe   :  { %2212 = dma.vmem_to_hbm [thread:$0]  %s2207_s13, 6400, %s5342_s4, [#allocation4], %s3154_s27, %s3154_s27, %s3155_s28  }
 0x2ff   :  { %3150 = dma.done.wait [#allocation4], 6400  }
 0x300   :  { %3151 = vsyncadd [#allocation4], 4294960896 }
 0x301   :  { %2216 = vsyncpa [#allocation3], 1 }
 0x302   :  { %2217 = vsyncpa [#allocation6], 1 }
 0x303   :  { %2218 = vsyncpa [#allocation9], 1 }
 0x304   :  { %2219 = vsyncpa [#allocation4], 1 }

// kernel: discriminator_forward.6
= control target key start
LH: loop header
LB: loop body
LE: loop exit
PB: predicated region body
PF: predicated region fallthrough
CT: control target
= control target key end

     0   :  { %9 = vsyncpa [#allocation3], 0  ;;  %s1520_s0 = inlined_call_operand.hbm [shape: bf16[200,128], index: 0, kind: input, shape index: {}]   ;;  %s1521_s1 = inlined_call_operand.hbm [shape: bf16[128,128], index: 1, kind: input, shape index: {}]   ;;  %s1522_s2 = inlined_call_operand.hbm [shape: f32[1,128], index: 2, kind: input, shape index: {}]   ;;  %s1523_s3 = inlined_call_operand.hbm [shape: f32[1,128], index: 3, kind: input, shape index: {}]   ;;  %s1524_s4 = inlined_call_operand.hbm [shape: bf16[200,128], index: 4, kind: output, shape index: {}]  }
   0x1   :  { %10 = vsyncpa [#allocation6], 0 }
   0x2   :  { %11 = vsyncpa [#allocation9], 0 }
   0x3   :  { %12 = vsyncpa [#allocation4], 0  ;;  %s1122_s15 = smov [#allocation5]   ;;  %s1123_s17 = smov [#allocation2]  }
   0x4   :  { %s30_s16 = sshll.u32 %s1122_s15, 4  ;;  %s18_s18 = sshll.u32 %s1123_s17, 4  ;;  %s31_s16 = int_to_ptr.vmem [resolvable:$true] %s30_s16  ;;  %s1156_s18 = int_to_ptr.vmem [resolvable:$true] %s18_s18 }
   0x5   :  { %s1004_s21 = scalar_lea.hbm %s1521_s1, 1024 }
   0x6   :  { %p1005_p0 = scmp.ne.s32.totalorder %s1521_s1, %s1004_s21  ;;  %p1008_p1 = scmp.lt.u32.totalorder %s1004_s21, %s1521_s1 }
   0x8   :  { %p1010_p2 = pnand %p1008_p1, %p1005_p0 }
   0xa   :  { %1013 = shalt.err (!%p1010_p2)
}
   0xb   :  { %s1014_s26 = scalar_lea.vmem %s31_s16, 1024  ;;  %p1019_p4 = scmp.lt.s32.totalorder %s31_s16, %s31_s16 }
   0xc   :  { %p1015_p3 = scmp.ne.s32.totalorder %s31_s16, %s1014_s26  ;;  %p1020_p5 = scmp.lt.s32.totalorder %s1014_s26, %s1014_s26 }
   0xe   :  { %p1021_p6 = por %p1020_p5, %p1019_p4 }
  0x10   :  { %p1022_p7 = pnand %p1021_p6, %p1015_p3 }
  0x12   :  { %1025 = shalt.err (!%p1022_p7)
}
  0x13   :  { %s1124_s27 = smov 64   ;;  %s1125_s28 = smov 4  }
  0x14   :  { %36 = dma.hbm_to_vmem [thread:$0]  %s1521_s1, 1024, %s31_s16, [#allocation6], %s1124_s27, %s1124_s27, %s1125_s28  }
  0x15   :  { %s1026_s7 = scalar_lea.hbm %s1520_s0, 1600 }
  0x16   :  { %p1027_p8 = scmp.ne.s32.totalorder %s1520_s0, %s1026_s7  ;;  %p1030_p9 = scmp.lt.u32.totalorder %s1026_s7, %s1520_s0 }
  0x18   :  { %p1032_p10 = pnand %p1030_p9, %p1027_p8 }
  0x1a   :  { %1035 = shalt.err (!%p1032_p10)
}
  0x1b   :  { %s1036_s12 = scalar_lea.vmem %s1156_s18, 1600  ;;  %p1041_p12 = scmp.lt.s32.totalorder %s1156_s18, %s1156_s18 }
  0x1c   :  { %p1037_p11 = scmp.ne.s32.totalorder %s1156_s18, %s1036_s12  ;;  %p1042_p13 = scmp.lt.s32.totalorder %s1036_s12, %s1036_s12 }
  0x1e   :  { %p1043_p0 = por %p1042_p13, %p1041_p12 }
  0x20   :  { %p1044_p1 = pnand %p1043_p0, %p1037_p11 }
  0x22   :  { %1047 = shalt.err (!%p1044_p1)
}
  0x23   :  { %24 = dma.hbm_to_vmem [thread:$0]  %s1520_s0, 1600, %s1156_s18, [#allocation3], %s1124_s27, %s1124_s27, %s1125_s28  }
  0x24   :  { %s1126_s14 = smov [#allocation7]   ;;  %s1127_s16 = smov [#allocation8]  }
  0x25   :  { %s43_s15 = sshll.u32 %s1126_s14, 4  ;;  %s53_s17 = sshll.u32 %s1127_s16, 4  ;;  %s44_s15 = int_to_ptr.vmem [resolvable:$true] %s43_s15  ;;  %s54_s17 = int_to_ptr.vmem [resolvable:$true] %s53_s17 }
  0x26   :  { %s1048_s21 = scalar_lea.hbm %s1522_s2, 16 }
  0x27   :  { %p1049_p2 = scmp.ne.s32.totalorder %s1522_s2, %s1048_s21  ;;  %p1052_p3 = scmp.lt.u32.totalorder %s1048_s21, %s1522_s2 }
  0x29   :  { %p1054_p4 = pnand %p1052_p3, %p1049_p2 }
  0x2b   :  { %1057 = shalt.err (!%p1054_p4)
}
  0x2c   :  { %s1058_s0 = scalar_lea.vmem %s44_s15, 16  ;;  %s1062_s18 = scalar_lea.vmem %s44_s15, 32 }
  0x2d   :  { %p1059_p5 = scmp.ne.s32.totalorder %s44_s15, %s1058_s0  ;;  %p1063_p6 = scmp.lt.s32.totalorder %s44_s15, %s44_s15 }
  0x2e   :  { %p1064_p7 = scmp.lt.s32.totalorder %s1062_s18, %s1058_s0 }
  0x30   :  { %p1065_p8 = por %p1064_p7, %p1063_p6 }
  0x32   :  { %p1066_p9 = pnand %p1065_p8, %p1059_p5 }
  0x34   :  { %1069 = shalt.err (!%p1066_p9)
}
  0x35   :  { %46 = dma.hbm_to_vmem [thread:$0]  %s1522_s2, 16, %s44_s15, [#allocation6]  }
  0x36   :  { %s1070_s6 = scalar_lea.hbm %s1523_s3, 16 }
  0x37   :  { %p1071_p10 = scmp.ne.s32.totalorder %s1523_s3, %s1070_s6  ;;  %p1074_p11 = scmp.lt.u32.totalorder %s1070_s6, %s1523_s3 }
  0x39   :  { %p1076_p12 = pnand %p1074_p11, %p1071_p10 }
  0x3b   :  { %1079 = shalt.err (!%p1076_p12)
}
  0x3c   :  { %s1080_s11 = scalar_lea.vmem %s54_s17, 16  ;;  %s1084_s12 = scalar_lea.vmem %s54_s17, 32 }
  0x3d   :  { %p1081_p13 = scmp.ne.s32.totalorder %s54_s17, %s1080_s11  ;;  %p1085_p0 = scmp.lt.s32.totalorder %s54_s17, %s54_s17 }
  0x3e   :  { %p1086_p1 = scmp.lt.s32.totalorder %s1084_s12, %s1080_s11 }
  0x40   :  { %p1087_p2 = por %p1086_p1, %p1085_p0 }
  0x42   :  { %p1088_p3 = pnand %p1087_p2, %p1081_p13 }
  0x44   :  { %1091 = shalt.err (!%p1088_p3)
}
  0x45   :  { %56 = dma.hbm_to_vmem [thread:$0]  %s1523_s3, 16, %s54_s17, [#allocation9]  }
  0x46   :  { %1114 = dma.done.wait [#allocation3], 1600  }
  0x47   :  { %1115 = vsyncadd [#allocation3], 4294965696 }
  0x48   :  { %1116 = dma.done.wait [#allocation6], 1040  }
  0x49   :  { %1117 = vsyncadd [#allocation6], 4294966256 }
  0x4a   :  { %1118 = dma.done.wait [#allocation9], 16  }
  0x4b   :  { %1119 = vsyncadd [#allocation9], 4294967280  ;;  %v1128_v0 = vmov 0.0   ;;  %vm1129_vm0 = vmmov 0   ;;  %v981_v1 = vld [vmem:[#allocation5] sm:$0xff]   ;;  %v982_v2 = vld [vmem:[#allocation5 + $0x8] sm:$0xff]  }
  0x4c   :  { %888 = vmatprep.subr.bf16.mxu0 %v1128_v0  ;;  %956 = vmatprep.subr.bf16.mxu1 %v1128_v0  ;;  %v983_v3 = vld [vmem:[#allocation5 + $0x10] sm:$0xff]   ;;  %v984_v4 = vld [vmem:[#allocation5 + $0x18] sm:$0xff]   ;;  %v985_v5 = vld [vmem:[#allocation5 + $0x20] sm:$0xff]   ;;  %s1130_s3 = smov [#allocation10]  }
  0x4d   :  { %904 = vmatprep.mubr.msk.bf16.mxu0 %vm1129_vm0, %v1128_v0  ;;  %932 = vmatprep.mubr.msk.bf16.mxu1 %vm1129_vm0, %v1128_v0  ;;  %v986_v6 = vld [vmem:[#allocation5 + $0x28] sm:$0xff]   ;;  %v987_v7 = vld [vmem:[#allocation5 + $0x30] sm:$0xff]   ;;  %v988_v8 = vld [vmem:[#allocation5 + $0x38] sm:$0xff]   ;;  %s711_s13 = sshll.u32 %s1130_s3, 4  ;;  %s712_s13 = int_to_ptr.vmem [resolvable:$true] %s711_s13 }
  0x4e   :  { %889 = vmatpush3.bf16.msra.mxu0 %v981_v1  ;;  %964 = vmatpush3.bf16.msra.mxu1 %v981_v1  ;;  %v989_v9 = vld [vmem:[#allocation2] sm:$0xff]   ;;  %v993_v10 = vld [vmem:[#allocation2 + $0x38] sm:$0xff]   ;;  %v990_v11 = vld [vmem:[#allocation2 + $0x8] sm:$0xff]   ;;  %s1092_s14 = scalar_lea.vmem %s712_s13, 1600  ;;  %p1097_p5 = scmp.lt.s32.totalorder %s712_s13, %s712_s13 }
  0x4f   :  { %890 = vmatprep.subr.bf16.mxu0 %v1128_v0  ;;  %957 = vmatprep.subr.bf16.mxu1 %v1128_v0  ;;  %v995_v12 = vld [vmem:[#allocation2 + $0x40] sm:$0xff]   ;;  %v991_v13 = vld [vmem:[#allocation2 + $0x10] sm:$0xff]   ;;  %v997_v14 = vld [vmem:[#allocation2 + $0x48] sm:$0xff]   ;;  %p1093_p4 = scmp.ne.s32.totalorder %s712_s13, %s1092_s14  ;;  %p1098_p6 = scmp.lt.s32.totalorder %s1092_s14, %s1092_s14 }
  0x50   :  { %v992_v15 = vld [vmem:[#allocation2 + $0x18] sm:$0xff]   ;;  %v999_v16 = vld [vmem:[#allocation2 + $0x50] sm:$0xff]   ;;  %v994_v17 = vld [vmem:[#allocation2 + $0x20] sm:$0xff]  }
  0x51   :  { %v1000_v18 = vld [vmem:[#allocation2 + $0x58] sm:$0xff]   ;;  %v996_v19 = vld [vmem:[#allocation2 + $0x28] sm:$0xff]   ;;  %v1001_v20 = vld [vmem:[#allocation2 + $0x60] ss:$0 sps:$4 sm:$0xff]   ;;  %p1099_p7 = por %p1098_p6, %p1097_p5 }
  0x52   :  { %891 = vmatpush3.bf16.msra.mxu0 %v982_v2  ;;  %965 = vmatpush3.bf16.msra.mxu1 %v982_v2  ;;  %v998_v21 = vld [vmem:[#allocation2 + $0x30] sm:$0xff]  }
  0x53   :  { %892 = vmatprep.subr.bf16.mxu0 %v1128_v0  ;;  %958 = vmatprep.subr.bf16.mxu1 %v1128_v0  ;;  %p1100_p8 = pnand %p1099_p7, %p1093_p4 }
  0x56   :  { %893 = vmatpush3.bf16.msra.mxu0 %v983_v3  ;;  %966 = vmatpush3.bf16.msra.mxu1 %v983_v3 }
  0x57   :  { %894 = vmatprep.subr.bf16.mxu0 %v1128_v0  ;;  %959 = vmatprep.subr.bf16.mxu1 %v1128_v0 }
  0x5a   :  { %895 = vmatpush3.bf16.msra.mxu0 %v984_v4  ;;  %967 = vmatpush3.bf16.msra.mxu1 %v984_v4 }
  0x5b   :  { %896 = vmatprep.subr.bf16.mxu0 %v1128_v0  ;;  %960 = vmatprep.subr.bf16.mxu1 %v1128_v0 }
  0x5e   :  { %897 = vmatpush3.bf16.msra.mxu0 %v985_v5  ;;  %968 = vmatpush3.bf16.msra.mxu1 %v985_v5 }
  0x5f   :  { %898 = vmatprep.subr.bf16.mxu0 %v1128_v0  ;;  %961 = vmatprep.subr.bf16.mxu1 %v1128_v0 }
  0x62   :  { %899 = vmatpush3.bf16.msra.mxu0 %v986_v6  ;;  %969 = vmatpush3.bf16.msra.mxu1 %v986_v6 }
  0x63   :  { %900 = vmatprep.subr.bf16.mxu0 %v1128_v0  ;;  %962 = vmatprep.subr.bf16.mxu1 %v1128_v0 }
  0x66   :  { %901 = vmatpush3.bf16.msra.mxu0 %v987_v7  ;;  %970 = vmatpush3.bf16.msra.mxu1 %v987_v7 }
  0x67   :  { %902 = vmatprep.subr.bf16.mxu0 %v1128_v0  ;;  %963 = vmatprep.subr.bf16.mxu1 %v1128_v0 }
  0x6a   :  { %903 = vmatpush3.bf16.msra.mxu0 %v988_v8  ;;  %971 = vmatpush3.bf16.msra.mxu1 %v988_v8 }
  0x6d   :  { %905 = vmatmul.mubr.bf16.vlgmr.msra.gmra.mrb[0].mxu0 %v989_v9  ;;  %933 = vmatmul.mubr.bf16.vlgmr.msra.gmra.mrb[0].mxu1 %v993_v10 }
  0x6e   :  { %908 = vmatprep.mubr.msk.bf16.mxu0 %vm1129_vm0, %v1128_v0  ;;  %936 = vmatprep.mubr.msk.bf16.mxu1 %vm1129_vm0, %v1128_v0 }
  0x75   :  { %909 = vmatmul.mubr.bf16.gmra.mrb[4].mxu0 %v990_v11  ;;  %937 = vmatmul.mubr.bf16.gmra.mrb[4].mxu1 %v995_v12 }
  0x76   :  { %912 = vmatprep.mubr.msk.bf16.mxu0 %vm1129_vm0, %v1128_v0  ;;  %940 = vmatprep.mubr.msk.bf16.mxu1 %vm1129_vm0, %v1128_v0 }
  0x7d   :  { %913 = vmatmul.mubr.bf16.gmra.mrb[8].mxu0 %v991_v13  ;;  %941 = vmatmul.mubr.bf16.gmra.mrb[8].mxu1 %v997_v14 }
  0x7e   :  { %916 = vmatprep.mubr.msk.bf16.mxu0 %vm1129_vm0, %v1128_v0  ;;  %944 = vmatprep.mubr.msk.bf16.mxu1 %vm1129_vm0, %v1128_v0 }
  0x85   :  { %917 = vmatmul.mubr.bf16.gmra.mrb[12].mxu0 %v992_v15  ;;  %945 = vmatmul.mubr.bf16.gmra.mrb[12].mxu1 %v999_v16 }
  0x86   :  { %920 = vmatprep.mubr.msk.bf16.mxu0 %vm1129_vm0, %v1128_v0  ;;  %948 = vmatprep.mubr.msk.bf16.mxu1 %vm1129_vm0, %v1128_v0 }
  0x8d   :  { %921 = vmatmul.mubr.bf16.gmra.mrb[16].mxu0 %v994_v17  ;;  %949 = vmatmul.mubr.bf16.gmra.mrb[16].mxu1 %v1000_v18 }
  0x8e   :  { %924 = vmatprep.mubr.msk.bf16.mxu0 %vm1129_vm0, %v1128_v0  ;;  %952 = vmatprep.mubr.msk.bf16.mxu1 %vm1129_vm0, %v1128_v0 }
  0x95   :  { %925 = vmatmul.mubr.bf16.gmra.mrb[20].mxu0 %v996_v19  ;;  %953 = vmatmul.mubr.bf16.gmra.mrb[20].mxu1 %v1001_v20 }
  0x96   :  { %928 = vmatprep.mubr.msk.bf16.mxu0 %vm1129_vm0, %v1128_v0 }
  0x9d   :  { %929 = vmatmul.mubr.bf16.gmra.mrb[24].mxu0 %v998_v21 }
 0x140   :  { %v1259_v22 = vpop.f32.mrb[0].mxu0  ;;  %v1261_v23 = vpop.f32.mrb[0].mxu1 }
 0x141   :  { %v906_v24 = vpop.f32.mrb[1].mxu0  ;;  %v934_v25 = vpop.f32.mrb[1].mxu1  ;;  %v402_v28 = vmul.f32 %v1259_v22, %v1259_v22 }
 0x142   :  { %v1263_v26 = vpop.f32.mrb[2].mxu0  ;;  %v1265_v27 = vpop.f32.mrb[2].mxu1 }
 0x143   :  { %v371_v29 = vadd.f32 %v1263_v26, %v1259_v22  ;;  %v403_v30 = vmul.f32 %v1263_v26, %v1263_v26  ;;  %v907_v31 = vpop.f32.mrb[3].mxu0  ;;  %v935_v32 = vpop.f32.mrb[3].mxu1 }
 0x145   :  { %v427_v33 = vadd.f32 %v403_v30, %v402_v28 }
 0x148   :  { %v1273_v34 = vpop.f32.mrb[4].mxu0  ;;  %v1275_v35 = vpop.f32.mrb[4].mxu1 }
 0x149   :  { %v372_v36 = vadd.f32 %v371_v29, %v1273_v34  ;;  %v404_v37 = vmul.f32 %v1273_v34, %v1273_v34  ;;  %v910_v38 = vpop.f32.mrb[5].mxu0  ;;  %v938_v39 = vpop.f32.mrb[5].mxu1 }
 0x14a   :  { %v1280_v40 = vpop.f32.mrb[6].mxu0  ;;  %v1282_v41 = vpop.f32.mrb[6].mxu1 }
 0x14b   :  { %v428_v42 = vadd.f32 %v427_v33, %v404_v37  ;;  %v373_v43 = vadd.f32 %v372_v36, %v1280_v40  ;;  %v405_v44 = vmul.f32 %v1280_v40, %v1280_v40  ;;  %v911_v45 = vpop.f32.mrb[7].mxu0  ;;  %v939_v46 = vpop.f32.mrb[7].mxu1 }
 0x14d   :  { %v429_v47 = vadd.f32 %v428_v42, %v405_v44 }
 0x150   :  { %v1287_v48 = vpop.f32.mrb[8].mxu0  ;;  %v1289_v49 = vpop.f32.mrb[8].mxu1 }
 0x151   :  { %v374_v50 = vadd.f32 %v373_v43, %v1287_v48  ;;  %v406_v51 = vmul.f32 %v1287_v48, %v1287_v48  ;;  %v914_v52 = vpop.f32.mrb[9].mxu0  ;;  %v942_v53 = vpop.f32.mrb[9].mxu1 }
 0x152   :  { %v1294_v54 = vpop.f32.mrb[10].mxu0  ;;  %v1296_v55 = vpop.f32.mrb[10].mxu1 }
 0x153   :  { %v430_v56 = vadd.f32 %v429_v47, %v406_v51  ;;  %v375_v57 = vadd.f32 %v374_v50, %v1294_v54  ;;  %v407_v58 = vmul.f32 %v1294_v54, %v1294_v54  ;;  %v915_v59 = vpop.f32.mrb[11].mxu0  ;;  %v943_v60 = vpop.f32.mrb[11].mxu1 }
 0x155   :  { %v431_v61 = vadd.f32 %v430_v56, %v407_v58 }
 0x158   :  { %v1301_v62 = vpop.f32.mrb[12].mxu0  ;;  %v1303_v63 = vpop.f32.mrb[12].mxu1 }
 0x159   :  { %v376_v0 = vadd.f32 %v375_v57, %v1301_v62  ;;  %v408_v1 = vmul.f32 %v1301_v62, %v1301_v62  ;;  %v918_v2 = vpop.f32.mrb[13].mxu0  ;;  %v946_v3 = vpop.f32.mrb[13].mxu1 }
 0x15a   :  { %v1308_v4 = vpop.f32.mrb[14].mxu0  ;;  %v1310_v5 = vpop.f32.mrb[14].mxu1  ;;  %v417_v2 = vmul.f32 %v1265_v27, %v1265_v27 }
 0x15b   :  { %v432_v6 = vadd.f32 %v431_v61, %v408_v1  ;;  %v377_v7 = vadd.f32 %v376_v0, %v1308_v4  ;;  %v409_v8 = vmul.f32 %v1308_v4, %v1308_v4  ;;  %v919_v9 = vpop.f32.mrb[15].mxu0  ;;  %v947_v10 = vpop.f32.mrb[15].mxu1  ;;  %v416_v61 = vmul.f32 %v1261_v23, %v1261_v23 }
 0x15c   :  { %v419_v10 = vmul.f32 %v1282_v41, %v1282_v41 }
 0x15d   :  { %v433_v11 = vadd.f32 %v432_v6, %v409_v8 }
 0x160   :  { %v1315_v12 = vpop.f32.mrb[16].mxu0  ;;  %v1317_v13 = vpop.f32.mrb[16].mxu1 }
 0x161   :  { %v378_v14 = vadd.f32 %v377_v7, %v1315_v12  ;;  %v410_v15 = vmul.f32 %v1315_v12, %v1315_v12  ;;  %v922_v16 = vpop.f32.mrb[17].mxu0  ;;  %v950_v17 = vpop.f32.mrb[17].mxu1  ;;  %v418_v7 = vmul.f32 %v1275_v35, %v1275_v35 }
 0x162   :  { %v1322_v18 = vpop.f32.mrb[18].mxu0  ;;  %v1324_v19 = vpop.f32.mrb[18].mxu1 }
 0x163   :  { %v434_v20 = vadd.f32 %v433_v11, %v410_v15  ;;  %v379_v21 = vadd.f32 %v378_v14, %v1322_v18  ;;  %v411_v24 = vmul.f32 %v1322_v18, %v1322_v18  ;;  %v923_v25 = vpop.f32.mrb[19].mxu0  ;;  %v951_v28 = vpop.f32.mrb[19].mxu1  ;;  %v420_v15 = vmul.f32 %v1289_v49, %v1289_v49 }
 0x164   :  { %v422_v28 = vmul.f32 %v1303_v63, %v1303_v63 }
 0x165   :  { %v435_v29 = vadd.f32 %v434_v20, %v411_v24  ;;  %v421_v20 = vmul.f32 %v1296_v55, %v1296_v55 }
 0x168   :  { %v1329_v30 = vpop.f32.mrb[20].mxu0  ;;  %v1331_v31 = vpop.f32.mrb[20].mxu1 }
 0x169   :  { %v380_v32 = vadd.f32 %v379_v21, %v1329_v30  ;;  %v412_v33 = vmul.f32 %v1329_v30, %v1329_v30  ;;  %v926_v36 = vpop.f32.mrb[21].mxu0  ;;  %v954_v37 = vpop.f32.mrb[21].mxu1 }
 0x16a   :  { %v1336_v38 = vpop.f32.mrb[22].mxu0  ;;  %v368_v39 = vpop.f32.mrb[22].mxu1  ;;  %v423_v36 = vmul.f32 %v1310_v5, %v1310_v5 }
 0x16b   :  { %v436_v42 = vadd.f32 %v435_v29, %v412_v33  ;;  %v381_v43 = vadd.f32 %v380_v32, %v1336_v38  ;;  %v413_v44 = vmul.f32 %v1336_v38, %v1336_v38  ;;  %v927_v45 = vpop.f32.mrb[23].mxu0  ;;  %v955_v46 = vpop.f32.mrb[23].mxu1 }
 0x16c   :  { %v425_v45 = vmul.f32 %v1324_v19, %v1324_v19  ;;  %v426_v46 = vmul.f32 %v1331_v31, %v1331_v31 }
 0x16d   :  { %v437_v47 = vadd.f32 %v436_v42, %v413_v44  ;;  %v424_v42 = vmul.f32 %v1317_v13, %v1317_v13 }
 0x170   :  { %v1341_v50 = vpop.f32.mrb[24].mxu0 }
 0x171   :  { %v382_v51 = vadd.f32 %v381_v43, %v1341_v50  ;;  %v414_v52 = vmul.f32 %v1341_v50, %v1341_v50  ;;  %v930_v53 = vpop.f32.mrb[25].mxu0 }
 0x172   :  { %v1346_v56 = vpop.f32.mrb[26].mxu0 }
 0x173   :  { %v438_v57 = vadd.f32 %v437_v47, %v414_v52  ;;  %v383_v58 = vadd.f32 %v382_v51, %v1346_v56  ;;  %v415_v59 = vmul.f32 %v1346_v56, %v1346_v56  ;;  %v931_v60 = vpop.f32.mrb[27].mxu0 }
 0x175   :  { %v384_v0 = vadd.f32 %v383_v58, %v1261_v23  ;;  %v439_v1 = vadd.f32 %v438_v57, %v415_v59 }
 0x177   :  { %v385_v3 = vadd.f32 %v384_v0, %v1265_v27  ;;  %v440_v6 = vadd.f32 %v439_v1, %v416_v61 }
 0x179   :  { %v386_v8 = vadd.f32 %v385_v3, %v1275_v35  ;;  %v441_v9 = vadd.f32 %v440_v6, %v417_v2 }
 0x17b   :  { %v442_v11 = vadd.f32 %v441_v9, %v418_v7  ;;  %v387_v14 = vadd.f32 %v386_v8, %v1282_v41 }
 0x17d   :  { %v388_v16 = vadd.f32 %v387_v14, %v1289_v49  ;;  %v443_v17 = vadd.f32 %v442_v11, %v419_v10 }
 0x17f   :  { %v389_v21 = vadd.f32 %v388_v16, %v1296_v55  ;;  %v444_v24 = vadd.f32 %v443_v17, %v420_v15  ;;  %v469_v16 = vlaneseq }
 0x181   :  { %v390_v25 = vadd.f32 %v389_v21, %v1303_v63  ;;  %v445_v29 = vadd.f32 %v444_v24, %v421_v20  ;;  %v470_v17 = vshrl.u32 %v469_v16, 7  ;;  %v461_v20 = vld [vmem:[#allocation7] sm:$0x1] }
 0x183   :  { %v446_v32 = vadd.f32 %v445_v29, %v422_v28  ;;  %v391_v33 = vadd.f32 %v390_v25, %v1310_v5  ;;  %v471_v21 = vsub.s32 0, %v470_v17  ;;  %v465_v28 = vld [vmem:[#allocation8] sm:$0x1] }
 0x185   :  { %v447_v37 = vadd.f32 %v446_v32, %v423_v36  ;;  %v392_v39 = vadd.f32 %v391_v33, %v1317_v13 }
 0x187   :  { %v448_v43 = vadd.f32 %v447_v37, %v424_v42  ;;  %v393_v44 = vadd.f32 %v392_v39, %v1324_v19 }
 0x189   :  { %v449_v47 = vadd.f32 %v448_v43, %v425_v45  ;;  %v394_v51 = vadd.f32 %v393_v44, %v1331_v31 }
 0x18b   :  { %v395_v52 = vrot.slane %v394_v51, 4  ;;  %v450_v53 = vadd.f32 %v449_v47, %v426_v46 }
 0x18d   :  { %v396_v57 = vadd.f32 %v395_v52, %v394_v51  ;;  %v451_v58 = vrot.slane %v450_v53, 4 }
 0x18f   :  { %v397_v59 = vrot.slane %v396_v57, 2  ;;  %v452_v60 = vadd.f32 %v451_v58, %v450_v53 }
 0x191   :  { %v398_v61 = vadd.f32 %v397_v59, %v396_v57  ;;  %v453_v0 = vrot.slane %v452_v60, 2 }
 0x193   :  { %v399_v1 = vrot.slane %v398_v61, 1  ;;  %v454_v2 = vadd.f32 %v453_v0, %v452_v60 }
 0x195   :  { %v400_v3 = vadd.f32 %v399_v1, %v398_v61  ;;  %v455_v6 = vrot.slane %v454_v2, 1 }
 0x197   :  { %v401_v7 = vmul.f32 0.005, %v400_v3  ;;  %v456_v8 = vadd.f32 %v455_v6, %v454_v2 }
 0x199   :  { %v457_v9 = vmul.f32 0.005, %v456_v8  ;;  %v458_v10 = vmul.f32 %v401_v7, %v401_v7 }
 0x19b   :  { %v459_v11 = vsub.f32 %v457_v9, %v458_v10 }
 0x19d   :  { %v460_v14 = vmax.f32 %v459_v11, 0.0 }
 0x19f   :  { %v462_v15 = vadd.f32 1e-05, %v460_v14 }
 0x1a1   :  { %1002 = vrsqrt.f32 %v462_v15 }
 0x1ab   :  { %v1003_v24 = vpop.eup %1002 }
 0x1ac   :  { %v464_v25 = vmul.f32 %v1003_v24, %v461_v20 }
 0x1ae   :  { %v466_v29 = vmul.f32 %v464_v25, %v401_v7  ;;  %v472_v32 = vrot.slane %v464_v25, %v471_v21 }
 0x1b0   :  { %v467_v33 = vsub.f32 %v465_v28, %v466_v29  ;;  %v498_v36 = vmul.f32 %v472_v32, %v1331_v31  ;;  %v474_v37 = vmul.f32 %v472_v32, %v1259_v22  ;;  %v475_v39 = vmul.f32 %v472_v32, %v1263_v26 }
 0x1b1   :  { %v476_v42 = vmul.f32 %v472_v32, %v1273_v34  ;;  %v477_v43 = vmul.f32 %v472_v32, %v1280_v40  ;;  %v478_v44 = vmul.f32 %v472_v32, %v1287_v48  ;;  %v479_v45 = vmul.f32 %v472_v32, %v1294_v54 }
 0x1b2   :  { %v503_v46 = vrot.slane %v467_v33, %v471_v21  ;;  %v480_v47 = vmul.f32 %v472_v32, %v1301_v62  ;;  %v481_v51 = vmul.f32 %v472_v32, %v1308_v4  ;;  %v482_v52 = vmul.f32 %v472_v32, %v1315_v12 }
 0x1b3   :  { %v483_v31 = vmul.f32 %v472_v32, %v1322_v18  ;;  %v484_v22 = vmul.f32 %v472_v32, %v1329_v30  ;;  %v485_v26 = vmul.f32 %v472_v32, %v1336_v38  ;;  %v486_v34 = vmul.f32 %v472_v32, %v1341_v50 }
 0x1b4   :  { %v529_v40 = vadd.f32 %v503_v46, %v498_v36  ;;  %v487_v48 = vmul.f32 %v472_v32, %v1346_v56  ;;  %v488_v54 = vmul.f32 %v472_v32, %v1261_v23  ;;  %v489_v53 = vmul.f32 %v472_v32, %v1265_v27 }
 0x1b5   :  { %v490_v62 = vmul.f32 %v472_v32, %v1275_v35  ;;  %v491_v4 = vmul.f32 %v472_v32, %v1282_v41  ;;  %v492_v12 = vmul.f32 %v472_v32, %v1289_v49  ;;  %v493_v18 = vmul.f32 %v472_v32, %v1296_v55 }
 0x1b6   :  { %v554_v30 = vmul.f32 0.2, %v529_v40  ;;  %v494_v38 = vmul.f32 %v472_v32, %v1303_v63  ;;  %v495_v50 = vmul.f32 %v472_v32, %v1310_v5  ;;  %v496_v57 = vmul.f32 %v472_v32, %v1317_v13 }
 0x1b7   :  { %v497_v56 = vmul.f32 %v472_v32, %v1324_v19  ;;  %v1409_v23 = vadd.f32 %v503_v46, %v474_v37  ;;  %v1411_v27 = vadd.f32 %v503_v46, %v475_v39  ;;  %v1413_v35 = vadd.f32 %v503_v46, %v476_v42 }
 0x1b8   :  { %v579_v41 = vmax.f32 %v529_v40, %v554_v30  ;;  %v1415_v58 = vadd.f32 %v503_v46, %v477_v43  ;;  %v1417_v49 = vadd.f32 %v503_v46, %v478_v44  ;;  %v1419_v55 = vadd.f32 %v503_v46, %v479_v45 }
 0x1b9   :  { %v1421_v63 = vadd.f32 %v503_v46, %v480_v47  ;;  %v1423_v5 = vadd.f32 %v503_v46, %v481_v51  ;;  %v1425_v13 = vadd.f32 %v503_v46, %v482_v52  ;;  %v1427_v19 = vadd.f32 %v503_v46, %v483_v31 }
 0x1ba   :  { %v795_v59 = vpack.c.bf16 %v579_v41, %v579_v41  ;;  %v1429_v60 = vadd.f32 %v503_v46, %v484_v22  ;;  %v1431_v61 = vadd.f32 %v503_v46, %v485_v26  ;;  %v1433_v0 = vadd.f32 %v503_v46, %v486_v34 }
 0x1bb   :  { %v1435_v1 = vadd.f32 %v503_v46, %v487_v48  ;;  %v1437_v2 = vadd.f32 %v503_v46, %v488_v54  ;;  %v1439_v3 = vadd.f32 %v503_v46, %v489_v53  ;;  %v1441_v6 = vadd.f32 %v503_v46, %v490_v62 }
 0x1bc   :  { %705 = vst [vmem:[#allocation10 + $0x60] sm:$0xf] %v795_v59  ;;  %v1443_v7 = vadd.f32 %v503_v46, %v491_v4  ;;  %v1445_v8 = vadd.f32 %v503_v46, %v492_v12  ;;  %v1447_v9 = vadd.f32 %v503_v46, %v493_v18  ;;  %v1449_v10 = vadd.f32 %v503_v46, %v494_v38 }
 0x1bd   :  { %v1451_v11 = vadd.f32 %v503_v46, %v495_v50  ;;  %v1453_v14 = vadd.f32 %v503_v46, %v496_v57  ;;  %v1455_v15 = vadd.f32 %v503_v46, %v497_v56  ;;  %v530_v16 = vmul.f32 0.2, %v1409_v23 }
 0x1be   :  { %v531_v17 = vmul.f32 0.2, %v1411_v27  ;;  %v532_v20 = vmul.f32 0.2, %v1413_v35  ;;  %v533_v21 = vmul.f32 0.2, %v1415_v58 }
 0x1bf   :  { %v534_v24 = vmul.f32 0.2, %v1417_v49  ;;  %v535_v25 = vmul.f32 0.2, %v1419_v55  ;;  %v536_v28 = vmul.f32 0.2, %v1421_v63  ;;  %v555_v29 = vmax.f32 %v1409_v23, %v530_v16 }
 0x1c0   :  { %v537_v32 = vmul.f32 0.2, %v1423_v5  ;;  %v538_v33 = vmul.f32 0.2, %v1425_v13  ;;  %v539_v36 = vmul.f32 0.2, %v1427_v19  ;;  %v556_v37 = vmax.f32 %v1411_v27, %v531_v17 }
 0x1c1   :  { %v540_v39 = vmul.f32 0.2, %v1429_v60  ;;  %v541_v42 = vmul.f32 0.2, %v1431_v61  ;;  %v542_v43 = vmul.f32 0.2, %v1433_v0  ;;  %v557_v44 = vmax.f32 %v1413_v35, %v532_v20 }
 0x1c2   :  { %v543_v45 = vmul.f32 0.2, %v1435_v1  ;;  %v544_v46 = vmul.f32 0.2, %v1437_v2  ;;  %v545_v47 = vmul.f32 0.2, %v1439_v3  ;;  %v558_v51 = vmax.f32 %v1415_v58, %v533_v21 }
 0x1c3   :  { %v546_v52 = vmul.f32 0.2, %v1441_v6  ;;  %v547_v31 = vmul.f32 0.2, %v1443_v7  ;;  %v548_v22 = vmul.f32 0.2, %v1445_v8  ;;  %v559_v26 = vmax.f32 %v1417_v49, %v534_v24 }
 0x1c4   :  { %v549_v34 = vmul.f32 0.2, %v1447_v9  ;;  %v550_v40 = vmul.f32 0.2, %v1449_v10  ;;  %v551_v48 = vmul.f32 0.2, %v1451_v11  ;;  %v560_v54 = vmax.f32 %v1419_v55, %v535_v25 }
 0x1c5   :  { %v552_v53 = vmul.f32 0.2, %v1453_v14  ;;  %v553_v62 = vmul.f32 0.2, %v1455_v15  ;;  %v561_v4 = vmax.f32 %v1421_v63, %v536_v28  ;;  %v562_v12 = vmax.f32 %v1423_v5, %v537_v32 }
 0x1c6   :  { %v563_v18 = vmax.f32 %v1425_v13, %v538_v33  ;;  %v564_v30 = vmax.f32 %v1427_v19, %v539_v36  ;;  %v565_v38 = vmax.f32 %v1429_v60, %v540_v39  ;;  %v566_v50 = vmax.f32 %v1431_v61, %v541_v42 }
 0x1c7   :  { %v567_v57 = vmax.f32 %v1433_v0, %v542_v43  ;;  %v568_v56 = vmax.f32 %v1435_v1, %v543_v45  ;;  %v569_v23 = vmax.f32 %v1437_v2, %v544_v46  ;;  %v570_v27 = vmax.f32 %v1439_v3, %v545_v47 }
 0x1c8   :  { %v571_v35 = vmax.f32 %v1441_v6, %v546_v52  ;;  %v572_v41 = vmax.f32 %v1443_v7, %v547_v31  ;;  %v573_v58 = vmax.f32 %v1445_v8, %v548_v22  ;;  %v574_v49 = vmax.f32 %v1447_v9, %v549_v34 }
 0x1c9   :  { %v575_v55 = vmax.f32 %v1449_v10, %v550_v40  ;;  %v576_v63 = vmax.f32 %v1451_v11, %v551_v48  ;;  %v577_v5 = vmax.f32 %v1453_v14, %v552_v53  ;;  %v578_v13 = vmax.f32 %v1455_v15, %v553_v62 }
 0x1ca   :  { %v799_v19 = vpack.c.bf16 %v556_v37, %v555_v29  ;;  %v804_v59 = vpack.c.bf16 %v558_v51, %v557_v44  ;;  %v809_v60 = vpack.c.bf16 %v560_v54, %v559_v26  ;;  %v814_v61 = vpack.c.bf16 %v562_v12, %v561_v4 }
 0x1cb   :  { %v819_v0 = vpack.c.bf16 %v564_v30, %v563_v18  ;;  %v824_v1 = vpack.c.bf16 %v566_v50, %v565_v38  ;;  %v829_v2 = vpack.c.bf16 %v568_v56, %v567_v57  ;;  %v834_v3 = vpack.c.bf16 %v570_v27, %v569_v23 }
 0x1cc   :  { %800 = vst [vmem:[#allocation10] sm:$0xff] %v799_v19   ;;  %856 = vst [vmem:[#allocation10 + $0x8] sm:$0xff] %v804_v59   ;;  %v839_v6 = vpack.c.bf16 %v572_v41, %v571_v35  ;;  %v844_v7 = vpack.c.bf16 %v574_v49, %v573_v58  ;;  %v849_v8 = vpack.c.bf16 %v576_v63, %v575_v55 }
 0x1cd   :  { %857 = vst [vmem:[#allocation10 + $0x10] sm:$0xff] %v809_v60   ;;  %858 = vst [vmem:[#allocation10 + $0x18] sm:$0xff] %v814_v61   ;;  %v854_v9 = vpack.c.bf16 %v578_v13, %v577_v5 }
 0x1ce   :  { %859 = vst [vmem:[#allocation10 + $0x20] sm:$0xff] %v819_v0   ;;  %860 = vst [vmem:[#allocation10 + $0x28] sm:$0xff] %v824_v1  }
 0x1cf   :  { %861 = vst [vmem:[#allocation10 + $0x30] sm:$0xff] %v829_v2   ;;  %862 = vst [vmem:[#allocation10 + $0x38] sm:$0xff] %v834_v3  }
 0x1d0   :  { %863 = vst [vmem:[#allocation10 + $0x40] sm:$0xff] %v839_v6   ;;  %864 = vst [vmem:[#allocation10 + $0x48] sm:$0xff] %v844_v7  }
 0x1d1   :  { %865 = vst [vmem:[#allocation10 + $0x50] sm:$0xff] %v849_v8   ;;  %866 = vst [vmem:[#allocation10 + $0x58] sm:$0xff] %v854_v9  }
 0x1d2   :  { %1103 = shalt.err (!%p1100_p8)
}
 0x1d3   :  { %s1104_s17 = scalar_lea.hbm %s1524_s4, 1600 }
 0x1d4   :  { %p1105_p9 = scmp.ne.s32.totalorder %s1524_s4, %s1104_s17  ;;  %p1108_p10 = scmp.lt.u32.totalorder %s1104_s17, %s1524_s4 }
 0x1d6   :  { %p1110_p11 = pnand %p1108_p10, %p1105_p9 }
 0x1d8   :  { %1113 = shalt.err (!%p1110_p11)
}
 0x1d9   :  { %717 = dma.vmem_to_hbm [thread:$0]  %s712_s13, 1600, %s1524_s4, [#allocation4], %s1124_s27, %s1124_s27, %s1125_s28  }
 0x1da   :  { %1120 = dma.done.wait [#allocation4], 1600  }
 0x1db   :  { %1121 = vsyncadd [#allocation4], 4294965696 }
 0x1dc   :  { %721 = vsyncpa [#allocation3], 1 }
 0x1dd   :  { %722 = vsyncpa [#allocation6], 1 }
 0x1de   :  { %723 = vsyncpa [#allocation9], 1 }
 0x1df   :  { %724 = vsyncpa [#allocation4], 1 }

// kernel: discriminator_forward.7
= control target key start
LH: loop header
LB: loop body
LE: loop exit
PB: predicated region body
PF: predicated region fallthrough
CT: control target
= control target key end

     0   :  { %9 = vsyncpa [#allocation3], 0  ;;  %s835_s0 = inlined_call_operand.hbm [shape: bf16[56,256], index: 0, kind: input, shape index: {}]   ;;  %s836_s1 = inlined_call_operand.hbm [shape: bf16[256,128], index: 1, kind: input, shape index: {}]   ;;  %s837_s2 = inlined_call_operand.hbm [shape: f32[1,128], index: 2, kind: input, shape index: {}]   ;;  %s838_s3 = inlined_call_operand.hbm [shape: f32[1,128], index: 3, kind: input, shape index: {}]   ;;  %s839_s4 = inlined_call_operand.hbm [shape: bf16[56,128], index: 4, kind: output, shape index: {}]  }
   0x1   :  { %10 = vsyncpa [#allocation6], 0 }
   0x2   :  { %11 = vsyncpa [#allocation9], 0 }
   0x3   :  { %12 = vsyncpa [#allocation4], 0  ;;  %s711_s15 = smov [#allocation5]   ;;  %s593_s19 = scalar_lea.hbm %s836_s1, 2048 }
   0x4   :  { %s30_s16 = sshll.u32 %s711_s15, 4  ;;  %p594_p0 = scmp.ne.s32.totalorder %s836_s1, %s593_s19  ;;  %s31_s16 = int_to_ptr.vmem [resolvable:$true] %s30_s16 }
   0x5   :  { %p597_p1 = scmp.lt.u32.totalorder %s593_s19, %s836_s1 }
   0x7   :  { %p599_p2 = pnand %p597_p1, %p594_p0 }
   0x9   :  { %602 = shalt.err (!%p599_p2)
}
   0xa   :  { %s603_s24 = scalar_lea.vmem %s31_s16, 2048  ;;  %p608_p4 = scmp.lt.s32.totalorder %s31_s16, %s31_s16 }
   0xb   :  { %p604_p3 = scmp.ne.s32.totalorder %s31_s16, %s603_s24  ;;  %p609_p5 = scmp.lt.s32.totalorder %s603_s24, %s603_s24 }
   0xd   :  { %p610_p6 = por %p609_p5, %p608_p4 }
   0xf   :  { %p611_p7 = pnand %p610_p6, %p604_p3 }
  0x11   :  { %614 = shalt.err (!%p611_p7)
}
  0x12   :  { %s712_s25 = smov 64   ;;  %s713_s26 = smov 4  }
  0x13   :  { %36 = dma.hbm_to_vmem [thread:$0]  %s836_s1, 2048, %s31_s16, [#allocation6], %s712_s25, %s712_s25, %s713_s26  }
  0x14   :  { %s714_s29 = smov [#allocation2]   ;;  %s615_s7 = scalar_lea.hbm %s835_s0, 896 }
  0x15   :  { %s18_s30 = sshll.u32 %s714_s29, 4  ;;  %p616_p8 = scmp.ne.s32.totalorder %s835_s0, %s615_s7  ;;  %s19_s30 = int_to_ptr.vmem [resolvable:$true] %s18_s30 }
  0x16   :  { %p619_p9 = scmp.lt.u32.totalorder %s615_s7, %s835_s0 }
  0x18   :  { %p621_p10 = pnand %p619_p9, %p616_p8 }
  0x1a   :  { %624 = shalt.err (!%p621_p10)
}
  0x1b   :  { %s625_s12 = scalar_lea.vmem %s19_s30, 896  ;;  %p630_p12 = scmp.lt.s32.totalorder %s19_s30, %s19_s30 }
  0x1c   :  { %p626_p11 = scmp.ne.s32.totalorder %s19_s30, %s625_s12  ;;  %p631_p13 = scmp.lt.s32.totalorder %s625_s12, %s625_s12 }
  0x1e   :  { %p632_p0 = por %p631_p13, %p630_p12 }
  0x20   :  { %p633_p1 = pnand %p632_p0, %p626_p11 }
  0x22   :  { %636 = shalt.err (!%p633_p1)
}
  0x23   :  { %s715_s1 = smov 128   ;;  %s716_s13 = smov 8  }
  0x24   :  { %24 = dma.hbm_to_vmem [thread:$0]  %s835_s0, 896, %s19_s30, [#allocation3], %s715_s1, %s715_s1, %s716_s13  }
  0x25   :  { %s717_s16 = smov [#allocation7]   ;;  %s718_s18 = smov [#allocation8]  }
  0x26   :  { %s43_s17 = sshll.u32 %s717_s16, 4  ;;  %s53_s19 = sshll.u32 %s718_s18, 4  ;;  %s44_s17 = int_to_ptr.vmem [resolvable:$true] %s43_s17  ;;  %s54_s19 = int_to_ptr.vmem [resolvable:$true] %s53_s19 }
  0x27   :  { %s637_s22 = scalar_lea.hbm %s837_s2, 16 }
  0x28   :  { %p638_p2 = scmp.ne.s32.totalorder %s837_s2, %s637_s22  ;;  %p641_p3 = scmp.lt.u32.totalorder %s637_s22, %s837_s2 }
  0x2a   :  { %p643_p4 = pnand %p641_p3, %p638_p2 }
  0x2c   :  { %646 = shalt.err (!%p643_p4)
}
  0x2d   :  { %s647_s0 = scalar_lea.vmem %s44_s17, 16  ;;  %s651_s29 = scalar_lea.vmem %s44_s17, 32 }
  0x2e   :  { %p648_p5 = scmp.ne.s32.totalorder %s44_s17, %s647_s0  ;;  %p652_p6 = scmp.lt.s32.totalorder %s44_s17, %s44_s17 }
  0x2f   :  { %p653_p7 = scmp.lt.s32.totalorder %s651_s29, %s647_s0 }
  0x31   :  { %p654_p8 = por %p653_p7, %p652_p6 }
  0x33   :  { %p655_p9 = pnand %p654_p8, %p648_p5 }
  0x35   :  { %658 = shalt.err (!%p655_p9)
}
  0x36   :  { %46 = dma.hbm_to_vmem [thread:$0]  %s837_s2, 16, %s44_s17, [#allocation6]  }
  0x37   :  { %s659_s8 = scalar_lea.hbm %s838_s3, 16 }
  0x38   :  { %p660_p10 = scmp.ne.s32.totalorder %s838_s3, %s659_s8  ;;  %p663_p11 = scmp.lt.u32.totalorder %s659_s8, %s838_s3 }
  0x3a   :  { %p665_p12 = pnand %p663_p11, %p660_p10 }
  0x3c   :  { %668 = shalt.err (!%p665_p12)
}
  0x3d   :  { %s669_s1 = scalar_lea.vmem %s54_s19, 16  ;;  %s673_s13 = scalar_lea.vmem %s54_s19, 32 }
  0x3e   :  { %p670_p13 = scmp.ne.s32.totalorder %s54_s19, %s669_s1  ;;  %p674_p0 = scmp.lt.s32.totalorder %s54_s19, %s54_s19 }
  0x3f   :  { %p675_p1 = scmp.lt.s32.totalorder %s673_s13, %s669_s1 }
  0x41   :  { %p676_p2 = por %p675_p1, %p674_p0 }
  0x43   :  { %p677_p3 = pnand %p676_p2, %p670_p13 }
  0x45   :  { %680 = shalt.err (!%p677_p3)
}
  0x46   :  { %56 = dma.hbm_to_vmem [thread:$0]  %s838_s3, 16, %s54_s19, [#allocation9]  }
  0x47   :  { %703 = dma.done.wait [#allocation3], 896  }
  0x48   :  { %704 = vsyncadd [#allocation3], 4294966400 }
  0x49   :  { %705 = dma.done.wait [#allocation6], 2064  }
  0x4a   :  { %706 = vsyncadd [#allocation6], 4294965232 }
  0x4b   :  { %707 = dma.done.wait [#allocation9], 16  }
  0x4c   :  { %708 = vsyncadd [#allocation9], 4294967280  ;;  %v564_v0 = vld [vmem:[#allocation5 + $0x40] sm:$0xff]   ;;  %v566_v2 = vld [vmem:[#allocation5 + $0x48] sm:$0xff]   ;;  %s719_s3 = smov [#allocation10]  }
  0x4d   :  { %v565_v1 = vld [vmem:[#allocation5] sm:$0xff]   ;;  %499 = vmatprep.subr.bf16.mxu0 %v564_v0  ;;  %539 = vmatprep.subr.bf16.mxu1 %v564_v0  ;;  %v567_v3 = vld [vmem:[#allocation5 + $0x8] sm:$0xff]   ;;  %v568_v4 = vld [vmem:[#allocation5 + $0x50] sm:$0xff]   ;;  %s430_s15 = sshll.u32 %s719_s3, 4  ;;  %s431_s15 = int_to_ptr.vmem [resolvable:$true] %s430_s15 }
  0x4e   :  { %500 = vmatpush3.bf16.msra.mxu0 %v565_v1  ;;  %547 = vmatpush3.bf16.msra.mxu1 %v565_v1  ;;  %v569_v5 = vld [vmem:[#allocation5 + $0x10] sm:$0xff]   ;;  %v570_v6 = vld [vmem:[#allocation5 + $0x58] sm:$0xff]   ;;  %v572_v8 = vld [vmem:[#allocation5 + $0x60] sm:$0xff]   ;;  %s681_s16 = scalar_lea.vmem %s431_s15, 448  ;;  %p686_p5 = scmp.lt.s32.totalorder %s431_s15, %s431_s15 }
  0x4f   :  { %501 = vmatprep.subr.bf16.mxu0 %v566_v2  ;;  %540 = vmatprep.subr.bf16.mxu1 %v566_v2  ;;  %v571_v7 = vld [vmem:[#allocation5 + $0x18] sm:$0xff]   ;;  %v573_v9 = vld [vmem:[#allocation5 + $0x20] sm:$0xff]   ;;  %v574_v10 = vld [vmem:[#allocation5 + $0x68] sm:$0xff]   ;;  %p682_p4 = scmp.ne.s32.totalorder %s431_s15, %s681_s16  ;;  %p687_p6 = scmp.lt.s32.totalorder %s681_s16, %s681_s16 }
  0x50   :  { %v582_v11 = vld [vmem:[#allocation2 + $0x4] ss:$8 sps:$4 sm:$0xff]   ;;  %v578_v16 = vld [vmem:[#allocation5 + $0x78] sm:$0xff]   ;;  %v580_v19 = vld [vmem:[#allocation2] ss:$8 sps:$4 sm:$0xff]  }
  0x51   :  { %v585_v12 = vld [vmem:[#allocation2 + $0x24] ss:$8 sps:$4 sm:$0xff]   ;;  %274 = vmatprep.mubr.bf16.mxu0 %v582_v11  ;;  %v579_v17 = vld [vmem:[#allocation5 + $0x38] sm:$0xff]   ;;  %v583_v20 = vld [vmem:[#allocation2 + $0x20] ss:$8 sps:$4 sm:$0xff]   ;;  %p688_p7 = por %p687_p6, %p686_p5 }
  0x52   :  { %502 = vmatpush3.bf16.msra.mxu0 %v567_v3  ;;  %548 = vmatpush3.bf16.msra.mxu1 %v567_v3  ;;  %v575_v13 = vld [vmem:[#allocation5 + $0x28] sm:$0xff]   ;;  %v576_v14 = vld [vmem:[#allocation5 + $0x70] sm:$0xff]   ;;  %v76_v18 = vld [vmem:[#allocation2 + $0x30] sm:$0xff] }
  0x53   :  { %503 = vmatprep.subr.bf16.mxu0 %v568_v4  ;;  %541 = vmatprep.subr.bf16.mxu1 %v568_v4  ;;  %v577_v15 = vld [vmem:[#allocation5 + $0x30] sm:$0xff]   ;;  %v586_v21 = vld [vmem:[#allocation2 + $0x14] ss:$8 sps:$4 sm:$0xff]   ;;  %v451_v22 = vcombine.high %v76_v18, %v76_v18  ;;  %v588_v23 = vld [vmem:[#allocation2 + $0x10] ss:$8 sps:$4 sm:$0xff]   ;;  %v450_v24 = vcombine.low %v76_v18, %v76_v18  ;;  %p689_p8 = pnand %p688_p7, %p682_p4 }
  0x54   :  { %290 = vmatprep.mubr.bf16.mxu1 %v585_v12 }
  0x56   :  { %504 = vmatpush3.bf16.msra.mxu0 %v569_v5  ;;  %549 = vmatpush3.bf16.msra.mxu1 %v569_v5 }
  0x57   :  { %505 = vmatprep.subr.bf16.mxu0 %v570_v6  ;;  %542 = vmatprep.subr.bf16.mxu1 %v570_v6 }
  0x5a   :  { %506 = vmatpush3.bf16.msra.mxu0 %v571_v7  ;;  %550 = vmatpush3.bf16.msra.mxu1 %v571_v7 }
  0x5b   :  { %507 = vmatprep.subr.bf16.mxu0 %v572_v8  ;;  %543 = vmatprep.subr.bf16.mxu1 %v572_v8 }
  0x5e   :  { %508 = vmatpush3.bf16.msra.mxu0 %v573_v9  ;;  %551 = vmatpush3.bf16.msra.mxu1 %v573_v9 }
  0x5f   :  { %509 = vmatprep.subr.bf16.mxu0 %v574_v10  ;;  %544 = vmatprep.subr.bf16.mxu1 %v574_v10 }
  0x62   :  { %510 = vmatpush3.bf16.msra.mxu0 %v575_v13  ;;  %552 = vmatpush3.bf16.msra.mxu1 %v575_v13 }
  0x63   :  { %511 = vmatprep.subr.bf16.mxu0 %v576_v14  ;;  %545 = vmatprep.subr.bf16.mxu1 %v576_v14 }
  0x66   :  { %512 = vmatpush3.bf16.msra.mxu0 %v577_v15  ;;  %553 = vmatpush3.bf16.msra.mxu1 %v577_v15 }
  0x67   :  { %513 = vmatprep.subr.bf16.mxu0 %v578_v16  ;;  %546 = vmatprep.subr.bf16.mxu1 %v578_v16 }
  0x6a   :  { %514 = vmatpush3.bf16.msra.mxu0 %v579_v17  ;;  %554 = vmatpush3.bf16.msra.mxu1 %v579_v17 }
  0x6d   :  { %275 = vmatmul.mubr.bf16.vlgmr.msra.gmra.mrb[0].mxu0 %v580_v19  ;;  %291 = vmatmul.mubr.bf16.vlgmr.msra.gmra.mrb[0].mxu1 %v583_v20 }
  0x6e   :  { %282 = vmatprep.mubr.bf16.mxu0 %v586_v21  ;;  %298 = vmatprep.mubr.bf16.mxu1 %v451_v22  ;;  %v350_v21 = vlaneseq }
  0x70   :  { %v351_v22 = vshrl.u32 %v350_v21, 7 }
  0x75   :  { %283 = vmatmul.mubr.bf16.gmra.mrb[4].mxu0 %v588_v23  ;;  %299 = vmatmul.mubr.bf16.gmra.mrb[4].mxu1 %v450_v24  ;;  %v342_v23 = vld [vmem:[#allocation7] sm:$0x1]  ;;  %v352_v24 = vsub.s32 0, %v351_v22 }
 0x140   :  { %v515_v25 = vpop.f32.mrb[0].mxu0  ;;  %v527_v26 = vpop.f32.mrb[0].mxu1 }
 0x141   :  { %v516_v27 = vpop.f32.mrb[1].mxu0  ;;  %v528_v28 = vpop.f32.mrb[1].mxu1 }
 0x142   :  { %v796_v29 = vadd.f32 %v516_v27, %v515_v25  ;;  %v518_v30 = vpop.f32.mrb[2].mxu0  ;;  %v798_v31 = vadd.f32 %v528_v28, %v527_v26  ;;  %v530_v32 = vpop.f32.mrb[2].mxu1  ;;  %v346_v27 = vld [vmem:[#allocation8] sm:$0x1] }
 0x143   :  { %v519_v33 = vpop.f32.mrb[3].mxu0  ;;  %v531_v34 = vpop.f32.mrb[3].mxu1 }
 0x144   :  { %v800_v35 = vadd.f32 %v519_v33, %v518_v30  ;;  %v802_v36 = vadd.f32 %v531_v34, %v530_v32  ;;  %v319_v37 = vmul.f32 %v796_v29, %v796_v29  ;;  %v323_v57 = vmul.f32 %v798_v31, %v798_v31 }
 0x146   :  { %v306_v38 = vadd.f32 %v800_v35, %v796_v29  ;;  %v320_v39 = vmul.f32 %v800_v35, %v800_v35  ;;  %v324_v60 = vmul.f32 %v802_v36, %v802_v36 }
 0x148   :  { %v326_v40 = vadd.f32 %v320_v39, %v319_v37  ;;  %v521_v41 = vpop.f32.mrb[4].mxu0  ;;  %v533_v42 = vpop.f32.mrb[4].mxu1 }
 0x149   :  { %v522_v43 = vpop.f32.mrb[5].mxu0  ;;  %v534_v44 = vpop.f32.mrb[5].mxu1 }
 0x14a   :  { %v523_v45 = vadd.f32 %v522_v43, %v521_v41  ;;  %v524_v46 = vpop.f32.mrb[6].mxu0  ;;  %v535_v47 = vadd.f32 %v534_v44, %v533_v42  ;;  %v536_v48 = vpop.f32.mrb[6].mxu1 }
 0x14b   :  { %v525_v49 = vpop.f32.mrb[7].mxu0  ;;  %v537_v50 = vpop.f32.mrb[7].mxu1 }
 0x14c   :  { %v307_v51 = vadd.f32 %v523_v45, %v306_v38  ;;  %v321_v52 = vmul.f32 %v523_v45, %v523_v45  ;;  %v526_v53 = vadd.f32 %v525_v49, %v524_v46  ;;  %v325_v63 = vmul.f32 %v535_v47, %v535_v47 }
 0x14e   :  { %v327_v54 = vadd.f32 %v326_v40, %v321_v52  ;;  %v308_v55 = vadd.f32 %v526_v53, %v307_v51  ;;  %v322_v56 = vmul.f32 %v526_v53, %v526_v53 }
 0x150   :  { %v309_v58 = vadd.f32 %v798_v31, %v308_v55  ;;  %v328_v59 = vadd.f32 %v327_v54, %v322_v56 }
 0x152   :  { %v329_v61 = vadd.f32 %v328_v59, %v323_v57  ;;  %v310_v62 = vadd.f32 %v802_v36, %v309_v58 }
 0x154   :  { %v311_v0 = vadd.f32 %v535_v47, %v310_v62  ;;  %v330_v1 = vadd.f32 %v329_v61, %v324_v60 }
 0x156   :  { %v312_v2 = vrot.slane %v311_v0, 4  ;;  %v331_v3 = vadd.f32 %v330_v1, %v325_v63 }
 0x158   :  { %v313_v4 = vadd.f32 %v312_v2, %v311_v0  ;;  %v332_v5 = vrot.slane %v331_v3, 4 }
 0x15a   :  { %v314_v6 = vrot.slane %v313_v4, 2  ;;  %v333_v7 = vadd.f32 %v332_v5, %v331_v3 }
 0x15c   :  { %v315_v8 = vadd.f32 %v314_v6, %v313_v4  ;;  %v334_v9 = vrot.slane %v333_v7, 2 }
 0x15e   :  { %v316_v10 = vrot.slane %v315_v8, 1  ;;  %v335_v11 = vadd.f32 %v334_v9, %v333_v7 }
 0x160   :  { %v317_v12 = vadd.f32 %v316_v10, %v315_v8  ;;  %v336_v13 = vrot.slane %v335_v11, 1 }
 0x162   :  { %v318_v14 = vmul.f32 0.02, %v317_v12  ;;  %v337_v15 = vadd.f32 %v336_v13, %v335_v11 }
 0x164   :  { %v338_v16 = vmul.f32 0.02, %v337_v15  ;;  %v339_v17 = vmul.f32 %v318_v14, %v318_v14 }
 0x166   :  { %v340_v18 = vsub.f32 %v338_v16, %v339_v17 }
 0x168   :  { %v341_v19 = vmax.f32 %v340_v18, 0.0 }
 0x16a   :  { %v343_v20 = vadd.f32 1e-05, %v341_v19 }
 0x16c   :  { %591 = vrsqrt.f32 %v343_v20 }
 0x176   :  { %v592_v25 = vpop.eup %591 }
 0x177   :  { %v345_v26 = vmul.f32 %v592_v25, %v342_v23 }
 0x179   :  { %v347_v28 = vmul.f32 %v345_v26, %v318_v14  ;;  %v353_v30 = vrot.slane %v345_v26, %v352_v24 }
 0x17b   :  { %v348_v32 = vsub.f32 %v346_v27, %v347_v28  ;;  %v361_v33 = vmul.f32 %v535_v47, %v353_v30  ;;  %v355_v34 = vmul.f32 %v796_v29, %v353_v30  ;;  %v356_v37 = vmul.f32 %v800_v35, %v353_v30 }
 0x17c   :  { %v357_v38 = vmul.f32 %v523_v45, %v353_v30  ;;  %v358_v39 = vmul.f32 %v526_v53, %v353_v30  ;;  %v359_v40 = vmul.f32 %v798_v31, %v353_v30  ;;  %v360_v41 = vmul.f32 %v802_v36, %v353_v30 }
 0x17d   :  { %v366_v42 = vrot.slane %v348_v32, %v352_v24 }
 0x17f   :  { %v374_v43 = vadd.f32 %v366_v42, %v361_v33  ;;  %v368_v44 = vadd.f32 %v366_v42, %v355_v34  ;;  %v369_v46 = vadd.f32 %v366_v42, %v356_v37  ;;  %v370_v48 = vadd.f32 %v366_v42, %v357_v38 }
 0x180   :  { %v371_v49 = vadd.f32 %v366_v42, %v358_v39  ;;  %v372_v50 = vadd.f32 %v366_v42, %v359_v40  ;;  %v373_v51 = vadd.f32 %v366_v42, %v360_v41 }
 0x181   :  { %v381_v52 = vmul.f32 0.2, %v374_v43  ;;  %v375_v47 = vmul.f32 0.2, %v368_v44  ;;  %v376_v54 = vmul.f32 0.2, %v369_v46 }
 0x182   :  { %v377_v29 = vmul.f32 0.2, %v370_v48  ;;  %v378_v55 = vmul.f32 0.2, %v371_v49  ;;  %v379_v35 = vmul.f32 0.2, %v372_v50 }
 0x183   :  { %v388_v45 = vmax.f32 %v374_v43, %v381_v52  ;;  %v380_v53 = vmul.f32 0.2, %v373_v51  ;;  %v382_v56 = vmax.f32 %v368_v44, %v375_v47  ;;  %v383_v31 = vmax.f32 %v369_v46, %v376_v54 }
 0x184   :  { %v384_v57 = vmax.f32 %v370_v48, %v377_v29  ;;  %v385_v36 = vmax.f32 %v371_v49, %v378_v55  ;;  %v386_v58 = vmax.f32 %v372_v50, %v379_v35 }
 0x185   :  { %v481_v59 = vpack.c.bf16 %v388_v45, %v388_v45  ;;  %v387_v60 = vmax.f32 %v373_v51, %v380_v53  ;;  %v485_v61 = vpack.c.bf16 %v383_v31, %v382_v56 }
 0x186   :  { %v490_v62 = vpack.c.bf16 %v385_v36, %v384_v57 }
 0x187   :  { %424 = vst [vmem:[#allocation10 + $0x18] sm:$0xf] %v481_v59  ;;  %486 = vst [vmem:[#allocation10] sm:$0xff] %v485_v61   ;;  %v495_v63 = vpack.c.bf16 %v387_v60, %v386_v58 }
 0x188   :  { %497 = vst [vmem:[#allocation10 + $0x8] sm:$0xff] %v490_v62  }
 0x189   :  { %498 = vst [vmem:[#allocation10 + $0x10] sm:$0xff] %v495_v63  }
 0x18a   :  { %692 = shalt.err (!%p689_p8)
}
 0x18b   :  { %s693_s19 = scalar_lea.hbm %s839_s4, 448 }
 0x18c   :  { %p694_p9 = scmp.ne.s32.totalorder %s839_s4, %s693_s19  ;;  %p697_p10 = scmp.lt.u32.totalorder %s693_s19, %s839_s4 }
 0x18e   :  { %p699_p11 = pnand %p697_p10, %p694_p9 }
 0x190   :  { %702 = shalt.err (!%p699_p11)
}
 0x191   :  { %436 = dma.vmem_to_hbm [thread:$0]  %s431_s15, 448, %s839_s4, [#allocation4], %s712_s25, %s712_s25, %s713_s26  }
 0x192   :  { %709 = dma.done.wait [#allocation4], 448  }
 0x193   :  { %710 = vsyncadd [#allocation4], 4294966848 }
 0x194   :  { %440 = vsyncpa [#allocation3], 1 }
 0x195   :  { %441 = vsyncpa [#allocation6], 1 }
 0x196   :  { %442 = vsyncpa [#allocation9], 1 }
 0x197   :  { %443 = vsyncpa [#allocation4], 1 }

</bundles_post_ra>
